<compile_context>
chip_gen: v6e
topology: v6e:2x2x1
jax: 0.10.0
libtpu: 0.0.40
codegen_flags: <defaults>
</compile_context>

<pallas_src>
import numpy as np
import jax
import jax.numpy as jnp
from jax import lax
from jax.experimental import pallas as pl
from jax.experimental.pallas import tpu as pltpu

BN_EPS = 1e-5          # PyTorch BatchNorm2d default
LANE = 128             # TPU lane width


def _round_up(x, m):
    return (x + m - 1) // m * m


def _vmem_tile_bytes(shape, dtype):
    """VMEM footprint of one buffer of `shape`, rounded to the (sublane, lane) tile."""
    itemsize = jnp.dtype(dtype).itemsize
    sub = {4: 8, 2: 16, 1: 32}.get(itemsize, 8)
    if len(shape) < 2:
        n = int(np.prod(shape, dtype=np.int64)) if shape else 1
        return _round_up(n, LANE) * itemsize
    lead = int(np.prod(shape[:-2], dtype=np.int64)) if len(shape) > 2 else 1
    return lead * _round_up(shape[-2], sub) * _round_up(shape[-1], LANE) * itemsize


def _vmem_capacity_bytes():
    try:
        return int(pltpu.get_tpu_info().vmem_capacity_bytes)
    except Exception:
        return 64 << 20            # conservative: v7x per-TensorCore physical VMEM


def _vmem_limit(need_bytes, cap_bytes):
    # exact buffer accounting + headroom for Mosaic internal scratch, capped per chip
    limit = need_bytes + max(need_bytes // 2, 4 << 20)
    limit = max(limit, 16 << 20)
    return int(min(limit, max(cap_bytes // 2, 32 << 20)))


# ------------------------------ fused layer -----------------------------------
def _conv_bn_relu_layer(x_nhwc, w_oihw, gamma, beta, out_dtype=jnp.bfloat16):
    """One Conv2d(3x3, pad=1, no bias) -> BatchNorm2d(train) -> ReLU layer.

    x_nhwc: (N, H, W, Cin) bf16.  Returns (N, H, W, Cout) in `out_dtype`.
    """
    N, H, W, Cin = x_nhwc.shape
    Cout = w_oihw.shape[0]
    HW = H * W

    Cin_p = _round_up(Cin, 16)                 # bf16 sublane tile height for the RHS
    Cp = _round_up(Cout, LANE)                 # lane-dense output channels
    CBLK = 256 if Cp % 256 == 0 else LANE      # 256-wide Cout tiles for v6e/v7x MXU
    n_cb = Cp // CBLK
    cap = _vmem_capacity_bytes()

    # ---- prep: single spatial+channel pad of the bf16 activation (1x traffic) ----
    xp = jnp.pad(x_nhwc.astype(jnp.bfloat16),
                 ((0, 0), (1, 1), (1, 1), (0, Cin_p - Cin)))
    Hp2, Wp2 = H + 2, W + 2

    # weight: (Cout, Cin, 3, 3) -> (9, Cin_p, Cp); tap index = 3*ky + kx
    w9 = jnp.transpose(w_oihw, (2, 3, 1, 0))                       # (3,3,Cin,Cout)
    w9 = jnp.pad(w9, ((0, 0), (0, 0), (0, Cin_p - Cin), (0, Cp - Cout)))
    w9 = w9.reshape(9, Cin_p, Cp).astype(jnp.bfloat16)

    gamma_p = jnp.pad(gamma.astype(jnp.float32), (0, Cp - Cout))
    beta_p = jnp.pad(beta.astype(jnp.float32), (0, Cp - Cout))

    # ------------- pass 1: in-kernel 3x3 conv + per-block BN partials -------------
    def conv_stats_kernel(x_ref, w_ref, y_ref, mean_ref, m2_ref):
        acc = None
        for ky in range(3):
            for kx in range(3):
                xs = x_ref[0, ky:ky + H, kx:kx + W, :].reshape(HW, Cin_p)
                t = jnp.dot(xs, w_ref[3 * ky + kx],
                            preferred_element_type=jnp.float32)
                acc = t if acc is None else acc + t
        y_ref[0] = acc.astype(y_ref.dtype)                 # bf16 conv output
        # numerically stable per-block partials (merged with Chan's formula in JAX)
        mean = jnp.sum(acc, axis=0, keepdims=True) * (1.0 / HW)
        d = acc - mean
        mean_ref[0] = mean
        m2_ref[0] = jnp.sum(d * d, axis=0, keepdims=True)

    need1 = (2 * _vmem_tile_bytes((1, Hp2, Wp2, Cin_p), jnp.bfloat16)  # x slab (x2)
             + 1 * _vmem_tile_bytes((9, Cin_p, CBLK), jnp.bfloat16)    # weights (x1)
             + 2 * _vmem_tile_bytes((1, HW, CBLK), jnp.bfloat16)       # y tile (x2)
             + 4 * _vmem_tile_bytes((1, 1, CBLK), jnp.float32))        # mean/M2 (x2 ea)

    y, bmean, bm2 = pl.pallas_call(
        conv_stats_kernel,
        out_shape=(
            jax.ShapeDtypeStruct((N, HW, Cp), jnp.bfloat16),
            jax.ShapeDtypeStruct((N, 1, Cp), jnp.float32),
            jax.ShapeDtypeStruct((N, 1, Cp), jnp.float32),
        ),
        grid=(N, n_cb),
        in_specs=[
            pl.BlockSpec((1, Hp2, Wp2, Cin_p), lambda n, c: (n, 0, 0, 0)),
            pl.BlockSpec((9, Cin_p, CBLK), lambda n, c: (0, 0, c),
                         pipeline_mode=pl.Buffered(1)),     # resident, single-buffered
        ],
        out_specs=(
            pl.BlockSpec((1, HW, CBLK), lambda n, c: (n, 0, c)),
            pl.BlockSpec((1, 1, CBLK), lambda n, c: (n, 0, c)),
            pl.BlockSpec((1, 1, CBLK), lambda n, c: (n, 0, c)),
        ),
        compiler_params=pltpu.CompilerParams(
            dimension_semantics=("parallel", "parallel"),
            vmem_limit_bytes=_vmem_limit(need1, cap),
        ),
    )(xp, w9)

    # ---- tiny JAX reduction: Chan-merge partials -> folded BN scale / shift ----
    means = bmean[:, 0, :]                                  # (N, Cp)
    m2s = bm2[:, 0, :]
    gmean = jnp.mean(means, axis=0)
    gm2 = jnp.sum(m2s, axis=0) + HW * jnp.sum((means - gmean[None, :]) ** 2, axis=0)
    var = gm2 / (N * HW)                                    # biased variance (train BN)
    scale = gamma_p * lax.rsqrt(var + BN_EPS)
    shift = beta_p - gmean * scale

    # ---------------- pass 2: fused normalize + ReLU (elementwise) ----------------
    rows2 = N * HW
    tr_max = 512 if cap <= (64 << 20) else 1024             # v7x: 512; v5e/v6e: 1024
    TR2 = rows2 if rows2 <= tr_max else tr_max
    n_rt = pl.cdiv(rows2, TR2)

    def bn_relu_kernel(y_ref, scale_ref, shift_ref, o_ref):
        yv = y_ref[...].astype(jnp.float32)
        o_ref[...] = jnp.maximum(yv * scale_ref[...] + shift_ref[...],
                                 0.0).astype(o_ref.dtype)

    y2 = y.reshape(rows2, Cp)
    need2 = (2 * _vmem_tile_bytes((TR2, CBLK), jnp.bfloat16)
             + 4 * _vmem_tile_bytes((1, CBLK), jnp.float32)
             + 2 * _vmem_tile_bytes((TR2, CBLK), out_dtype))
    alias = {0: 0} if jnp.dtype(out_dtype) == jnp.dtype(jnp.bfloat16) else {}

    out2 = pl.pallas_call(
        bn_relu_kernel,
        out_shape=jax.ShapeDtypeStruct((rows2, Cp), out_dtype),
        grid=(n_rt, n_cb),
        in_specs=[
            pl.BlockSpec((TR2, CBLK), lambda r, c: (r, c)),
            pl.BlockSpec((1, CBLK), lambda r, c: (0, c)),
            pl.BlockSpec((1, CBLK), lambda r, c: (0, c)),
        ],
        out_specs=pl.BlockSpec((TR2, CBLK), lambda r, c: (r, c)),
        input_output_aliases=alias,                         # reuse y's buffer in place
        compiler_params=pltpu.CompilerParams(
            dimension_semantics=("parallel", "parallel"),
            vmem_limit_bytes=_vmem_limit(need2, cap),
        ),
    )(y2, scale.reshape(1, Cp), shift.reshape(1, Cp))

    return out2[:, :Cout].reshape(N, H, W, Cout)


# ------------------------------ parameters / model -----------------------------
def init_convblock_params(key, in_channels, out_channels, nb_layers=2):
    """Deterministic synthetic parameters (PyTorch shapes: conv W (Cout,Cin,3,3))."""
    params = []
    cin = in_channels
    for _ in range(nb_layers):
        key, k1, k2, k3, k4 = jax.random.split(key, 5)
        fan_in = cin * 9
        bound = 1.0 / np.sqrt(fan_in)
        w = jax.random.uniform(k1, (out_channels, cin, 3, 3), jnp.float32, -bound, bound)
        b = jax.random.uniform(k2, (out_channels,), jnp.float32, -bound, bound)
        gamma = jax.random.uniform(k3, (out_channels,), jnp.float32, 0.5, 1.5)
        beta = jax.random.uniform(k4, (out_channels,), jnp.float32, -0.5, 0.5)
        params.append((w, b, gamma, beta))
        cin = out_channels
    return params


def convblock_forward(x_nchw, params):
    """ConvBlock.forward — sequence of fused Pallas conv+bn+relu layers. NCHW in/out."""
    x = jnp.transpose(x_nchw, (0, 2, 3, 1)).astype(jnp.bfloat16)   # NCHW -> NHWC bf16
    for li, (w, _b, gamma, beta) in enumerate(params):
        # _b (conv bias) is intentionally unused: it cancels exactly under
        # training-mode BatchNorm (mean subtraction), so it never reaches the kernels.
        last = li == len(params) - 1
        x = _conv_bn_relu_layer(
            x, w, gamma, beta,
            out_dtype=jnp.float32 if last else jnp.bfloat16)
    return jnp.transpose(x, (0, 3, 1, 2))                           # NHWC -> NCHW
    # TODO(synk): BatchNorm running-stat updates (training side effect) are not
    # modeled; they do not affect the forward output.


def convblock_reference(x_nchw, params):
    """Pure-JAX f32 reference matching PyTorch training-mode forward semantics."""
    x = x_nchw
    for (w, b, gamma, beta) in params:
        y = lax.conv_general_dilated(
            x, w, window_strides=(1, 1), padding=((1, 1), (1, 1)),
            dimension_numbers=("NCHW", "OIHW", "NCHW"),
        )
        y = y + b[None, :, None, None]
        mean = jnp.mean(y, axis=(0, 2, 3), keepdims=True)
        var = jnp.mean((y - mean) ** 2, axis=(0, 2, 3), keepdims=True)
        y = (y - mean) * lax.rsqrt(var + BN_EPS) * gamma[None, :, None, None] \
            + beta[None, :, None, None]
        x = jnp.maximum(y, 0.0)
    return x


# --------------------------------- main ----------------------------------------
if __name__ == "__main__":
    key = jax.random.PRNGKey(0)
    key_x, key_p = jax.random.split(key)

    N, CIN, COUT, H, W = 2, 4, 8, 16, 16
    x = jax.random.normal(key_x, (N, CIN, H, W), jnp.float32)
    params = init_convblock_params(key_p, CIN, COUT, nb_layers=2)

    fwd = jax.jit(convblock_forward)
    out = jax.block_until_ready(fwd(x, params))

    ref = jax.block_until_ready(convblock_reference(x, params))
    assert out.shape == (N, COUT, H, W), out.shape
    err = jnp.abs(out - ref)
    max_err = float(jnp.max(err))
    mean_err = float(jnp.mean(err))
    # Tolerance accounts for bf16 MXU operands and bf16 intermediate activations /
    # conv outputs (intentional per perf review); BN statistics and the normalize
    # epilogue run in f32 and the final layer writes f32.
    assert max_err < 1e-1, f"mismatch vs reference: max abs err = {max_err}"
    assert mean_err < 2.5e-2, f"mismatch vs reference: mean abs err = {mean_err}"

    print("KERNEL_OK")
</pallas_src>

<mosaic_0001>
module attributes {stable_mosaic.version = 11 : i64} {
  func.func @conv_stats_kernel(%arg0: i32, %arg1: i32, %arg2: memref<1x18x18x16xbf16, #tpu.memory_space<vmem>>, %arg3: memref<9x16x128xbf16, #tpu.memory_space<vmem>>, %arg4: memref<1x256x128xbf16, #tpu.memory_space<vmem>>, %arg5: memref<1x1x128xf32, #tpu.memory_space<vmem>>, %arg6: memref<1x1x128xf32, #tpu.memory_space<vmem>>) attributes {dimension_semantics = [#tpu.dimension_semantics<parallel>, #tpu.dimension_semantics<parallel>], iteration_bounds = array<i64: 2, 1>, scalar_prefetch = 0 : i64, scratch_operands = 0 : i64, tpu.core_type = #tpu.core_type<tc>, window_params = [{transform_indices = @transform_0, window_bounds = array<i64: 1, 18, 18, 16>}, {pipeline_mode = #tpu.pipeline_mode<synchronous>, transform_indices = @transform_1, window_bounds = array<i64: 9, 16, 128>}, {transform_indices = @transform_2, window_bounds = array<i64: 1, 256, 128>}, {transform_indices = @transform_3, window_bounds = array<i64: 1, 1, 128>}, {transform_indices = @transform_4, window_bounds = array<i64: 1, 1, 128>}]} {
    %c0 = arith.constant 0 : index
    %c0_0 = arith.constant 0 : index
    %c0_1 = arith.constant 0 : index
    %c0_2 = arith.constant 0 : index
    %0 = vector.load %arg2[%c0, %c0_0, %c0_1, %c0_2] : memref<1x18x18x16xbf16, #tpu.memory_space<vmem>>, vector<1x16x16x16xbf16>
    %1 = vector.shape_cast %0 : vector<1x16x16x16xbf16> to vector<16x16x16xbf16>
    %2 = vector.shape_cast %1 : vector<16x16x16xbf16> to vector<256x16xbf16>
    %c0_3 = arith.constant 0 : index
    %c0_4 = arith.constant 0 : index
    %c0_5 = arith.constant 0 : index
    %3 = vector.load %arg3[%c0_3, %c0_4, %c0_5] : memref<9x16x128xbf16, #tpu.memory_space<vmem>>, vector<1x16x128xbf16>
    %4 = vector.shape_cast %3 : vector<1x16x128xbf16> to vector<16x128xbf16>
    %cst = arith.constant dense<0.000000e+00> : vector<256x128xf32>
    %5 = tpu.matmul %2, %4, %cst {dimension_numbers = #tpu.dot_dimension_numbers<[1], [0], [0], [1], [0, 0, 1, 1], [], []>} : vector<256x16xbf16>, vector<16x128xbf16>, vector<256x128xf32> -> vector<256x128xf32>
    %c0_6 = arith.constant 0 : index
    %c0_7 = arith.constant 0 : index
    %c1 = arith.constant 1 : index
    %c0_8 = arith.constant 0 : index
    %6 = vector.load %arg2[%c0_6, %c0_7, %c1, %c0_8] : memref<1x18x18x16xbf16, #tpu.memory_space<vmem>>, vector<1x16x16x16xbf16>
    %7 = vector.shape_cast %6 : vector<1x16x16x16xbf16> to vector<16x16x16xbf16>
    %8 = vector.shape_cast %7 : vector<16x16x16xbf16> to vector<256x16xbf16>
    %c1_9 = arith.constant 1 : index
    %c0_10 = arith.constant 0 : index
    %c0_11 = arith.constant 0 : index
    %9 = vector.load %arg3[%c1_9, %c0_10, %c0_11] : memref<9x16x128xbf16, #tpu.memory_space<vmem>>, vector<1x16x128xbf16>
    %10 = vector.shape_cast %9 : vector<1x16x128xbf16> to vector<16x128xbf16>
    %cst_12 = arith.constant dense<0.000000e+00> : vector<256x128xf32>
    %11 = tpu.matmul %8, %10, %cst_12 {dimension_numbers = #tpu.dot_dimension_numbers<[1], [0], [0], [1], [0, 0, 1, 1], [], []>} : vector<256x16xbf16>, vector<16x128xbf16>, vector<256x128xf32> -> vector<256x128xf32>
    %12 = arith.addf %5, %11 : vector<256x128xf32>
    %c0_13 = arith.constant 0 : index
    %c0_14 = arith.constant 0 : index
    %c2 = arith.constant 2 : index
    %c0_15 = arith.constant 0 : index
    %13 = vector.load %arg2[%c0_13, %c0_14, %c2, %c0_15] : memref<1x18x18x16xbf16, #tpu.memory_space<vmem>>, vector<1x16x16x16xbf16>
    %14 = vector.shape_cast %13 : vector<1x16x16x16xbf16> to vector<16x16x16xbf16>
    %15 = vector.shape_cast %14 : vector<16x16x16xbf16> to vector<256x16xbf16>
    %c2_16 = arith.constant 2 : index
    %c0_17 = arith.constant 0 : index
    %c0_18 = arith.constant 0 : index
    %16 = vector.load %arg3[%c2_16, %c0_17, %c0_18] : memref<9x16x128xbf16, #tpu.memory_space<vmem>>, vector<1x16x128xbf16>
    %17 = vector.shape_cast %16 : vector<1x16x128xbf16> to vector<16x128xbf16>
    %cst_19 = arith.constant dense<0.000000e+00> : vector<256x128xf32>
    %18 = tpu.matmul %15, %17, %cst_19 {dimension_numbers = #tpu.dot_dimension_numbers<[1], [0], [0], [1], [0, 0, 1, 1], [], []>} : vector<256x16xbf16>, vector<16x128xbf16>, vector<256x128xf32> -> vector<256x128xf32>
    %19 = arith.addf %12, %18 : vector<256x128xf32>
    %c0_20 = arith.constant 0 : index
    %c1_21 = arith.constant 1 : index
    %c0_22 = arith.constant 0 : index
    %c0_23 = arith.constant 0 : index
    %20 = vector.load %arg2[%c0_20, %c1_21, %c0_22, %c0_23] : memref<1x18x18x16xbf16, #tpu.memory_space<vmem>>, vector<1x16x16x16xbf16>
    %21 = vector.shape_cast %20 : vector<1x16x16x16xbf16> to vector<16x16x16xbf16>
    %22 = vector.shape_cast %21 : vector<16x16x16xbf16> to vector<256x16xbf16>
    %c3 = arith.constant 3 : index
    %c0_24 = arith.constant 0 : index
    %c0_25 = arith.constant 0 : index
    %23 = vector.load %arg3[%c3, %c0_24, %c0_25] : memref<9x16x128xbf16, #tpu.memory_space<vmem>>, vector<1x16x128xbf16>
    %24 = vector.shape_cast %23 : vector<1x16x128xbf16> to vector<16x128xbf16>
    %cst_26 = arith.constant dense<0.000000e+00> : vector<256x128xf32>
    %25 = tpu.matmul %22, %24, %cst_26 {dimension_numbers = #tpu.dot_dimension_numbers<[1], [0], [0], [1], [0, 0, 1, 1], [], []>} : vector<256x16xbf16>, vector<16x128xbf16>, vector<256x128xf32> -> vector<256x128xf32>
    %26 = arith.addf %19, %25 : vector<256x128xf32>
    %c0_27 = arith.constant 0 : index
    %c1_28 = arith.constant 1 : index
    %c1_29 = arith.constant 1 : index
    %c0_30 = arith.constant 0 : index
    %27 = vector.load %arg2[%c0_27, %c1_28, %c1_29, %c0_30] : memref<1x18x18x16xbf16, #tpu.memory_space<vmem>>, vector<1x16x16x16xbf16>
    %28 = vector.shape_cast %27 : vector<1x16x16x16xbf16> to vector<16x16x16xbf16>
    %29 = vector.shape_cast %28 : vector<16x16x16xbf16> to vector<256x16xbf16>
    %c4 = arith.constant 4 : index
    %c0_31 = arith.constant 0 : index
    %c0_32 = arith.constant 0 : index
    %30 = vector.load %arg3[%c4, %c0_31, %c0_32] : memref<9x16x128xbf16, #tpu.memory_space<vmem>>, vector<1x16x128xbf16>
    %31 = vector.shape_cast %30 : vector<1x16x128xbf16> to vector<16x128xbf16>
    %cst_33 = arith.constant dense<0.000000e+00> : vector<256x128xf32>
    %32 = tpu.matmul %29, %31, %cst_33 {dimension_numbers = #tpu.dot_dimension_numbers<[1], [0], [0], [1], [0, 0, 1, 1], [], []>} : vector<256x16xbf16>, vector<16x128xbf16>, vector<256x128xf32> -> vector<256x128xf32>
    %33 = arith.addf %26, %32 : vector<256x128xf32>
    %c0_34 = arith.constant 0 : index
    %c1_35 = arith.constant 1 : index
    %c2_36 = arith.constant 2 : index
    %c0_37 = arith.constant 0 : index
    %34 = vector.load %arg2[%c0_34, %c1_35, %c2_36, %c0_37] : memref<1x18x18x16xbf16, #tpu.memory_space<vmem>>, vector<1x16x16x16xbf16>
    %35 = vector.shape_cast %34 : vector<1x16x16x16xbf16> to vector<16x16x16xbf16>
    %36 = vector.shape_cast %35 : vector<16x16x16xbf16> to vector<256x16xbf16>
    %c5 = arith.constant 5 : index
    %c0_38 = arith.constant 0 : index
    %c0_39 = arith.constant 0 : index
    %37 = vector.load %arg3[%c5, %c0_38, %c0_39] : memref<9x16x128xbf16, #tpu.memory_space<vmem>>, vector<1x16x128xbf16>
    %38 = vector.shape_cast %37 : vector<1x16x128xbf16> to vector<16x128xbf16>
    %cst_40 = arith.constant dense<0.000000e+00> : vector<256x128xf32>
    %39 = tpu.matmul %36, %38, %cst_40 {dimension_numbers = #tpu.dot_dimension_numbers<[1], [0], [0], [1], [0, 0, 1, 1], [], []>} : vector<256x16xbf16>, vector<16x128xbf16>, vector<256x128xf32> -> vector<256x128xf32>
    %40 = arith.addf %33, %39 : vector<256x128xf32>
    %c0_41 = arith.constant 0 : index
    %c2_42 = arith.constant 2 : index
    %c0_43 = arith.constant 0 : index
    %c0_44 = arith.constant 0 : index
    %41 = vector.load %arg2[%c0_41, %c2_42, %c0_43, %c0_44] : memref<1x18x18x16xbf16, #tpu.memory_space<vmem>>, vector<1x16x16x16xbf16>
    %42 = vector.shape_cast %41 : vector<1x16x16x16xbf16> to vector<16x16x16xbf16>
    %43 = vector.shape_cast %42 : vector<16x16x16xbf16> to vector<256x16xbf16>
    %c6 = arith.constant 6 : index
    %c0_45 = arith.constant 0 : index
    %c0_46 = arith.constant 0 : index
    %44 = vector.load %arg3[%c6, %c0_45, %c0_46] : memref<9x16x128xbf16, #tpu.memory_space<vmem>>, vector<1x16x128xbf16>
    %45 = vector.shape_cast %44 : vector<1x16x128xbf16> to vector<16x128xbf16>
    %cst_47 = arith.constant dense<0.000000e+00> : vector<256x128xf32>
    %46 = tpu.matmul %43, %45, %cst_47 {dimension_numbers = #tpu.dot_dimension_numbers<[1], [0], [0], [1], [0, 0, 1, 1], [], []>} : vector<256x16xbf16>, vector<16x128xbf16>, vector<256x128xf32> -> vector<256x128xf32>
    %47 = arith.addf %40, %46 : vector<256x128xf32>
    %c0_48 = arith.constant 0 : index
    %c2_49 = arith.constant 2 : index
    %c1_50 = arith.constant 1 : index
    %c0_51 = arith.constant 0 : index
    %48 = vector.load %arg2[%c0_48, %c2_49, %c1_50, %c0_51] : memref<1x18x18x16xbf16, #tpu.memory_space<vmem>>, vector<1x16x16x16xbf16>
    %49 = vector.shape_cast %48 : vector<1x16x16x16xbf16> to vector<16x16x16xbf16>
    %50 = vector.shape_cast %49 : vector<16x16x16xbf16> to vector<256x16xbf16>
    %c7 = arith.constant 7 : index
    %c0_52 = arith.constant 0 : index
    %c0_53 = arith.constant 0 : index
    %51 = vector.load %arg3[%c7, %c0_52, %c0_53] : memref<9x16x128xbf16, #tpu.memory_space<vmem>>, vector<1x16x128xbf16>
    %52 = vector.shape_cast %51 : vector<1x16x128xbf16> to vector<16x128xbf16>
    %cst_54 = arith.constant dense<0.000000e+00> : vector<256x128xf32>
    %53 = tpu.matmul %50, %52, %cst_54 {dimension_numbers = #tpu.dot_dimension_numbers<[1], [0], [0], [1], [0, 0, 1, 1], [], []>} : vector<256x16xbf16>, vector<16x128xbf16>, vector<256x128xf32> -> vector<256x128xf32>
    %54 = arith.addf %47, %53 : vector<256x128xf32>
    %c0_55 = arith.constant 0 : index
    %c2_56 = arith.constant 2 : index
    %c2_57 = arith.constant 2 : index
    %c0_58 = arith.constant 0 : index
    %55 = vector.load %arg2[%c0_55, %c2_56, %c2_57, %c0_58] : memref<1x18x18x16xbf16, #tpu.memory_space<vmem>>, vector<1x16x16x16xbf16>
    %56 = vector.shape_cast %55 : vector<1x16x16x16xbf16> to vector<16x16x16xbf16>
    %57 = vector.shape_cast %56 : vector<16x16x16xbf16> to vector<256x16xbf16>
    %c8 = arith.constant 8 : index
    %c0_59 = arith.constant 0 : index
    %c0_60 = arith.constant 0 : index
    %58 = vector.load %arg3[%c8, %c0_59, %c0_60] : memref<9x16x128xbf16, #tpu.memory_space<vmem>>, vector<1x16x128xbf16>
    %59 = vector.shape_cast %58 : vector<1x16x128xbf16> to vector<16x128xbf16>
    %cst_61 = arith.constant dense<0.000000e+00> : vector<256x128xf32>
    %60 = tpu.matmul %57, %59, %cst_61 {dimension_numbers = #tpu.dot_dimension_numbers<[1], [0], [0], [1], [0, 0, 1, 1], [], []>} : vector<256x16xbf16>, vector<16x128xbf16>, vector<256x128xf32> -> vector<256x128xf32>
    %61 = arith.addf %54, %60 : vector<256x128xf32>
    %62 = arith.truncf %61 : vector<256x128xf32> to vector<256x128xbf16>
    %c0_62 = arith.constant 0 : index
    %c0_63 = arith.constant 0 : index
    %c0_64 = arith.constant 0 : index
    %63 = vector.load %arg4[%c0_62, %c0_63, %c0_64] : memref<1x256x128xbf16, #tpu.memory_space<vmem>>, vector<1x256x128xbf16>
    %64 = vector.shape_cast %63 : vector<1x256x128xbf16> to vector<256x128xbf16>
    %65 = vector.shape_cast %62 : vector<256x128xbf16> to vector<1x256x128xbf16>
    tpu.vector_store %arg4[%c0_62, %c0_63, %c0_64], %65 {strides = array<i32>} : memref<1x256x128xbf16, #tpu.memory_space<vmem>>, vector<1x256x128xbf16>,
    %cst_65 = arith.constant dense<0.000000e+00> : vector<128xf32>
    %66 = vector.multi_reduction <add>, %61, %cst_65 [0] : vector<256x128xf32> to vector<128xf32>
    %67 = vector.shape_cast %66 : vector<128xf32> to vector<1x128xf32>
    %cst_66 = arith.constant 3.906250e-03 : f32
    %68 = vector.broadcast %cst_66 : f32 to vector<1x128xf32>
    %69 = arith.mulf %67, %68 : vector<1x128xf32>
    %70 = vector.broadcast %69 : vector<1x128xf32> to vector<256x128xf32>
    %71 = arith.subf %61, %70 : vector<256x128xf32>
    %c0_67 = arith.constant 0 : index
    %c0_68 = arith.constant 0 : index
    %c0_69 = arith.constant 0 : index
    %72 = vector.load %arg5[%c0_67, %c0_68, %c0_69] : memref<1x1x128xf32, #tpu.memory_space<vmem>>, vector<1x1x128xf32>
    %73 = vector.shape_cast %72 : vector<1x1x128xf32> to vector<1x128xf32>
    %74 = vector.shape_cast %69 : vector<1x128xf32> to vector<1x1x128xf32>
    tpu.vector_store %arg5[%c0_67, %c0_68, %c0_69], %74 {strides = array<i32>} : memref<1x1x128xf32, #tpu.memory_space<vmem>>, vector<1x1x128xf32>,
    %75 = arith.mulf %71, %71 : vector<256x128xf32>
    %cst_70 = arith.constant dense<0.000000e+00> : vector<128xf32>
    %76 = vector.multi_reduction <add>, %75, %cst_70 [0] : vector<256x128xf32> to vector<128xf32>
    %77 = vector.shape_cast %76 : vector<128xf32> to vector<1x128xf32>
    %c0_71 = arith.constant 0 : index
    %c0_72 = arith.constant 0 : index
    %c0_73 = arith.constant 0 : index
    %78 = vector.load %arg6[%c0_71, %c0_72, %c0_73] : memref<1x1x128xf32, #tpu.memory_space<vmem>>, vector<1x1x128xf32>
    %79 = vector.shape_cast %78 : vector<1x1x128xf32> to vector<1x128xf32>
    %80 = vector.shape_cast %77 : vector<1x128xf32> to vector<1x1x128xf32>
    tpu.vector_store %arg6[%c0_71, %c0_72, %c0_73], %80 {strides = array<i32>} : memref<1x1x128xf32, #tpu.memory_space<vmem>>, vector<1x1x128xf32>,
    return
  }
  func.func @transform_0(%arg0: i32, %arg1: i32) -> (i32, i32, i32, i32) {
    %c0_i32 = arith.constant 0 : i32
    %c0_i32_0 = arith.constant 0 : i32
    %c0_i32_1 = arith.constant 0 : i32
    %c0_i32_2 = arith.constant 0 : i32
    return %arg0, %c0_i32, %c0_i32_0, %c0_i32_1 : i32, i32, i32, i32
  }
  func.func @transform_1(%arg0: i32, %arg1: i32) -> (i32, i32, i32) {
    %c0_i32 = arith.constant 0 : i32
    %c0_i32_0 = arith.constant 0 : i32
    %c0_i32_1 = arith.constant 0 : i32
    return %c0_i32, %c0_i32_0, %arg1 : i32, i32, i32
  }
  func.func @transform_2(%arg0: i32, %arg1: i32) -> (i32, i32, i32) {
    %c0_i32 = arith.constant 0 : i32
    %c0_i32_0 = arith.constant 0 : i32
    return %arg0, %c0_i32, %arg1 : i32, i32, i32
  }
  func.func @transform_3(%arg0: i32, %arg1: i32) -> (i32, i32, i32) {
    %c0_i32 = arith.constant 0 : i32
    %c0_i32_0 = arith.constant 0 : i32
    return %arg0, %c0_i32, %arg1 : i32, i32, i32
  }
  func.func @transform_4(%arg0: i32, %arg1: i32) -> (i32, i32, i32) {
    %c0_i32 = arith.constant 0 : i32
    %c0_i32_0 = arith.constant 0 : i32
    return %arg0, %c0_i32, %arg1 : i32, i32, i32
  }
}

module attributes {stable_mosaic.version = 11 : i64} {
  func.func @bn_relu_kernel(%arg0: i32, %arg1: i32, %arg2: memref<512x128xbf16, #tpu.memory_space<vmem>>, %arg3: memref<1x128xf32, #tpu.memory_space<vmem>>, %arg4: memref<1x128xf32, #tpu.memory_space<vmem>>, %arg5: memref<512x128xbf16, #tpu.memory_space<vmem>>) attributes {dimension_semantics = [#tpu.dimension_semantics<parallel>, #tpu.dimension_semantics<parallel>], iteration_bounds = array<i64: 1, 1>, scalar_prefetch = 0 : i64, scratch_operands = 0 : i64, tpu.core_type = #tpu.core_type<tc>, window_params = [{transform_indices = @transform_0, window_bounds = array<i64: 512, 128>}, {transform_indices = @transform_1, window_bounds = array<i64: 1, 128>}, {transform_indices = @transform_2, window_bounds = array<i64: 1, 128>}, {transform_indices = @transform_3, window_bounds = array<i64: 512, 128>}]} {
    %c0 = arith.constant 0 : index
    %c0_0 = arith.constant 0 : index
    %0 = vector.load %arg2[%c0, %c0_0] : memref<512x128xbf16, #tpu.memory_space<vmem>>, vector<512x128xbf16>
    %1 = arith.extf %0 : vector<512x128xbf16> to vector<512x128xf32>
    %c0_1 = arith.constant 0 : index
    %c0_2 = arith.constant 0 : index
    %2 = vector.load %arg3[%c0_1, %c0_2] : memref<1x128xf32, #tpu.memory_space<vmem>>, vector<1x128xf32>
    %3 = vector.broadcast %2 : vector<1x128xf32> to vector<512x128xf32>
    %4 = arith.mulf %1, %3 : vector<512x128xf32>
    %c0_3 = arith.constant 0 : index
    %c0_4 = arith.constant 0 : index
    %5 = vector.load %arg4[%c0_3, %c0_4] : memref<1x128xf32, #tpu.memory_space<vmem>>, vector<1x128xf32>
    %6 = vector.broadcast %5 : vector<1x128xf32> to vector<512x128xf32>
    %7 = arith.addf %4, %6 : vector<512x128xf32>
    %cst = arith.constant 0.000000e+00 : f32
    %8 = vector.broadcast %cst : f32 to vector<512x128xf32>
    %9 = arith.maximumf %7, %8 : vector<512x128xf32>
    %10 = arith.truncf %9 : vector<512x128xf32> to vector<512x128xbf16>
    %c0_5 = arith.constant 0 : index
    %c0_6 = arith.constant 0 : index
    %11 = vector.load %arg5[%c0_5, %c0_6] : memref<512x128xbf16, #tpu.memory_space<vmem>>, vector<512x128xbf16>
    tpu.vector_store %arg5[%c0_5, %c0_6], %10 {strides = array<i32>} : memref<512x128xbf16, #tpu.memory_space<vmem>>, vector<512x128xbf16>,
    return
  }
  func.func @transform_0(%arg0: i32, %arg1: i32) -> (i32, i32) {
    %c0_i32 = arith.constant 0 : i32
    return %arg0, %arg1 : i32, i32
  }
  func.func @transform_1(%arg0: i32, %arg1: i32) -> (i32, i32) {
    %c0_i32 = arith.constant 0 : i32
    %c0_i32_0 = arith.constant 0 : i32
    return %c0_i32, %arg1 : i32, i32
  }
  func.func @transform_2(%arg0: i32, %arg1: i32) -> (i32, i32) {
    %c0_i32 = arith.constant 0 : i32
    %c0_i32_0 = arith.constant 0 : i32
    return %c0_i32, %arg1 : i32, i32
  }
  func.func @transform_3(%arg0: i32, %arg1: i32) -> (i32, i32) {
    %c0_i32 = arith.constant 0 : i32
    return %arg0, %arg1 : i32, i32
  }
}

module attributes {stable_mosaic.version = 11 : i64} {
  func.func @bn_relu_kernel(%arg0: i32, %arg1: i32, %arg2: memref<512x128xbf16, #tpu.memory_space<vmem>>, %arg3: memref<1x128xf32, #tpu.memory_space<vmem>>, %arg4: memref<1x128xf32, #tpu.memory_space<vmem>>, %arg5: memref<512x128xf32, #tpu.memory_space<vmem>>) attributes {dimension_semantics = [#tpu.dimension_semantics<parallel>, #tpu.dimension_semantics<parallel>], iteration_bounds = array<i64: 1, 1>, scalar_prefetch = 0 : i64, scratch_operands = 0 : i64, tpu.core_type = #tpu.core_type<tc>, window_params = [{transform_indices = @transform_0, window_bounds = array<i64: 512, 128>}, {transform_indices = @transform_1, window_bounds = array<i64: 1, 128>}, {transform_indices = @transform_2, window_bounds = array<i64: 1, 128>}, {transform_indices = @transform_3, window_bounds = array<i64: 512, 128>}]} {
    %c0 = arith.constant 0 : index
    %c0_0 = arith.constant 0 : index
    %0 = vector.load %arg2[%c0, %c0_0] : memref<512x128xbf16, #tpu.memory_space<vmem>>, vector<512x128xbf16>
    %1 = arith.extf %0 : vector<512x128xbf16> to vector<512x128xf32>
    %c0_1 = arith.constant 0 : index
    %c0_2 = arith.constant 0 : index
    %2 = vector.load %arg3[%c0_1, %c0_2] : memref<1x128xf32, #tpu.memory_space<vmem>>, vector<1x128xf32>
    %3 = vector.broadcast %2 : vector<1x128xf32> to vector<512x128xf32>
    %4 = arith.mulf %1, %3 : vector<512x128xf32>
    %c0_3 = arith.constant 0 : index
    %c0_4 = arith.constant 0 : index
    %5 = vector.load %arg4[%c0_3, %c0_4] : memref<1x128xf32, #tpu.memory_space<vmem>>, vector<1x128xf32>
    %6 = vector.broadcast %5 : vector<1x128xf32> to vector<512x128xf32>
    %7 = arith.addf %4, %6 : vector<512x128xf32>
    %cst = arith.constant 0.000000e+00 : f32
    %8 = vector.broadcast %cst : f32 to vector<512x128xf32>
    %9 = arith.maximumf %7, %8 : vector<512x128xf32>
    %c0_5 = arith.constant 0 : index
    %c0_6 = arith.constant 0 : index
    %10 = vector.load %arg5[%c0_5, %c0_6] : memref<512x128xf32, #tpu.memory_space<vmem>>, vector<512x128xf32>
    tpu.vector_store %arg5[%c0_5, %c0_6], %9 {strides = array<i32>} : memref<512x128xf32, #tpu.memory_space<vmem>>, vector<512x128xf32>,
    return
  }
  func.func @transform_0(%arg0: i32, %arg1: i32) -> (i32, i32) {
    %c0_i32 = arith.constant 0 : i32
    return %arg0, %arg1 : i32, i32
  }
  func.func @transform_1(%arg0: i32, %arg1: i32) -> (i32, i32) {
    %c0_i32 = arith.constant 0 : i32
    %c0_i32_0 = arith.constant 0 : i32
    return %c0_i32, %arg1 : i32, i32
  }
  func.func @transform_2(%arg0: i32, %arg1: i32) -> (i32, i32) {
    %c0_i32 = arith.constant 0 : i32
    %c0_i32_0 = arith.constant 0 : i32
    return %c0_i32, %arg1 : i32, i32
  }
  func.func @transform_3(%arg0: i32, %arg1: i32) -> (i32, i32) {
    %c0_i32 = arith.constant 0 : i32
    return %arg0, %arg1 : i32, i32
  }
}

</mosaic_0001>

<bundles_post_ra>
// kernel: convblock_forward.5
= control target key start
LH: loop header
LB: loop body
LE: loop exit
PB: predicated region body
PF: predicated region fallthrough
CT: control target
= control target key end

     0   :  { %s1502_s0 = inlined_call_operand.vmem [shape: bf16[512,128], index: 0, kind: input, shape index: {}, may-alias: {0,3}]   ;;  %s1503_s1 = inlined_call_operand.vmem [shape: f32[1,128], index: 1, kind: input, shape index: {}]   ;;  %s1504_s2 = inlined_call_operand.vmem [shape: f32[1,128], index: 2, kind: input, shape index: {}]   ;;  %s1505_s3 = inlined_call_operand.vmem [shape: bf16[512,128], index: 3, kind: output, shape index: {}, may-alias: {0,3}]  }
   0x1   :  { %v803_v0 = vld [vmem:[%s1502_s0] sm:$0xff]   ;;  %v1090_v4 = vld [vmem:[%s1502_s0 + $0x8] sm:$0xff]   ;;  %v1091_v5 = vld [vmem:[%s1502_s0 + $0x10] sm:$0xff]  }
   0x2   :  { %v1178_v1 = vld [vmem:[%s1503_s1] ss:$0 sm:$0xff]  ;;  %v804_v2 = vunpack.c.l.bf16 %v803_v0  ;;  %v805_v3 = vunpack.c.h.bf16 %v803_v0  ;;  %v1092_v6 = vld [vmem:[%s1502_s0 + $0x18] sm:$0xff]   ;;  %v808_v8 = vunpack.c.l.bf16 %v1090_v4  ;;  %v809_v9 = vunpack.c.h.bf16 %v1090_v4  ;;  %v1094_v33 = vld [vmem:[%s1502_s0 + $0x28] sm:$0xff]  }
   0x3   :  { %v1192_v7 = vld [vmem:[%s1504_s2] ss:$0 sm:$0xff]  ;;  %v812_v10 = vunpack.c.l.bf16 %v1091_v5  ;;  %v813_v11 = vunpack.c.h.bf16 %v1091_v5  ;;  %v816_v14 = vunpack.c.l.bf16 %v1092_v6  ;;  %v817_v15 = vunpack.c.h.bf16 %v1092_v6  ;;  %v1095_v38 = vld [vmem:[%s1502_s0 + $0x30] sm:$0xff]   ;;  %v1096_v43 = vld [vmem:[%s1502_s0 + $0x38] sm:$0xff]  }
   0x4   :  { %v149_v12 = vmul.f32 %v804_v2, %v1178_v1  ;;  %v150_v13 = vmul.f32 %v805_v3, %v1178_v1  ;;  %v151_v16 = vmul.f32 %v808_v8, %v1178_v1  ;;  %v152_v17 = vmul.f32 %v809_v9, %v1178_v1  ;;  %v1093_v28 = vld [vmem:[%s1502_s0 + $0x20] sm:$0xff]  }
   0x5   :  { %v153_v18 = vmul.f32 %v812_v10, %v1178_v1  ;;  %v154_v19 = vmul.f32 %v813_v11, %v1178_v1  ;;  %v155_v22 = vmul.f32 %v816_v14, %v1178_v1  ;;  %v156_v23 = vmul.f32 %v817_v15, %v1178_v1 }
   0x6   :  { %v220_v20 = vadd.f32 %v1192_v7, %v149_v12  ;;  %v221_v21 = vadd.f32 %v1192_v7, %v150_v13  ;;  %v222_v24 = vadd.f32 %v1192_v7, %v151_v16  ;;  %v223_v25 = vadd.f32 %v1192_v7, %v152_v17 }
   0x7   :  { %v224_v26 = vadd.f32 %v1192_v7, %v153_v18  ;;  %v225_v27 = vadd.f32 %v1192_v7, %v154_v19  ;;  %v226_v31 = vadd.f32 %v1192_v7, %v155_v22  ;;  %v227_v32 = vadd.f32 %v1192_v7, %v156_v23 }
   0x8   :  { %v284_v29 = vmax.f32 %v220_v20, 0.0  ;;  %v285_v30 = vmax.f32 %v221_v21, 0.0  ;;  %v286_v34 = vmax.f32 %v222_v24, 0.0  ;;  %v287_v35 = vmax.f32 %v223_v25, 0.0 }
   0x9   :  { %v288_v36 = vmax.f32 %v224_v26, 0.0  ;;  %v289_v37 = vmax.f32 %v225_v27, 0.0  ;;  %v290_v40 = vmax.f32 %v226_v31, 0.0  ;;  %v291_v41 = vmax.f32 %v227_v32, 0.0 }
   0xa   :  { %v933_v39 = vpack.c.bf16 %v285_v30, %v284_v29  ;;  %v820_v42 = vunpack.c.l.bf16 %v1093_v28  ;;  %v938_v44 = vpack.c.bf16 %v287_v35, %v286_v34  ;;  %v821_v46 = vunpack.c.h.bf16 %v1093_v28 }
   0xb   :  { %v943_v45 = vpack.c.bf16 %v289_v37, %v288_v36  ;;  %v824_v47 = vunpack.c.l.bf16 %v1094_v33  ;;  %v948_v48 = vpack.c.bf16 %v291_v41, %v290_v40  ;;  %v825_v50 = vunpack.c.h.bf16 %v1094_v33 }
   0xc   :  { %934 = vst [vmem:[%s1505_s3] sm:$0xff] %v933_v39   ;;  %v157_v49 = vmul.f32 %v820_v42, %v1178_v1  ;;  %v828_v51 = vunpack.c.l.bf16 %v1095_v38  ;;  %1121 = vst [vmem:[%s1505_s3 + $0x8] sm:$0xff] %v938_v44   ;;  %v158_v52 = vmul.f32 %v821_v46, %v1178_v1  ;;  %v829_v54 = vunpack.c.h.bf16 %v1095_v38 }
   0xd   :  { %1122 = vst [vmem:[%s1505_s3 + $0x10] sm:$0xff] %v943_v45   ;;  %v159_v53 = vmul.f32 %v824_v47, %v1178_v1  ;;  %v832_v55 = vunpack.c.l.bf16 %v1096_v43  ;;  %1123 = vst [vmem:[%s1505_s3 + $0x18] sm:$0xff] %v948_v48   ;;  %v160_v57 = vmul.f32 %v825_v50, %v1178_v1  ;;  %v833_v59 = vunpack.c.h.bf16 %v1096_v43 }
   0xe   :  { %v228_v56 = vadd.f32 %v1192_v7, %v157_v49  ;;  %v161_v58 = vmul.f32 %v828_v51, %v1178_v1  ;;  %v229_v60 = vadd.f32 %v1192_v7, %v158_v52  ;;  %v162_v62 = vmul.f32 %v829_v54, %v1178_v1 }
   0xf   :  { %v230_v61 = vadd.f32 %v1192_v7, %v159_v53  ;;  %v163_v63 = vmul.f32 %v832_v55, %v1178_v1  ;;  %v231_v3 = vadd.f32 %v1192_v7, %v160_v57  ;;  %v164_v5 = vmul.f32 %v833_v59, %v1178_v1 }
  0x10   :  { %v292_v2 = vmax.f32 %v228_v56, 0.0  ;;  %v232_v4 = vadd.f32 %v1192_v7, %v161_v58  ;;  %v293_v6 = vmax.f32 %v229_v60, 0.0  ;;  %v233_v9 = vadd.f32 %v1192_v7, %v162_v62 }
  0x11   :  { %v294_v8 = vmax.f32 %v230_v61, 0.0  ;;  %v234_v10 = vadd.f32 %v1192_v7, %v163_v63  ;;  %v295_v12 = vmax.f32 %v231_v3, 0.0  ;;  %v235_v14 = vadd.f32 %v1192_v7, %v164_v5 }
  0x12   :  { %v296_v13 = vmax.f32 %v232_v4, 0.0  ;;  %v953_v17 = vpack.c.bf16 %v293_v6, %v292_v2  ;;  %v297_v18 = vmax.f32 %v233_v9, 0.0 }
  0x13   :  { %v298_v19 = vmax.f32 %v234_v10, 0.0  ;;  %v958_v21 = vpack.c.bf16 %v295_v12, %v294_v8  ;;  %v299_v22 = vmax.f32 %v235_v14, 0.0 }
  0x14   :  { %v1097_v0 = vld [vmem:[%s1502_s0 + $0x40] sm:$0xff]   ;;  %v1098_v11 = vld [vmem:[%s1502_s0 + $0x48] sm:$0xff]   ;;  %v1099_v16 = vld [vmem:[%s1502_s0 + $0x50] sm:$0xff]   ;;  %v963_v26 = vpack.c.bf16 %v297_v18, %v296_v13 }
  0x15   :  { %v836_v15 = vunpack.c.l.bf16 %v1097_v0  ;;  %v837_v20 = vunpack.c.h.bf16 %v1097_v0  ;;  %v840_v24 = vunpack.c.l.bf16 %v1098_v11  ;;  %v1100_v25 = vld [vmem:[%s1502_s0 + $0x58] sm:$0xff]   ;;  %v841_v28 = vunpack.c.h.bf16 %v1098_v11 }
  0x16   :  { %1124 = vst [vmem:[%s1505_s3 + $0x20] sm:$0xff] %v953_v17   ;;  %v844_v29 = vunpack.c.l.bf16 %v1099_v16  ;;  %1125 = vst [vmem:[%s1505_s3 + $0x28] sm:$0xff] %v958_v21   ;;  %v968_v30 = vpack.c.bf16 %v299_v22, %v298_v19  ;;  %v845_v33 = vunpack.c.h.bf16 %v1099_v16  ;;  %v848_v37 = vunpack.c.l.bf16 %v1100_v25 }
  0x17   :  { %v165_v23 = vmul.f32 %v836_v15, %v1178_v1  ;;  %v166_v27 = vmul.f32 %v837_v20, %v1178_v1  ;;  %v167_v32 = vmul.f32 %v840_v24, %v1178_v1  ;;  %1126 = vst [vmem:[%s1505_s3 + $0x30] sm:$0xff] %v963_v26   ;;  %v168_v35 = vmul.f32 %v841_v28, %v1178_v1 }
  0x18   :  { %v169_v36 = vmul.f32 %v844_v29, %v1178_v1  ;;  %v170_v41 = vmul.f32 %v845_v33, %v1178_v1  ;;  %v849_v42 = vunpack.c.h.bf16 %v1100_v25  ;;  %v171_v46 = vmul.f32 %v848_v37, %v1178_v1 }
  0x19   :  { %v236_v31 = vadd.f32 %v1192_v7, %v165_v23  ;;  %v237_v34 = vadd.f32 %v1192_v7, %v166_v27  ;;  %v238_v40 = vadd.f32 %v1192_v7, %v167_v32  ;;  %v239_v44 = vadd.f32 %v1192_v7, %v168_v35 }
  0x1a   :  { %v240_v45 = vadd.f32 %v1192_v7, %v169_v36  ;;  %v241_v48 = vadd.f32 %v1192_v7, %v170_v41  ;;  %v172_v49 = vmul.f32 %v849_v42, %v1178_v1  ;;  %v242_v55 = vadd.f32 %v1192_v7, %v171_v46 }
  0x1b   :  { %v300_v39 = vmax.f32 %v236_v31, 0.0  ;;  %v301_v43 = vmax.f32 %v237_v34, 0.0  ;;  %v302_v47 = vmax.f32 %v238_v40, 0.0  ;;  %v303_v53 = vmax.f32 %v239_v44, 0.0 }
  0x1c   :  { %v304_v54 = vmax.f32 %v240_v45, 0.0  ;;  %v305_v56 = vmax.f32 %v241_v48, 0.0  ;;  %v243_v57 = vadd.f32 %v1192_v7, %v172_v49  ;;  %v306_v62 = vmax.f32 %v242_v55, 0.0 }
  0x1d   :  { %v973_v52 = vpack.c.bf16 %v301_v43, %v300_v39  ;;  %v978_v61 = vpack.c.bf16 %v303_v53, %v302_v47 }
  0x1e   :  { %v1101_v38 = vld [vmem:[%s1502_s0 + $0x60] sm:$0xff]   ;;  %v983_v3 = vpack.c.bf16 %v305_v56, %v304_v54  ;;  %v307_v4 = vmax.f32 %v243_v57, 0.0 }
  0x1f   :  { %1127 = vst [vmem:[%s1505_s3 + $0x38] sm:$0xff] %v968_v30   ;;  %v852_v50 = vunpack.c.l.bf16 %v1101_v38  ;;  %v853_v58 = vunpack.c.h.bf16 %v1101_v38 }
  0x20   :  { %v988_v13 = vpack.c.bf16 %v307_v4, %v306_v62 }
  0x21   :  { %v173_v59 = vmul.f32 %v852_v50, %v1178_v1  ;;  %v174_v5 = vmul.f32 %v853_v58, %v1178_v1 }
  0x23   :  { %v244_v6 = vadd.f32 %v1192_v7, %v173_v59  ;;  %v245_v14 = vadd.f32 %v1192_v7, %v174_v5 }
  0x25   :  { %v308_v15 = vmax.f32 %v244_v6, 0.0  ;;  %v309_v21 = vmax.f32 %v245_v14, 0.0 }
  0x26   :  { %v1102_v51 = vld [vmem:[%s1502_s0 + $0x68] sm:$0xff]   ;;  %v1103_v60 = vld [vmem:[%s1502_s0 + $0x70] sm:$0xff]  }
  0x27   :  { %1128 = vst [vmem:[%s1505_s3 + $0x40] sm:$0xff] %v973_v52   ;;  %v856_v63 = vunpack.c.l.bf16 %v1102_v51  ;;  %v857_v0 = vunpack.c.h.bf16 %v1102_v51  ;;  %v860_v10 = vunpack.c.l.bf16 %v1103_v60  ;;  %v861_v11 = vunpack.c.h.bf16 %v1103_v60 }
  0x28   :  { %v993_v30 = vpack.c.bf16 %v309_v21, %v308_v15 }
  0x29   :  { %v175_v8 = vmul.f32 %v856_v63, %v1178_v1  ;;  %v176_v9 = vmul.f32 %v857_v0, %v1178_v1  ;;  %v177_v19 = vmul.f32 %v860_v10, %v1178_v1  ;;  %v178_v20 = vmul.f32 %v861_v11, %v1178_v1 }
  0x2b   :  { %v246_v17 = vadd.f32 %v1192_v7, %v175_v8  ;;  %v247_v18 = vadd.f32 %v1192_v7, %v176_v9  ;;  %v248_v27 = vadd.f32 %v1192_v7, %v177_v19  ;;  %v249_v28 = vadd.f32 %v1192_v7, %v178_v20 }
  0x2d   :  { %v310_v25 = vmax.f32 %v246_v17, 0.0  ;;  %v311_v26 = vmax.f32 %v247_v18, 0.0  ;;  %v312_v36 = vmax.f32 %v248_v27, 0.0  ;;  %v313_v37 = vmax.f32 %v249_v28, 0.0 }
  0x2e   :  { %v1104_v2 = vld [vmem:[%s1502_s0 + $0x78] sm:$0xff]  }
  0x2f   :  { %1129 = vst [vmem:[%s1505_s3 + $0x48] sm:$0xff] %v978_v61   ;;  %v864_v16 = vunpack.c.l.bf16 %v1104_v2  ;;  %v865_v22 = vunpack.c.h.bf16 %v1104_v2  ;;  %v998_v35 = vpack.c.bf16 %v311_v26, %v310_v25  ;;  %v1003_v44 = vpack.c.bf16 %v313_v37, %v312_v36 }
  0x31   :  { %v179_v23 = vmul.f32 %v864_v16, %v1178_v1  ;;  %v180_v31 = vmul.f32 %v865_v22, %v1178_v1 }
  0x33   :  { %v250_v32 = vadd.f32 %v1192_v7, %v179_v23  ;;  %v251_v39 = vadd.f32 %v1192_v7, %v180_v31 }
  0x35   :  { %v314_v40 = vmax.f32 %v250_v32, 0.0  ;;  %v315_v48 = vmax.f32 %v251_v39, 0.0 }
  0x36   :  { %v1105_v12 = vld [vmem:[%s1502_s0 + $0x80] sm:$0xff]  }
  0x37   :  { %1130 = vst [vmem:[%s1505_s3 + $0x50] sm:$0xff] %v983_v3   ;;  %1131 = vst [vmem:[%s1505_s3 + $0x58] sm:$0xff] %v988_v13   ;;  %v868_v24 = vunpack.c.l.bf16 %v1105_v12  ;;  %v869_v33 = vunpack.c.h.bf16 %v1105_v12  ;;  %v1008_v57 = vpack.c.bf16 %v315_v48, %v314_v40 }
  0x39   :  { %v181_v38 = vmul.f32 %v868_v24, %v1178_v1  ;;  %v182_v41 = vmul.f32 %v869_v33, %v1178_v1 }
  0x3b   :  { %v252_v45 = vadd.f32 %v1192_v7, %v181_v38  ;;  %v253_v49 = vadd.f32 %v1192_v7, %v182_v41 }
  0x3d   :  { %v316_v52 = vmax.f32 %v252_v45, 0.0  ;;  %v317_v58 = vmax.f32 %v253_v49, 0.0 }
  0x3e   :  { %v1106_v29 = vld [vmem:[%s1502_s0 + $0x88] sm:$0xff]   ;;  %v1107_v34 = vld [vmem:[%s1502_s0 + $0x90] sm:$0xff]  }
  0x3f   :  { %1132 = vst [vmem:[%s1505_s3 + $0x60] sm:$0xff] %v993_v30   ;;  %v872_v42 = vunpack.c.l.bf16 %v1106_v29  ;;  %v873_v46 = vunpack.c.h.bf16 %v1106_v29  ;;  %v876_v47 = vunpack.c.l.bf16 %v1107_v34  ;;  %v877_v51 = vunpack.c.h.bf16 %v1107_v34 }
  0x40   :  { %v1013_v3 = vpack.c.bf16 %v317_v58, %v316_v52 }
  0x41   :  { %v183_v50 = vmul.f32 %v872_v42, %v1178_v1  ;;  %v184_v53 = vmul.f32 %v873_v46, %v1178_v1  ;;  %v185_v54 = vmul.f32 %v876_v47, %v1178_v1  ;;  %v186_v60 = vmul.f32 %v877_v51, %v1178_v1 }
  0x43   :  { %v254_v59 = vadd.f32 %v1192_v7, %v183_v50  ;;  %v255_v61 = vadd.f32 %v1192_v7, %v184_v53  ;;  %v256_v62 = vadd.f32 %v1192_v7, %v185_v54  ;;  %v257_v5 = vadd.f32 %v1192_v7, %v186_v60 }
  0x45   :  { %v318_v4 = vmax.f32 %v254_v59, 0.0  ;;  %v319_v8 = vmax.f32 %v255_v61, 0.0  ;;  %v320_v9 = vmax.f32 %v256_v62, 0.0  ;;  %v321_v12 = vmax.f32 %v257_v5, 0.0 }
  0x46   :  { %v1108_v43 = vld [vmem:[%s1502_s0 + $0x98] sm:$0xff]  }
  0x47   :  { %1133 = vst [vmem:[%s1505_s3 + $0x68] sm:$0xff] %v998_v35   ;;  %1134 = vst [vmem:[%s1505_s3 + $0x70] sm:$0xff] %v1003_v44   ;;  %v880_v55 = vunpack.c.l.bf16 %v1108_v43  ;;  %v881_v63 = vunpack.c.h.bf16 %v1108_v43  ;;  %v1018_v17 = vpack.c.bf16 %v319_v8, %v318_v4  ;;  %v1023_v22 = vpack.c.bf16 %v321_v12, %v320_v9 }
  0x49   :  { %v187_v0 = vmul.f32 %v880_v55, %v1178_v1  ;;  %v188_v10 = vmul.f32 %v881_v63, %v1178_v1 }
  0x4b   :  { %v258_v11 = vadd.f32 %v1192_v7, %v187_v0  ;;  %v259_v18 = vadd.f32 %v1192_v7, %v188_v10 }
  0x4d   :  { %v322_v19 = vmax.f32 %v258_v11, 0.0  ;;  %v323_v26 = vmax.f32 %v259_v18, 0.0 }
  0x4e   :  { %v1109_v56 = vld [vmem:[%s1502_s0 + $0xa0] sm:$0xff]   ;;  %v1110_v2 = vld [vmem:[%s1502_s0 + $0xa8] sm:$0xff]  }
  0x4f   :  { %1135 = vst [vmem:[%s1505_s3 + $0x78] sm:$0xff] %v1008_v57   ;;  %v884_v6 = vunpack.c.l.bf16 %v1109_v56  ;;  %1136 = vst [vmem:[%s1505_s3 + $0x80] sm:$0xff] %v1013_v3   ;;  %v885_v13 = vunpack.c.h.bf16 %v1109_v56  ;;  %v888_v15 = vunpack.c.l.bf16 %v1110_v2  ;;  %v889_v20 = vunpack.c.h.bf16 %v1110_v2 }
  0x50   :  { %v1028_v35 = vpack.c.bf16 %v323_v26, %v322_v19 }
  0x51   :  { %v189_v14 = vmul.f32 %v884_v6, %v1178_v1  ;;  %v190_v23 = vmul.f32 %v885_v13, %v1178_v1  ;;  %v191_v25 = vmul.f32 %v888_v15, %v1178_v1  ;;  %v192_v27 = vmul.f32 %v889_v20, %v1178_v1 }
  0x53   :  { %v260_v24 = vadd.f32 %v1192_v7, %v189_v14  ;;  %v261_v30 = vadd.f32 %v1192_v7, %v190_v23  ;;  %v262_v32 = vadd.f32 %v1192_v7, %v191_v25  ;;  %v263_v36 = vadd.f32 %v1192_v7, %v192_v27 }
  0x55   :  { %v324_v31 = vmax.f32 %v260_v24, 0.0  ;;  %v325_v39 = vmax.f32 %v261_v30, 0.0  ;;  %v326_v40 = vmax.f32 %v262_v32, 0.0  ;;  %v327_v43 = vmax.f32 %v263_v36, 0.0 }
  0x56   :  { %v1111_v16 = vld [vmem:[%s1502_s0 + $0xb0] sm:$0xff]   ;;  %v1112_v21 = vld [vmem:[%s1502_s0 + $0xb8] sm:$0xff]  }
  0x57   :  { %1137 = vst [vmem:[%s1505_s3 + $0x88] sm:$0xff] %v1018_v17   ;;  %v892_v28 = vunpack.c.l.bf16 %v1111_v16  ;;  %v893_v29 = vunpack.c.h.bf16 %v1111_v16  ;;  %1138 = vst [vmem:[%s1505_s3 + $0x90] sm:$0xff] %v1023_v22   ;;  %v896_v33 = vunpack.c.l.bf16 %v1112_v21  ;;  %v897_v41 = vunpack.c.h.bf16 %v1112_v21 }
  0x58   :  { %v1033_v48 = vpack.c.bf16 %v325_v39, %v324_v31  ;;  %v1038_v53 = vpack.c.bf16 %v327_v43, %v326_v40 }
  0x59   :  { %v193_v37 = vmul.f32 %v892_v28, %v1178_v1  ;;  %v194_v38 = vmul.f32 %v893_v29, %v1178_v1  ;;  %v195_v42 = vmul.f32 %v896_v33, %v1178_v1  ;;  %v196_v49 = vmul.f32 %v897_v41, %v1178_v1 }
  0x5b   :  { %v264_v44 = vadd.f32 %v1192_v7, %v193_v37  ;;  %v265_v45 = vadd.f32 %v1192_v7, %v194_v38  ;;  %v266_v50 = vadd.f32 %v1192_v7, %v195_v42  ;;  %v267_v57 = vadd.f32 %v1192_v7, %v196_v49 }
  0x5d   :  { %v328_v54 = vmax.f32 %v264_v44, 0.0  ;;  %v329_v55 = vmax.f32 %v265_v45, 0.0  ;;  %v330_v58 = vmax.f32 %v266_v50, 0.0  ;;  %v331_v3 = vmax.f32 %v267_v57, 0.0 }
  0x5e   :  { %v1113_v34 = vld [vmem:[%s1502_s0 + $0xc0] sm:$0xff]  }
  0x5f   :  { %1139 = vst [vmem:[%s1505_s3 + $0x98] sm:$0xff] %v1028_v35   ;;  %v900_v46 = vunpack.c.l.bf16 %v1113_v34  ;;  %v901_v51 = vunpack.c.h.bf16 %v1113_v34  ;;  %v1043_v62 = vpack.c.bf16 %v329_v55, %v328_v54  ;;  %v1048_v13 = vpack.c.bf16 %v331_v3, %v330_v58 }
  0x61   :  { %v197_v56 = vmul.f32 %v900_v46, %v1178_v1  ;;  %v198_v59 = vmul.f32 %v901_v51, %v1178_v1 }
  0x63   :  { %v268_v63 = vadd.f32 %v1192_v7, %v197_v56  ;;  %v269_v4 = vadd.f32 %v1192_v7, %v198_v59 }
  0x65   :  { %v332_v8 = vmax.f32 %v268_v63, 0.0  ;;  %v333_v14 = vmax.f32 %v269_v4, 0.0 }
  0x66   :  { %v1114_v47 = vld [vmem:[%s1502_s0 + $0xc8] sm:$0xff]   ;;  %v1115_v52 = vld [vmem:[%s1502_s0 + $0xd0] sm:$0xff]  }
  0x67   :  { %1140 = vst [vmem:[%s1505_s3 + $0xa0] sm:$0xff] %v1033_v48   ;;  %v904_v60 = vunpack.c.l.bf16 %v1114_v47  ;;  %v905_v0 = vunpack.c.h.bf16 %v1114_v47  ;;  %v908_v2 = vunpack.c.l.bf16 %v1115_v52  ;;  %v909_v6 = vunpack.c.h.bf16 %v1115_v52 }
  0x68   :  { %v1053_v22 = vpack.c.bf16 %v333_v14, %v332_v8 }
  0x69   :  { %v199_v5 = vmul.f32 %v904_v60, %v1178_v1  ;;  %v200_v9 = vmul.f32 %v905_v0, %v1178_v1  ;;  %v201_v10 = vmul.f32 %v908_v2, %v1178_v1  ;;  %v202_v16 = vmul.f32 %v909_v6, %v1178_v1 }
  0x6b   :  { %v270_v15 = vadd.f32 %v1192_v7, %v199_v5  ;;  %v271_v17 = vadd.f32 %v1192_v7, %v200_v9  ;;  %v272_v18 = vadd.f32 %v1192_v7, %v201_v10  ;;  %v273_v24 = vadd.f32 %v1192_v7, %v202_v16 }
  0x6d   :  { %v334_v23 = vmax.f32 %v270_v15, 0.0  ;;  %v335_v26 = vmax.f32 %v271_v17, 0.0  ;;  %v336_v27 = vmax.f32 %v272_v18, 0.0  ;;  %v337_v30 = vmax.f32 %v273_v24, 0.0 }
  0x6e   :  { %v1116_v61 = vld [vmem:[%s1502_s0 + $0xd8] sm:$0xff]  }
  0x6f   :  { %1141 = vst [vmem:[%s1505_s3 + $0xa8] sm:$0xff] %v1038_v53   ;;  %1142 = vst [vmem:[%s1505_s3 + $0xb0] sm:$0xff] %v1043_v62   ;;  %v912_v11 = vunpack.c.l.bf16 %v1116_v61  ;;  %v913_v19 = vunpack.c.h.bf16 %v1116_v61  ;;  %v1058_v35 = vpack.c.bf16 %v335_v26, %v334_v23  ;;  %v1063_v40 = vpack.c.bf16 %v337_v30, %v336_v27 }
  0x71   :  { %v203_v20 = vmul.f32 %v912_v11, %v1178_v1  ;;  %v204_v28 = vmul.f32 %v913_v19, %v1178_v1 }
  0x73   :  { %v274_v29 = vadd.f32 %v1192_v7, %v203_v20  ;;  %v275_v36 = vadd.f32 %v1192_v7, %v204_v28 }
  0x75   :  { %v338_v37 = vmax.f32 %v274_v29, 0.0  ;;  %v339_v44 = vmax.f32 %v275_v36, 0.0 }
  0x76   :  { %v1117_v12 = vld [vmem:[%s1502_s0 + $0xe0] sm:$0xff]   ;;  %v1118_v21 = vld [vmem:[%s1502_s0 + $0xe8] sm:$0xff]  }
  0x77   :  { %1143 = vst [vmem:[%s1505_s3 + $0xb8] sm:$0xff] %v1048_v13   ;;  %v916_v25 = vunpack.c.l.bf16 %v1117_v12  ;;  %1144 = vst [vmem:[%s1505_s3 + $0xc0] sm:$0xff] %v1053_v22   ;;  %v917_v31 = vunpack.c.h.bf16 %v1117_v12  ;;  %v920_v33 = vunpack.c.l.bf16 %v1118_v21  ;;  %v921_v38 = vunpack.c.h.bf16 %v1118_v21 }
  0x78   :  { %v1068_v52 = vpack.c.bf16 %v339_v44, %v338_v37 }
  0x79   :  { %v205_v32 = vmul.f32 %v916_v25, %v1178_v1  ;;  %v206_v41 = vmul.f32 %v917_v31, %v1178_v1  ;;  %v207_v43 = vmul.f32 %v920_v33, %v1178_v1  ;;  %v208_v45 = vmul.f32 %v921_v38, %v1178_v1 }
  0x7b   :  { %v276_v42 = vadd.f32 %v1192_v7, %v205_v32  ;;  %v277_v48 = vadd.f32 %v1192_v7, %v206_v41  ;;  %v278_v50 = vadd.f32 %v1192_v7, %v207_v43  ;;  %v279_v53 = vadd.f32 %v1192_v7, %v208_v45 }
  0x7d   :  { %v340_v49 = vmax.f32 %v276_v42, 0.0  ;;  %v341_v56 = vmax.f32 %v277_v48, 0.0  ;;  %v342_v57 = vmax.f32 %v278_v50, 0.0  ;;  %v343_v60 = vmax.f32 %v279_v53, 0.0 }
  0x7e   :  { %v1119_v34 = vld [vmem:[%s1502_s0 + $0xf0] sm:$0xff]   ;;  %v1120_v39 = vld [vmem:[%s1502_s0 + $0xf8] sm:$0xff]  }
  0x7f   :  { %1145 = vst [vmem:[%s1505_s3 + $0xc8] sm:$0xff] %v1058_v35   ;;  %v924_v46 = vunpack.c.l.bf16 %v1119_v34  ;;  %v925_v47 = vunpack.c.h.bf16 %v1119_v34  ;;  %1146 = vst [vmem:[%s1505_s3 + $0xd0] sm:$0xff] %v1063_v40   ;;  %v928_v51 = vunpack.c.l.bf16 %v1120_v39  ;;  %v929_v58 = vunpack.c.h.bf16 %v1120_v39 }
  0x80   :  { %1147 = vst [vmem:[%s1505_s3 + $0xd8] sm:$0xff] %v1068_v52   ;;  %v1073_v63 = vpack.c.bf16 %v341_v56, %v340_v49  ;;  %v1078_v3 = vpack.c.bf16 %v343_v60, %v342_v57 }
  0x81   :  { %v209_v54 = vmul.f32 %v924_v46, %v1178_v1  ;;  %v210_v55 = vmul.f32 %v925_v47, %v1178_v1  ;;  %v211_v59 = vmul.f32 %v928_v51, %v1178_v1  ;;  %v212_v0 = vmul.f32 %v929_v58, %v1178_v1 }
  0x82   :  { %1148 = vst [vmem:[%s1505_s3 + $0xe0] sm:$0xff] %v1073_v63   ;;  %1149 = vst [vmem:[%s1505_s3 + $0xe8] sm:$0xff] %v1078_v3  }
  0x83   :  { %v280_v61 = vadd.f32 %v1192_v7, %v209_v54  ;;  %v281_v62 = vadd.f32 %v1192_v7, %v210_v55  ;;  %v282_v2 = vadd.f32 %v1192_v7, %v211_v59  ;;  %v283_v6 = vadd.f32 %v1192_v7, %v212_v0 }
  0x85   :  { %v344_v4 = vmax.f32 %v280_v61, 0.0  ;;  %v345_v5 = vmax.f32 %v281_v62, 0.0  ;;  %v346_v8 = vmax.f32 %v282_v2, 0.0  ;;  %v347_v10 = vmax.f32 %v283_v6, 0.0 }
  0x87   :  { %v1083_v9 = vpack.c.bf16 %v345_v5, %v344_v4  ;;  %v1088_v1 = vpack.c.bf16 %v347_v10, %v346_v8 }
  0x89   :  { %1150 = vst [vmem:[%s1505_s3 + $0xf0] sm:$0xff] %v1083_v9   ;;  %1151 = vst [vmem:[%s1505_s3 + $0xf8] sm:$0xff] %v1088_v1  }

// kernel: convblock_forward.7
= control target key start
LH: loop header
LB: loop body
LE: loop exit
PB: predicated region body
PF: predicated region fallthrough
CT: control target
= control target key end

     0   :  { %s1023_s0 = inlined_call_operand.vmem [shape: bf16[512,128], index: 0, kind: input, shape index: {}]   ;;  %s1024_s1 = inlined_call_operand.vmem [shape: f32[1,128], index: 1, kind: input, shape index: {}]   ;;  %s1025_s2 = inlined_call_operand.vmem [shape: f32[1,128], index: 2, kind: input, shape index: {}]   ;;  %s1026_s3 = inlined_call_operand.vmem [shape: f32[512,128], index: 3, kind: output, shape index: {}]  }
   0x1   :  { %v419_v0 = vld [vmem:[%s1023_s0] sm:$0xff]   ;;  %v546_v4 = vld [vmem:[%s1023_s0 + $0x8] sm:$0xff]   ;;  %v547_v5 = vld [vmem:[%s1023_s0 + $0x10] sm:$0xff]  }
   0x2   :  { %v603_v1 = vld [vmem:[%s1024_s1] ss:$0 sm:$0xff]  ;;  %v420_v2 = vunpack.c.l.bf16 %v419_v0  ;;  %v421_v3 = vunpack.c.h.bf16 %v419_v0  ;;  %v548_v6 = vld [vmem:[%s1023_s0 + $0x18] sm:$0xff]   ;;  %v424_v8 = vunpack.c.l.bf16 %v546_v4  ;;  %v425_v9 = vunpack.c.h.bf16 %v546_v4  ;;  %v550_v33 = vld [vmem:[%s1023_s0 + $0x28] sm:$0xff]  }
   0x3   :  { %v617_v7 = vld [vmem:[%s1025_s2] ss:$0 sm:$0xff]  ;;  %v428_v10 = vunpack.c.l.bf16 %v547_v5  ;;  %v429_v11 = vunpack.c.h.bf16 %v547_v5  ;;  %v432_v14 = vunpack.c.l.bf16 %v548_v6  ;;  %v433_v15 = vunpack.c.h.bf16 %v548_v6  ;;  %v551_v34 = vld [vmem:[%s1023_s0 + $0x30] sm:$0xff]   ;;  %v552_v39 = vld [vmem:[%s1023_s0 + $0x38] sm:$0xff]  }
   0x4   :  { %v149_v12 = vmul.f32 %v420_v2, %v603_v1  ;;  %v150_v13 = vmul.f32 %v421_v3, %v603_v1  ;;  %v151_v16 = vmul.f32 %v424_v8, %v603_v1  ;;  %v152_v17 = vmul.f32 %v425_v9, %v603_v1  ;;  %v549_v28 = vld [vmem:[%s1023_s0 + $0x20] sm:$0xff]   ;;  %v554_v6 = vld [vmem:[%s1023_s0 + $0x48] sm:$0xff]   ;;  %v555_v8 = vld [vmem:[%s1023_s0 + $0x50] sm:$0xff]  }
   0x5   :  { %v153_v18 = vmul.f32 %v428_v10, %v603_v1  ;;  %v154_v19 = vmul.f32 %v429_v11, %v603_v1  ;;  %v155_v22 = vmul.f32 %v432_v14, %v603_v1  ;;  %v156_v23 = vmul.f32 %v433_v15, %v603_v1  ;;  %v553_v0 = vld [vmem:[%s1023_s0 + $0x40] sm:$0xff]  }
   0x6   :  { %v220_v20 = vadd.f32 %v617_v7, %v149_v12  ;;  %v221_v21 = vadd.f32 %v617_v7, %v150_v13  ;;  %v222_v24 = vadd.f32 %v617_v7, %v151_v16  ;;  %v223_v25 = vadd.f32 %v617_v7, %v152_v17  ;;  %v556_v13 = vld [vmem:[%s1023_s0 + $0x58] sm:$0xff]  }
   0x7   :  { %v224_v26 = vadd.f32 %v617_v7, %v153_v18  ;;  %v225_v27 = vadd.f32 %v617_v7, %v154_v19  ;;  %v226_v31 = vadd.f32 %v617_v7, %v155_v22  ;;  %v227_v32 = vadd.f32 %v617_v7, %v156_v23 }
   0x8   :  { %v284_v29 = vmax.f32 %v220_v20, 0.0  ;;  %v285_v30 = vmax.f32 %v221_v21, 0.0  ;;  %v286_v35 = vmax.f32 %v222_v24, 0.0  ;;  %v287_v36 = vmax.f32 %v223_v25, 0.0 }
   0x9   :  { %v288_v37 = vmax.f32 %v224_v26, 0.0  ;;  %v289_v38 = vmax.f32 %v225_v27, 0.0  ;;  %v290_v40 = vmax.f32 %v226_v31, 0.0  ;;  %v291_v41 = vmax.f32 %v227_v32, 0.0 }
   0xa   :  { %348 = vst [vmem:[%s1026_s3] sm:$0xff] %v284_v29  ;;  %349 = vst [vmem:[%s1026_s3 + $0x8] sm:$0xff] %v285_v30  ;;  %v436_v42 = vunpack.c.l.bf16 %v549_v28  ;;  %v437_v43 = vunpack.c.h.bf16 %v549_v28  ;;  %v440_v44 = vunpack.c.l.bf16 %v550_v33  ;;  %v441_v45 = vunpack.c.h.bf16 %v550_v33 }
   0xb   :  { %350 = vst [vmem:[%s1026_s3 + $0x10] sm:$0xff] %v286_v35  ;;  %351 = vst [vmem:[%s1026_s3 + $0x18] sm:$0xff] %v287_v36  ;;  %v444_v46 = vunpack.c.l.bf16 %v551_v34  ;;  %v445_v47 = vunpack.c.h.bf16 %v551_v34  ;;  %v448_v50 = vunpack.c.l.bf16 %v552_v39  ;;  %v449_v51 = vunpack.c.h.bf16 %v552_v39 }
   0xc   :  { %352 = vst [vmem:[%s1026_s3 + $0x20] sm:$0xff] %v288_v37  ;;  %353 = vst [vmem:[%s1026_s3 + $0x28] sm:$0xff] %v289_v38  ;;  %v157_v48 = vmul.f32 %v436_v42, %v603_v1  ;;  %v158_v49 = vmul.f32 %v437_v43, %v603_v1  ;;  %v159_v52 = vmul.f32 %v440_v44, %v603_v1  ;;  %v452_v16 = vunpack.c.l.bf16 %v553_v0  ;;  %v557_v38 = vld [vmem:[%s1023_s0 + $0x60] sm:$0xff]   ;;  %v558_v43 = vld [vmem:[%s1023_s0 + $0x68] sm:$0xff]  }
   0xd   :  { %354 = vst [vmem:[%s1026_s3 + $0x30] sm:$0xff] %v290_v40  ;;  %355 = vst [vmem:[%s1026_s3 + $0x38] sm:$0xff] %v291_v41  ;;  %v160_v53 = vmul.f32 %v441_v45, %v603_v1  ;;  %v161_v54 = vmul.f32 %v444_v46, %v603_v1  ;;  %v162_v55 = vmul.f32 %v445_v47, %v603_v1  ;;  %v453_v17 = vunpack.c.h.bf16 %v553_v0  ;;  %v559_v44 = vld [vmem:[%s1023_s0 + $0x70] sm:$0xff]  }
   0xe   :  { %v228_v56 = vadd.f32 %v617_v7, %v157_v48  ;;  %v229_v57 = vadd.f32 %v617_v7, %v158_v49  ;;  %v163_v58 = vmul.f32 %v448_v50, %v603_v1  ;;  %v164_v59 = vmul.f32 %v449_v51, %v603_v1  ;;  %v560_v49 = vld [vmem:[%s1023_s0 + $0x78] sm:$0xff]  }
   0xf   :  { %v230_v60 = vadd.f32 %v617_v7, %v159_v52  ;;  %v231_v61 = vadd.f32 %v617_v7, %v160_v53  ;;  %v232_v62 = vadd.f32 %v617_v7, %v161_v54  ;;  %v233_v63 = vadd.f32 %v617_v7, %v162_v55 }
  0x10   :  { %v292_v2 = vmax.f32 %v228_v56, 0.0  ;;  %v293_v3 = vmax.f32 %v229_v57, 0.0  ;;  %v234_v4 = vadd.f32 %v617_v7, %v163_v58  ;;  %v235_v5 = vadd.f32 %v617_v7, %v164_v59 }
  0x11   :  { %v294_v9 = vmax.f32 %v230_v60, 0.0  ;;  %v295_v10 = vmax.f32 %v231_v61, 0.0  ;;  %v296_v11 = vmax.f32 %v232_v62, 0.0  ;;  %v297_v12 = vmax.f32 %v233_v63, 0.0 }
  0x12   :  { %356 = vst [vmem:[%s1026_s3 + $0x40] sm:$0xff] %v292_v2  ;;  %357 = vst [vmem:[%s1026_s3 + $0x48] sm:$0xff] %v293_v3  ;;  %v298_v14 = vmax.f32 %v234_v4, 0.0  ;;  %v299_v15 = vmax.f32 %v235_v5, 0.0  ;;  %v456_v18 = vunpack.c.l.bf16 %v554_v6  ;;  %v457_v19 = vunpack.c.h.bf16 %v554_v6 }
  0x13   :  { %358 = vst [vmem:[%s1026_s3 + $0x50] sm:$0xff] %v294_v9  ;;  %359 = vst [vmem:[%s1026_s3 + $0x58] sm:$0xff] %v295_v10  ;;  %v460_v20 = vunpack.c.l.bf16 %v555_v8  ;;  %v461_v21 = vunpack.c.h.bf16 %v555_v8  ;;  %v165_v22 = vmul.f32 %v452_v16, %v603_v1  ;;  %v166_v23 = vmul.f32 %v453_v17, %v603_v1  ;;  %v562_v17 = vld [vmem:[%s1023_s0 + $0x88] sm:$0xff]  }
  0x14   :  { %360 = vst [vmem:[%s1026_s3 + $0x60] sm:$0xff] %v296_v11  ;;  %361 = vst [vmem:[%s1026_s3 + $0x68] sm:$0xff] %v297_v12  ;;  %v464_v24 = vunpack.c.l.bf16 %v556_v13  ;;  %v465_v25 = vunpack.c.h.bf16 %v556_v13  ;;  %v167_v26 = vmul.f32 %v456_v18, %v603_v1  ;;  %v168_v27 = vmul.f32 %v457_v19, %v603_v1  ;;  %v561_v12 = vld [vmem:[%s1023_s0 + $0x80] sm:$0xff]   ;;  %v563_v18 = vld [vmem:[%s1023_s0 + $0x90] sm:$0xff]  }
  0x15   :  { %362 = vst [vmem:[%s1026_s3 + $0x70] sm:$0xff] %v298_v14  ;;  %363 = vst [vmem:[%s1026_s3 + $0x78] sm:$0xff] %v299_v15  ;;  %v169_v28 = vmul.f32 %v460_v20, %v603_v1  ;;  %v170_v29 = vmul.f32 %v461_v21, %v603_v1  ;;  %v236_v30 = vadd.f32 %v617_v7, %v165_v22  ;;  %v468_v52 = vunpack.c.l.bf16 %v557_v38 }
  0x16   :  { %v237_v31 = vadd.f32 %v617_v7, %v166_v23  ;;  %v171_v32 = vmul.f32 %v464_v24, %v603_v1  ;;  %v172_v33 = vmul.f32 %v465_v25, %v603_v1  ;;  %v238_v34 = vadd.f32 %v617_v7, %v167_v26  ;;  %v564_v23 = vld [vmem:[%s1023_s0 + $0x98] sm:$0xff]  }
  0x17   :  { %v239_v35 = vadd.f32 %v617_v7, %v168_v27  ;;  %v240_v36 = vadd.f32 %v617_v7, %v169_v28  ;;  %v241_v37 = vadd.f32 %v617_v7, %v170_v29  ;;  %v300_v39 = vmax.f32 %v236_v30, 0.0 }
  0x18   :  { %v301_v40 = vmax.f32 %v237_v31, 0.0  ;;  %v242_v41 = vadd.f32 %v617_v7, %v171_v32  ;;  %v243_v42 = vadd.f32 %v617_v7, %v172_v33  ;;  %v302_v45 = vmax.f32 %v238_v34, 0.0 }
  0x19   :  { %v303_v46 = vmax.f32 %v239_v35, 0.0  ;;  %v304_v47 = vmax.f32 %v240_v36, 0.0  ;;  %v305_v48 = vmax.f32 %v241_v37, 0.0  ;;  %364 = vst [vmem:[%s1026_s3 + $0x80] sm:$0xff] %v300_v39  ;;  %v469_v53 = vunpack.c.h.bf16 %v557_v38 }
  0x1a   :  { %365 = vst [vmem:[%s1026_s3 + $0x88] sm:$0xff] %v301_v40  ;;  %v306_v50 = vmax.f32 %v242_v41, 0.0  ;;  %v307_v51 = vmax.f32 %v243_v42, 0.0  ;;  %366 = vst [vmem:[%s1026_s3 + $0x90] sm:$0xff] %v302_v45  ;;  %v472_v54 = vunpack.c.l.bf16 %v558_v43  ;;  %v473_v55 = vunpack.c.h.bf16 %v558_v43 }
  0x1b   :  { %367 = vst [vmem:[%s1026_s3 + $0x98] sm:$0xff] %v303_v46  ;;  %368 = vst [vmem:[%s1026_s3 + $0xa0] sm:$0xff] %v304_v47  ;;  %v476_v56 = vunpack.c.l.bf16 %v559_v44  ;;  %v477_v57 = vunpack.c.h.bf16 %v559_v44  ;;  %v173_v58 = vmul.f32 %v468_v52, %v603_v1  ;;  %v174_v59 = vmul.f32 %v469_v53, %v603_v1  ;;  %v566_v53 = vld [vmem:[%s1023_s0 + $0xa8] sm:$0xff]  }
  0x1c   :  { %369 = vst [vmem:[%s1026_s3 + $0xa8] sm:$0xff] %v305_v48  ;;  %370 = vst [vmem:[%s1026_s3 + $0xb0] sm:$0xff] %v306_v50  ;;  %v480_v60 = vunpack.c.l.bf16 %v560_v49  ;;  %v481_v61 = vunpack.c.h.bf16 %v560_v49  ;;  %v175_v62 = vmul.f32 %v472_v54, %v603_v1  ;;  %v176_v63 = vmul.f32 %v473_v55, %v603_v1  ;;  %v565_v48 = vld [vmem:[%s1023_s0 + $0xa0] sm:$0xff]   ;;  %v567_v54 = vld [vmem:[%s1023_s0 + $0xb0] sm:$0xff]  }
  0x1d   :  { %371 = vst [vmem:[%s1026_s3 + $0xb8] sm:$0xff] %v307_v51  ;;  %v177_v0 = vmul.f32 %v476_v56, %v603_v1  ;;  %v178_v2 = vmul.f32 %v477_v57, %v603_v1  ;;  %v244_v3 = vadd.f32 %v617_v7, %v173_v58  ;;  %v245_v4 = vadd.f32 %v617_v7, %v174_v59  ;;  %v568_v59 = vld [vmem:[%s1023_s0 + $0xb8] sm:$0xff]  }
  0x1e   :  { %v179_v5 = vmul.f32 %v480_v60, %v603_v1  ;;  %v180_v6 = vmul.f32 %v481_v61, %v603_v1  ;;  %v246_v8 = vadd.f32 %v617_v7, %v175_v62  ;;  %v247_v9 = vadd.f32 %v617_v7, %v176_v63 }
  0x1f   :  { %v248_v10 = vadd.f32 %v617_v7, %v177_v0  ;;  %v249_v11 = vadd.f32 %v617_v7, %v178_v2  ;;  %v308_v13 = vmax.f32 %v244_v3, 0.0  ;;  %v309_v14 = vmax.f32 %v245_v4, 0.0 }
  0x20   :  { %v250_v15 = vadd.f32 %v617_v7, %v179_v5  ;;  %v251_v16 = vadd.f32 %v617_v7, %v180_v6  ;;  %v310_v19 = vmax.f32 %v246_v8, 0.0  ;;  %v311_v20 = vmax.f32 %v247_v9, 0.0 }
  0x21   :  { %v312_v21 = vmax.f32 %v248_v10, 0.0  ;;  %v313_v22 = vmax.f32 %v249_v11, 0.0  ;;  %372 = vst [vmem:[%s1026_s3 + $0xc0] sm:$0xff] %v308_v13  ;;  %373 = vst [vmem:[%s1026_s3 + $0xc8] sm:$0xff] %v309_v14  ;;  %v484_v26 = vunpack.c.l.bf16 %v561_v12  ;;  %v485_v27 = vunpack.c.h.bf16 %v561_v12 }
  0x22   :  { %v314_v24 = vmax.f32 %v250_v15, 0.0  ;;  %v315_v25 = vmax.f32 %v251_v16, 0.0  ;;  %374 = vst [vmem:[%s1026_s3 + $0xd0] sm:$0xff] %v310_v19  ;;  %375 = vst [vmem:[%s1026_s3 + $0xd8] sm:$0xff] %v311_v20  ;;  %v488_v28 = vunpack.c.l.bf16 %v562_v17  ;;  %v489_v29 = vunpack.c.h.bf16 %v562_v17 }
  0x23   :  { %376 = vst [vmem:[%s1026_s3 + $0xe0] sm:$0xff] %v312_v21  ;;  %377 = vst [vmem:[%s1026_s3 + $0xe8] sm:$0xff] %v313_v22  ;;  %v492_v30 = vunpack.c.l.bf16 %v563_v18  ;;  %v493_v31 = vunpack.c.h.bf16 %v563_v18  ;;  %v181_v32 = vmul.f32 %v484_v26, %v603_v1  ;;  %v182_v33 = vmul.f32 %v485_v27, %v603_v1  ;;  %v569_v22 = vld [vmem:[%s1023_s0 + $0xc0] sm:$0xff]   ;;  %v570_v27 = vld [vmem:[%s1023_s0 + $0xc8] sm:$0xff]  }
  0x24   :  { %378 = vst [vmem:[%s1026_s3 + $0xf0] sm:$0xff] %v314_v24  ;;  %379 = vst [vmem:[%s1026_s3 + $0xf8] sm:$0xff] %v315_v25  ;;  %v496_v34 = vunpack.c.l.bf16 %v564_v23  ;;  %v497_v35 = vunpack.c.h.bf16 %v564_v23  ;;  %v183_v36 = vmul.f32 %v488_v28, %v603_v1  ;;  %v184_v37 = vmul.f32 %v489_v29, %v603_v1  ;;  %v571_v28 = vld [vmem:[%s1023_s0 + $0xd0] sm:$0xff]  }
  0x25   :  { %v185_v38 = vmul.f32 %v492_v30, %v603_v1  ;;  %v186_v39 = vmul.f32 %v493_v31, %v603_v1  ;;  %v252_v40 = vadd.f32 %v617_v7, %v181_v32  ;;  %v253_v41 = vadd.f32 %v617_v7, %v182_v33  ;;  %v572_v33 = vld [vmem:[%s1023_s0 + $0xd8] sm:$0xff]  }
  0x26   :  { %v187_v42 = vmul.f32 %v496_v34, %v603_v1  ;;  %v188_v43 = vmul.f32 %v497_v35, %v603_v1  ;;  %v254_v44 = vadd.f32 %v617_v7, %v183_v36  ;;  %v255_v45 = vadd.f32 %v617_v7, %v184_v37 }
  0x27   :  { %v256_v46 = vadd.f32 %v617_v7, %v185_v38  ;;  %v257_v47 = vadd.f32 %v617_v7, %v186_v39  ;;  %v316_v49 = vmax.f32 %v252_v40, 0.0  ;;  %v317_v50 = vmax.f32 %v253_v41, 0.0 }
  0x28   :  { %v258_v51 = vadd.f32 %v617_v7, %v187_v42  ;;  %v259_v52 = vadd.f32 %v617_v7, %v188_v43  ;;  %v318_v55 = vmax.f32 %v254_v44, 0.0  ;;  %v319_v56 = vmax.f32 %v255_v45, 0.0 }
  0x29   :  { %v320_v57 = vmax.f32 %v256_v46, 0.0  ;;  %v321_v58 = vmax.f32 %v257_v47, 0.0  ;;  %380 = vst [vmem:[%s1026_s3 + $0x100] sm:$0xff] %v316_v49  ;;  %381 = vst [vmem:[%s1026_s3 + $0x108] sm:$0xff] %v317_v50  ;;  %v500_v62 = vunpack.c.l.bf16 %v565_v48  ;;  %v501_v63 = vunpack.c.h.bf16 %v565_v48 }
  0x2a   :  { %v322_v60 = vmax.f32 %v258_v51, 0.0  ;;  %v323_v61 = vmax.f32 %v259_v52, 0.0  ;;  %382 = vst [vmem:[%s1026_s3 + $0x110] sm:$0xff] %v318_v55  ;;  %383 = vst [vmem:[%s1026_s3 + $0x118] sm:$0xff] %v319_v56  ;;  %v504_v0 = vunpack.c.l.bf16 %v566_v53  ;;  %v505_v2 = vunpack.c.h.bf16 %v566_v53 }
  0x2b   :  { %384 = vst [vmem:[%s1026_s3 + $0x120] sm:$0xff] %v320_v57  ;;  %385 = vst [vmem:[%s1026_s3 + $0x128] sm:$0xff] %v321_v58  ;;  %v508_v3 = vunpack.c.l.bf16 %v567_v54  ;;  %v509_v4 = vunpack.c.h.bf16 %v567_v54  ;;  %v189_v5 = vmul.f32 %v500_v62, %v603_v1  ;;  %v190_v6 = vmul.f32 %v501_v63, %v603_v1  ;;  %v573_v58 = vld [vmem:[%s1023_s0 + $0xe0] sm:$0xff]   ;;  %v574_v63 = vld [vmem:[%s1023_s0 + $0xe8] sm:$0xff]  }
  0x2c   :  { %386 = vst [vmem:[%s1026_s3 + $0x130] sm:$0xff] %v322_v60  ;;  %387 = vst [vmem:[%s1026_s3 + $0x138] sm:$0xff] %v323_v61  ;;  %v512_v8 = vunpack.c.l.bf16 %v568_v59  ;;  %v513_v9 = vunpack.c.h.bf16 %v568_v59  ;;  %v191_v10 = vmul.f32 %v504_v0, %v603_v1  ;;  %v192_v11 = vmul.f32 %v505_v2, %v603_v1  ;;  %v575_v0 = vld [vmem:[%s1023_s0 + $0xf0] sm:$0xff]  }
  0x2d   :  { %v193_v12 = vmul.f32 %v508_v3, %v603_v1  ;;  %v194_v13 = vmul.f32 %v509_v4, %v603_v1  ;;  %v260_v14 = vadd.f32 %v617_v7, %v189_v5  ;;  %v261_v15 = vadd.f32 %v617_v7, %v190_v6  ;;  %v576_v6 = vld [vmem:[%s1023_s0 + $0xf8] sm:$0xff]  }
  0x2e   :  { %v195_v16 = vmul.f32 %v512_v8, %v603_v1  ;;  %v196_v17 = vmul.f32 %v513_v9, %v603_v1  ;;  %v262_v18 = vadd.f32 %v617_v7, %v191_v10  ;;  %v263_v19 = vadd.f32 %v617_v7, %v192_v11 }
  0x2f   :  { %v264_v20 = vadd.f32 %v617_v7, %v193_v12  ;;  %v265_v21 = vadd.f32 %v617_v7, %v194_v13  ;;  %v324_v23 = vmax.f32 %v260_v14, 0.0  ;;  %v325_v24 = vmax.f32 %v261_v15, 0.0 }
  0x30   :  { %v266_v25 = vadd.f32 %v617_v7, %v195_v16  ;;  %v267_v26 = vadd.f32 %v617_v7, %v196_v17  ;;  %v326_v29 = vmax.f32 %v262_v18, 0.0  ;;  %v327_v30 = vmax.f32 %v263_v19, 0.0 }
  0x31   :  { %v328_v31 = vmax.f32 %v264_v20, 0.0  ;;  %v329_v32 = vmax.f32 %v265_v21, 0.0  ;;  %388 = vst [vmem:[%s1026_s3 + $0x140] sm:$0xff] %v324_v23  ;;  %389 = vst [vmem:[%s1026_s3 + $0x148] sm:$0xff] %v325_v24  ;;  %v516_v36 = vunpack.c.l.bf16 %v569_v22  ;;  %v517_v37 = vunpack.c.h.bf16 %v569_v22 }
  0x32   :  { %v330_v34 = vmax.f32 %v266_v25, 0.0  ;;  %v331_v35 = vmax.f32 %v267_v26, 0.0  ;;  %390 = vst [vmem:[%s1026_s3 + $0x150] sm:$0xff] %v326_v29  ;;  %391 = vst [vmem:[%s1026_s3 + $0x158] sm:$0xff] %v327_v30  ;;  %v520_v38 = vunpack.c.l.bf16 %v570_v27  ;;  %v521_v39 = vunpack.c.h.bf16 %v570_v27 }
  0x33   :  { %392 = vst [vmem:[%s1026_s3 + $0x160] sm:$0xff] %v328_v31  ;;  %393 = vst [vmem:[%s1026_s3 + $0x168] sm:$0xff] %v329_v32  ;;  %v524_v40 = vunpack.c.l.bf16 %v571_v28  ;;  %v525_v41 = vunpack.c.h.bf16 %v571_v28  ;;  %v197_v42 = vmul.f32 %v516_v36, %v603_v1  ;;  %v198_v43 = vmul.f32 %v517_v37, %v603_v1 }
  0x34   :  { %394 = vst [vmem:[%s1026_s3 + $0x170] sm:$0xff] %v330_v34  ;;  %395 = vst [vmem:[%s1026_s3 + $0x178] sm:$0xff] %v331_v35  ;;  %v528_v44 = vunpack.c.l.bf16 %v572_v33  ;;  %v529_v45 = vunpack.c.h.bf16 %v572_v33  ;;  %v199_v46 = vmul.f32 %v520_v38, %v603_v1  ;;  %v200_v47 = vmul.f32 %v521_v39, %v603_v1 }
  0x35   :  { %v201_v48 = vmul.f32 %v524_v40, %v603_v1  ;;  %v202_v49 = vmul.f32 %v525_v41, %v603_v1  ;;  %v268_v50 = vadd.f32 %v617_v7, %v197_v42  ;;  %v269_v51 = vadd.f32 %v617_v7, %v198_v43 }
  0x36   :  { %v203_v52 = vmul.f32 %v528_v44, %v603_v1  ;;  %v204_v53 = vmul.f32 %v529_v45, %v603_v1  ;;  %v270_v54 = vadd.f32 %v617_v7, %v199_v46  ;;  %v271_v55 = vadd.f32 %v617_v7, %v200_v47 }
  0x37   :  { %v272_v56 = vadd.f32 %v617_v7, %v201_v48  ;;  %v273_v57 = vadd.f32 %v617_v7, %v202_v49  ;;  %v332_v59 = vmax.f32 %v268_v50, 0.0  ;;  %v333_v60 = vmax.f32 %v269_v51, 0.0 }
  0x38   :  { %v274_v61 = vadd.f32 %v617_v7, %v203_v52  ;;  %v275_v62 = vadd.f32 %v617_v7, %v204_v53  ;;  %v334_v2 = vmax.f32 %v270_v54, 0.0  ;;  %v335_v3 = vmax.f32 %v271_v55, 0.0 }
  0x39   :  { %v336_v4 = vmax.f32 %v272_v56, 0.0  ;;  %v337_v5 = vmax.f32 %v273_v57, 0.0  ;;  %396 = vst [vmem:[%s1026_s3 + $0x180] sm:$0xff] %v332_v59  ;;  %397 = vst [vmem:[%s1026_s3 + $0x188] sm:$0xff] %v333_v60  ;;  %v532_v10 = vunpack.c.l.bf16 %v573_v58  ;;  %v533_v11 = vunpack.c.h.bf16 %v573_v58 }
  0x3a   :  { %v338_v8 = vmax.f32 %v274_v61, 0.0  ;;  %v339_v9 = vmax.f32 %v275_v62, 0.0  ;;  %398 = vst [vmem:[%s1026_s3 + $0x190] sm:$0xff] %v334_v2  ;;  %399 = vst [vmem:[%s1026_s3 + $0x198] sm:$0xff] %v335_v3  ;;  %v536_v12 = vunpack.c.l.bf16 %v574_v63  ;;  %v537_v13 = vunpack.c.h.bf16 %v574_v63 }
  0x3b   :  { %400 = vst [vmem:[%s1026_s3 + $0x1a0] sm:$0xff] %v336_v4  ;;  %401 = vst [vmem:[%s1026_s3 + $0x1a8] sm:$0xff] %v337_v5  ;;  %v540_v14 = vunpack.c.l.bf16 %v575_v0  ;;  %v541_v15 = vunpack.c.h.bf16 %v575_v0  ;;  %v205_v16 = vmul.f32 %v532_v10, %v603_v1  ;;  %v206_v17 = vmul.f32 %v533_v11, %v603_v1 }
  0x3c   :  { %402 = vst [vmem:[%s1026_s3 + $0x1b0] sm:$0xff] %v338_v8  ;;  %403 = vst [vmem:[%s1026_s3 + $0x1b8] sm:$0xff] %v339_v9  ;;  %v544_v18 = vunpack.c.l.bf16 %v576_v6  ;;  %v545_v19 = vunpack.c.h.bf16 %v576_v6  ;;  %v207_v20 = vmul.f32 %v536_v12, %v603_v1  ;;  %v208_v21 = vmul.f32 %v537_v13, %v603_v1 }
  0x3d   :  { %v209_v22 = vmul.f32 %v540_v14, %v603_v1  ;;  %v210_v23 = vmul.f32 %v541_v15, %v603_v1  ;;  %v276_v24 = vadd.f32 %v617_v7, %v205_v16  ;;  %v277_v25 = vadd.f32 %v617_v7, %v206_v17 }
  0x3e   :  { %v211_v26 = vmul.f32 %v544_v18, %v603_v1  ;;  %v212_v27 = vmul.f32 %v545_v19, %v603_v1  ;;  %v278_v28 = vadd.f32 %v617_v7, %v207_v20  ;;  %v279_v29 = vadd.f32 %v617_v7, %v208_v21 }
  0x3f   :  { %v280_v30 = vadd.f32 %v617_v7, %v209_v22  ;;  %v281_v31 = vadd.f32 %v617_v7, %v210_v23  ;;  %v340_v32 = vmax.f32 %v276_v24, 0.0  ;;  %v341_v33 = vmax.f32 %v277_v25, 0.0 }
  0x40   :  { %v282_v34 = vadd.f32 %v617_v7, %v211_v26  ;;  %v283_v35 = vadd.f32 %v617_v7, %v212_v27  ;;  %v342_v36 = vmax.f32 %v278_v28, 0.0  ;;  %v343_v37 = vmax.f32 %v279_v29, 0.0 }
  0x41   :  { %v344_v38 = vmax.f32 %v280_v30, 0.0  ;;  %v345_v39 = vmax.f32 %v281_v31, 0.0  ;;  %404 = vst [vmem:[%s1026_s3 + $0x1c0] sm:$0xff] %v340_v32  ;;  %405 = vst [vmem:[%s1026_s3 + $0x1c8] sm:$0xff] %v341_v33 }
  0x42   :  { %v346_v1 = vmax.f32 %v282_v34, 0.0  ;;  %v347_v40 = vmax.f32 %v283_v35, 0.0  ;;  %406 = vst [vmem:[%s1026_s3 + $0x1d0] sm:$0xff] %v342_v36  ;;  %407 = vst [vmem:[%s1026_s3 + $0x1d8] sm:$0xff] %v343_v37 }
  0x43   :  { %408 = vst [vmem:[%s1026_s3 + $0x1e0] sm:$0xff] %v344_v38  ;;  %409 = vst [vmem:[%s1026_s3 + $0x1e8] sm:$0xff] %v345_v39 }
  0x44   :  { %410 = vst [vmem:[%s1026_s3 + $0x1f0] sm:$0xff] %v346_v1  ;;  %411 = vst [vmem:[%s1026_s3 + $0x1f8] sm:$0xff] %v347_v40 }

// kernel: convblock_forward.4
= control target key start
LH: loop header
LB: loop body
LE: loop exit
PB: predicated region body
PF: predicated region fallthrough
CT: control target
= control target key end

     0   :  { %s6648_s15 = smov 0   ;;  %s6650_s16 = smov 0   ;;  %s9349_s0 = inlined_call_operand.vmem [shape: bf16[2,18,18,16], index: 0, kind: input, shape index: {}]   ;;  %s9350_s1 = inlined_call_operand.vmem [shape: bf16[9,16,128], index: 1, kind: input, shape index: {}]   ;;  %s9351_s2 = inlined_call_operand.vmem [shape: bf16[2,256,128], index: 2, kind: output, shape index: {0}]   ;;  %s9352_s3 = inlined_call_operand.vmem [shape: f32[2,1,128], index: 3, kind: output, shape index: {1}]   ;;  %s9353_s4 = inlined_call_operand.vmem [shape: f32[2,1,128], index: 4, kind: output, shape index: {2}]  }
   0x1   :  { %s6652_s17 = smov 0  }
   0x2 LB: > { %s27_s18 = sadd.s32 1, %s6617_s16  ;;  %p5332_p0 = scmp.ge.s32.totalorder %s6621_s17, 1  ;;  %s6621_s17 = sphi %s6652_s17, %s15_s17   ;;  %s6617_s16 = sphi %s6650_s16, %s9571_s16   ;;  %s6613_s15 = sphi %s6648_s15, %s9570_s15  }
   0x3   : > { %p29_p1 = scmp.ge.s32.totalorder %s27_s18, 2  ;;  %p194_p2 = scmp.lt.s32.totalorder %s6621_s17, 3 }
   0x5   : > { %s9573_s18 = smov (%p29_p1, %s27_s18), 0  ;;  %p195_p3 = pnand %p5332_p0, %p194_p2 }
   0x7   : > { %198 = sbr.rel (%p195_p3) target bundleno = 658 (0x292), region = 28 }
   0xc   : > { %v6537_v0 = vld [vmem:[%s9350_s1 + $0x8] sm:$0xff]   ;;  %p239_p4 = scmp.lt.s32.totalorder %s6613_s15, 1  ;;  %v6672_v1 = vld [vmem:[%s9350_s1] sm:$0xff]   ;;  %v6679_v2 = vld [vmem:[%s9350_s1 + $0x10] sm:$0xff]   ;;  %vm319_vm0 = vsmask.f32 3328 }
   0xd   : > { %6510 = vmatprep.subr.bf16.mxu1 %v6537_v0  ;;  %6204 = vmatprep.subr.bf16.mxu0 %v6537_v0  ;;  %vm320_vm1 = vsmask.f32 7440  ;;  %vm763_vm2 = vcmask 130048   ;;  %vm1316_vm4 = vcmask 1042432   ;;  %vm1317_vm5 = vcmask 1046532  }
   0xe   : > { %s9575_s15 = smov (!%p239_p4, %s6613_s15), 1  ;;  %6511 = vmatpush3.bf16.msra.mxu1 %v6537_v0  ;;  %6205 = vmatpush3.bf16.msra.mxu0 %v6537_v0  ;;  %vm6725_vm3 = vmor %vm319_vm0, %vm320_vm1 }
   0xf   : > { %s6512_s25 = smul.u32 216, %s9575_s15  ;;  %6238 = vmatprep.subr.bf16.mxu1 %v6672_v1  ;;  %6272 = vmatprep.subr.bf16.mxu0 %v6679_v2  ;;  %vm7001_vm6 = vmor %vm1316_vm4, %vm1317_vm5  ;;  %s5923_s19 = sshll.u32 %s9575_s15, 7 }
  0x10   : > { %s9090_s22 = scalar_lea.vmem %s9351_s2, %s5923_s19 }
  0x11   : > { %s6687_s28 = scalar_lea.vmem %s9349_s0, %s6512_s25  ;;  %s261_s25 = scalar_lea.vmem %s9352_s3, %s9575_s15 }
  0x12   : > { %v6690_v3 = vld [vmem:[%s6687_s28] sm:$0xf]  ;;  %v6693_v4 = vld [vmem:[%s6687_s28 + $0x4] sm:$0xf]  ;;  %v6696_v5 = vld [vmem:[%s6687_s28 + $0x8] sm:$0x1] }
  0x13   : > { %v323_v6 = vshrl.u32 %v6690_v3, 16  ;;  %v326_v7 = vshll.u32 %v6690_v3, 16  ;;  %v332_v8 = vshll.u32 %v6693_v4, 16  ;;  %v336_v9 = vshrl.u32 %v6693_v4, 16  ;;  %v6703_v10 = vld [vmem:[%s6687_s28 + $0x60] sm:$0xf] }
  0x14   : > { %v342_v11 = vshll.u32 %v6696_v5, 16  ;;  %v6707_v12 = vld [vmem:[%s6687_s28 + $0x64] sm:$0xf]  ;;  %v6710_v13 = vld [vmem:[%s6687_s28 + $0x68] sm:$0x1]  ;;  %v515_v19 = vshrl.u32 %v6703_v10, 16 }
  0x15   : > { %v325_v14 = vrot.slane %v323_v6, 4  ;;  %v328_v15 = vrot.slane %v326_v7, 5  ;;  %v334_v16 = vrot.slane %v332_v8, 5  ;;  %v338_v17 = vrot.slane %v336_v9, 4  ;;  %v6718_v26 = vld [vmem:[%s6687_s28 + $0xc] sm:$0xf] }
  0x16   : > { %v344_v18 = vrot.slane %v342_v11, 5  ;;  %v518_v20 = vshll.u32 %v6703_v10, 16  ;;  %v524_v21 = vshll.u32 %v6707_v12, 16  ;;  %v528_v24 = vshrl.u32 %v6707_v12, 16  ;;  %v6721_v27 = vld [vmem:[%s6687_s28 + $0x10] sm:$0xf] }
  0x17   : > { %v329_v22 = vor.u32 %v328_v15, %v325_v14  ;;  %v339_v23 = vor.u32 %v338_v17, %v334_v16  ;;  %v534_v25 = vshll.u32 %v6710_v13, 16  ;;  %v517_v30 = vrot.slane %v515_v19, 4  ;;  %v6731_v38 = vld [vmem:[%s6687_s28 + $0x14] sm:$0x1]  ;;  %v287_v50 = vld [vmem:[%s6687_s28 + $0x6c] sm:$0xf] }
  0x18   : > { %v520_v31 = vrot.slane %v518_v20, 5  ;;  %v526_v32 = vrot.slane %v524_v21, 5  ;;  %v530_v35 = vrot.slane %v528_v24, 4  ;;  %v347_v39 = vshrl.u32 %v6718_v26, 16  ;;  %v6744_v55 = vld [vmem:[%s6687_s28 + $0x70] sm:$0xf] }
  0x19   : > { %v330_v33 = vrot.slane %v329_v22, 4  ;;  %v340_v34 = vrot.slane %v339_v23, 4  ;;  %v536_v36 = vrot.slane %v534_v25, 5  ;;  %v350_v40 = vshll.u32 %v6718_v26, 16  ;;  %v6752_v60 = vld [vmem:[%s6687_s28 + $0x74] sm:$0x1] }
  0x1a   : > { %v521_v37 = vor.u32 %v520_v31, %v517_v30  ;;  %v356_v41 = vshll.u32 %v6721_v27, 16  ;;  %v531_v44 = vor.u32 %v530_v35, %v526_v32  ;;  %v360_v45 = vshrl.u32 %v6721_v27, 16  ;;  %v6757_v6 = vld [vmem:[%s6687_s28 + $0x18] sm:$0xf]  ;;  %v6769_v22 = vld [vmem:[%s6687_s28 + $0x20] sm:$0x1] }
  0x1b   : > { %v335_v42 = vsel %vm6725_vm3, %v330_v33, %v334_v16  ;;  %v345_v43 = vsel %vm6725_vm3, %v340_v34, %v344_v18  ;;  %v349_v48 = vrot.slane %v347_v39, 4  ;;  %v352_v49 = vrot.slane %v350_v40, 5  ;;  %v6763_v18 = vld [vmem:[%s6687_s28 + $0x1c] sm:$0xf] }
  0x1c   : > { %v5338_v46 = vcombine.low %v335_v42, %v345_v43  ;;  %v522_v47 = vrot.slane %v521_v37, 4  ;;  %v532_v51 = vrot.slane %v531_v44, 4  ;;  %v358_v52 = vrot.slane %v356_v41, 5  ;;  %v6780_v37 = vld [vmem:[%s9350_s1 + $0x20] sm:$0xff]   ;;  %v6785_v43 = vld [vmem:[%s6687_s28 + $0x7c] sm:$0xf] }
  0x1d   : > { %v362_v53 = vrot.slane %v360_v45, 4  ;;  %v366_v54 = vshll.u32 %v6731_v38, 16  ;;  %v353_v57 = vor.u32 %v352_v49, %v349_v48  ;;  %v539_v0 = vshrl.u32 %v287_v50, 16  ;;  %9383 = vst [vmem:[#allocation2_spill] sm:$0xff] %v6785_v43 }
  0x1e   : > { %6206 = vmatprep.mubr.msk.bf16.mxu0 %vm763_vm2, %v5338_v46  ;;  %v527_v56 = vsel %vm6725_vm3, %v522_v47, %v526_v32  ;;  %v537_v61 = vsel %vm6725_vm3, %v532_v51, %v536_v36  ;;  %v542_v9 = vshll.u32 %v287_v50, 16  ;;  %v548_v11 = vshll.u32 %v6744_v55, 16  ;;  %v289_v32 = vld [vmem:[%s6687_s28 + $0x78] sm:$0xf] }
  0x1f   : > { %v363_v62 = vor.u32 %v362_v53, %v358_v52  ;;  %v368_v63 = vrot.slane %v366_v54, 5  ;;  %v5346_v7 = vcombine.low %v527_v56, %v537_v61  ;;  %v354_v8 = vrot.slane %v353_v57, 4  ;;  %v6796_v61 = vld [vmem:[%s6687_s28 + $0x24] sm:$0xf] }
  0x20   : > { %v541_v15 = vrot.slane %v539_v0, 4  ;;  %v552_v16 = vshrl.u32 %v6744_v55, 16  ;;  %v558_v17 = vshll.u32 %v6752_v60, 16  ;;  %v544_v20 = vrot.slane %v542_v9, 5 }
  0x21   : > { %v364_v14 = vrot.slane %v363_v62, 4  ;;  %6222 = vmatprep.mubr.msk.bf16.mxu1 %vm763_vm2, %v5346_v7  ;;  %v359_v19 = vsel %vm6725_vm3, %v354_v8, %v358_v52  ;;  %v550_v21 = vrot.slane %v548_v11, 5  ;;  %v371_v23 = vshrl.u32 %v6757_v6, 16  ;;  %v6790_v52 = vld [vmem:[%s6687_s28 + $0x80] sm:$0x1] }
  0x22   : > { %v554_v25 = vrot.slane %v552_v16, 4  ;;  %v560_v30 = vrot.slane %v558_v17, 5  ;;  %v374_v31 = vshll.u32 %v6757_v6, 16  ;;  %v545_v34 = vor.u32 %v544_v20, %v541_v15  ;;  %9384 = vst [vmem:[#allocation3_spill] sm:$0xff] %v6790_v52  ;;  %v6803_v7 = vld [vmem:[%s6687_s28 + $0x28] sm:$0xf] }
  0x23   : > { %v369_v24 = vsel %vm6725_vm3, %v364_v14, %v368_v63  ;;  %v373_v35 = vrot.slane %v371_v23, 4  ;;  %v380_v36 = vshll.u32 %v6763_v18, 16  ;;  %v384_v41 = vshrl.u32 %v6763_v18, 16  ;;  %v6809_v15 = vld [vmem:[%s9350_s1 + $0x18] sm:$0xff]   ;;  %v6814_v20 = vld [vmem:[%s6687_s28 + $0x2c] sm:$0x1] }
  0x24   : > { %v5339_v33 = vcombine.low %v359_v19, %v369_v24  ;;  %v555_v39 = vor.u32 %v554_v25, %v550_v21  ;;  %v376_v40 = vrot.slane %v374_v31, 5  ;;  %v390_v42 = vshll.u32 %v6769_v22, 16  ;;  %v6821_v31 = vld [vmem:[%s6687_s28 + $0x84] sm:$0xf] }
  0x25   : > { %v546_v44 = vrot.slane %v545_v34, 4  ;;  %v382_v45 = vrot.slane %v380_v36, 5  ;;  %v563_v46 = vshrl.u32 %v289_v32, 16  ;;  %v566_v47 = vshll.u32 %v289_v32, 16  ;;  %v6828_v36 = vld [vmem:[%s6687_s28 + $0x88] sm:$0xf] }
  0x26   : > { %6207 = vmatmul.mubr.msk.bf16.vlgmr.msra.gmra.mxu0 %vm763_vm2, %v5339_v33  ;;  %v556_v48 = vrot.slane %v555_v39, 4  ;;  %v377_v49 = vor.u32 %v376_v40, %v373_v35  ;;  %v386_v50 = vrot.slane %v384_v41, 4  ;;  %v392_v51 = vrot.slane %v390_v42, 5 }
  0x27   : > { %6273 = vmatpush3.bf16.msra.mxu0 %v6679_v2  ;;  %v551_v53 = vsel %vm6725_vm3, %v546_v44, %v550_v21  ;;  %v565_v54 = vrot.slane %v563_v46, 4  ;;  %v568_v56 = vrot.slane %v566_v47, 5  ;;  %v572_v57 = vshll.u32 %v6785_v43, 16  ;;  %v6835_v46 = vld [vmem:[%s6687_s28 + $0x8c] sm:$0x1] }
  0x28   : > { %6340 = vmatprep.subr.bf16.mxu0 %v6780_v37  ;;  %v561_v2 = vsel %vm6725_vm3, %v556_v48, %v560_v30  ;;  %v378_v62 = vrot.slane %v377_v49, 4  ;;  %v387_v63 = vor.u32 %v386_v50, %v382_v45  ;;  %v576_v0 = vshrl.u32 %v6785_v43, 16 }
  0x29   : > { %v5347_v8 = vcombine.low %v551_v53, %v561_v2  ;;  %v569_v9 = vor.u32 %v568_v56, %v565_v54  ;;  %v574_v11 = vrot.slane %v572_v57, 5  ;;  %v582_v14 = vshll.u32 %v6790_v52, 16  ;;  %v6843_v53 = vld [vmem:[%s6687_s28 + $0x30] sm:$0xf] }
  0x2a   : > { %v383_v16 = vsel %vm6725_vm3, %v378_v62, %v382_v45  ;;  %v388_v17 = vrot.slane %v387_v63, 4  ;;  %v578_v19 = vrot.slane %v576_v0, 4  ;;  %v395_v21 = vshrl.u32 %v6796_v61, 16  ;;  %v6848_v62 = vld [vmem:[%s6687_s28 + $0x34] sm:$0xf] }
  0x2b   : > { %6223 = vmatmul.mubr.msk.bf16.vlgmr.msra.gmra.mxu1 %vm763_vm2, %v5347_v8  ;;  %v570_v23 = vrot.slane %v569_v9, 4  ;;  %v584_v24 = vrot.slane %v582_v14, 5  ;;  %v398_v25 = vshll.u32 %v6796_v61, 16  ;;  %v404_v30 = vshll.u32 %v6803_v7, 16 }
  0x2c   : > { %6239 = vmatpush3.bf16.msra.mxu1 %v6672_v1  ;;  %v393_v32 = vsel %vm6725_vm3, %v388_v17, %v392_v51  ;;  %v579_v33 = vor.u32 %v578_v19, %v574_v11  ;;  %v397_v34 = vrot.slane %v395_v21, 4  ;;  %v408_v35 = vshrl.u32 %v6803_v7, 16 }
  0x2d   : > { %v5340_v39 = vcombine.low %v383_v16, %v393_v32  ;;  %v575_v40 = vsel %vm6725_vm3, %v570_v23, %v574_v11  ;;  %v400_v41 = vrot.slane %v398_v25, 5  ;;  %v406_v42 = vrot.slane %v404_v30, 5  ;;  %6306 = vmatprep.subr.bf16.mxu1 %v6809_v15  ;;  %v6856_v23 = vld [vmem:[%s6687_s28 + $0x38] sm:$0x1]  ;;  %v6861_v30 = vld [vmem:[%s6687_s28 + $0x90] sm:$0xf] }
  0x2e   : > { %v580_v1 = vrot.slane %v579_v33, 4  ;;  %v410_v44 = vrot.slane %v408_v35, 4  ;;  %v414_v45 = vshll.u32 %v6814_v20, 16  ;;  %v587_v47 = vshrl.u32 %v6821_v31, 16 }
  0x2f   : > { %6210 = vmatprep.mubr.msk.bf16.mxu0 %vm763_vm2, %v5340_v39  ;;  %v401_v48 = vor.u32 %v400_v41, %v397_v34  ;;  %v590_v49 = vshll.u32 %v6821_v31, 16  ;;  %v596_v50 = vshll.u32 %v6828_v36, 16  ;;  %v600_v51 = vshrl.u32 %v6828_v36, 16  ;;  %v6866_v39 = vld [vmem:[%s6687_s28 + $0x94] sm:$0xf] }
  0x30   : > { %v585_v54 = vsel %vm6725_vm3, %v580_v1, %v584_v24  ;;  %v411_v56 = vor.u32 %v410_v44, %v406_v42  ;;  %v416_v57 = vrot.slane %v414_v45, 5  ;;  %v589_v2 = vrot.slane %v587_v47, 4 }
  0x31   : > { %v5348_v63 = vcombine.low %v575_v40, %v585_v54  ;;  %v402_v0 = vrot.slane %v401_v48, 4  ;;  %v592_v8 = vrot.slane %v590_v49, 5  ;;  %v598_v9 = vrot.slane %v596_v50, 5 }
  0x32   : > { %v412_v11 = vrot.slane %v411_v56, 4  ;;  %v602_v14 = vrot.slane %v600_v51, 4  ;;  %v606_v16 = vshll.u32 %v6835_v46, 16  ;;  %v419_v17 = vshrl.u32 %v6843_v53, 16  ;;  %v6875_v51 = vld [vmem:[%s6687_s28 + $0x98] sm:$0x1] }
  0x33   : > { %6226 = vmatprep.mubr.msk.bf16.mxu1 %vm763_vm2, %v5348_v63  ;;  %v407_v19 = vsel %vm6725_vm3, %v402_v0, %v406_v42  ;;  %v593_v21 = vor.u32 %v592_v8, %v589_v2  ;;  %v422_v24 = vshll.u32 %v6843_v53, 16  ;;  %v428_v25 = vshll.u32 %v6848_v62, 16  ;;  %9385 = vst [vmem:[#allocation4_spill] sm:$0xff] %v6875_v51 }
  0x34   : > { %v417_v32 = vsel %vm6725_vm3, %v412_v11, %v416_v57  ;;  %v603_v33 = vor.u32 %v602_v14, %v598_v9  ;;  %v608_v34 = vrot.slane %v606_v16, 5  ;;  %v421_v35 = vrot.slane %v419_v17, 4  ;;  %v6880_v57 = vld [vmem:[%s6687_s28 + $0x3c] sm:$0xf]  ;;  %v6885_v11 = vld [vmem:[%s6687_s28 + $0x40] sm:$0xf] }
  0x35   : > { %v5341_v40 = vcombine.low %v407_v19, %v417_v32  ;;  %v594_v41 = vrot.slane %v593_v21, 4  ;;  %v424_v42 = vrot.slane %v422_v24, 5  ;;  %v430_v1 = vrot.slane %v428_v25, 5 }
  0x36   : > { %v604_v44 = vrot.slane %v603_v33, 4  ;;  %v432_v45 = vshrl.u32 %v6848_v62, 16  ;;  %v438_v47 = vshll.u32 %v6856_v23, 16  ;;  %v611_v48 = vshrl.u32 %v6861_v30, 16 }
  0x37   : > { %6211 = vmatmul.mubr.msk.bf16.gmra.mxu0 %vm763_vm2, %v5341_v40  ;;  %v599_v49 = vsel %vm6725_vm3, %v594_v41, %v598_v9  ;;  %v425_v50 = vor.u32 %v424_v42, %v421_v35  ;;  %v614_v54 = vshll.u32 %v6861_v30, 16  ;;  %v620_v56 = vshll.u32 %v6866_v39, 16  ;;  %v6899_v41 = vld [vmem:[%s6687_s28 + $0x9c] sm:$0xf] }
  0x38   : > { %v609_v2 = vsel %vm6725_vm3, %v604_v44, %v608_v34  ;;  %v434_v63 = vrot.slane %v432_v45, 4  ;;  %v440_v0 = vrot.slane %v438_v47, 5  ;;  %v613_v8 = vrot.slane %v611_v48, 4  ;;  %v6894_v34 = vld [vmem:[%s6687_s28 + $0x44] sm:$0x1]  ;;  %9386 = vst [vmem:[#allocation5_spill] sm:$0xff] %v6899_v41 }
  0x39   : > { %v5349_v9 = vcombine.low %v599_v49, %v609_v2  ;;  %v426_v14 = vrot.slane %v425_v50, 4  ;;  %v616_v16 = vrot.slane %v614_v54, 5  ;;  %v622_v17 = vrot.slane %v620_v56, 5  ;;  %v6903_v54 = vld [vmem:[%s6687_s28 + $0xa0] sm:$0xf] }
  0x3a   : > { %v435_v19 = vor.u32 %v434_v63, %v430_v1  ;;  %v624_v21 = vshrl.u32 %v6866_v39, 16  ;;  %v630_v24 = vshll.u32 %v6875_v51, 16  ;;  %v443_v25 = vshrl.u32 %v6880_v57, 16  ;;  %9387 = vst [vmem:[#allocation6_spill] sm:$0xff] %v6903_v54  ;;  %v1269_v51 = vld [vmem:[%s6687_s28 + $0xc] sm:$0xe] }
  0x3b   : > { %6227 = vmatmul.mubr.msk.bf16.gmra.mxu1 %vm763_vm2, %v5349_v9  ;;  %v431_v32 = vsel %vm6725_vm3, %v426_v14, %v430_v1  ;;  %v617_v33 = vor.u32 %v616_v16, %v613_v8  ;;  %v446_v35 = vshll.u32 %v6880_v57, 16  ;;  %v452_v40 = vshll.u32 %v6885_v11, 16  ;;  %v6909_v8 = vld [vmem:[%s6687_s28 + $0xa4] sm:$0x1]  ;;  %v6913_v14 = vld [vmem:[%s6687_s28 + $0x48] sm:$0xf] }
  0x3c   : > { %v436_v42 = vrot.slane %v435_v19, 4  ;;  %v626_v44 = vrot.slane %v624_v21, 4  ;;  %v632_v45 = vrot.slane %v630_v24, 5  ;;  %v445_v47 = vrot.slane %v443_v25, 4  ;;  %9388 = vst [vmem:[#allocation7_spill] sm:$0xff] %v6909_v8 }
  0x3d   : > { %v618_v48 = vrot.slane %v617_v33, 4  ;;  %v448_v49 = vrot.slane %v446_v35, 5  ;;  %v454_v50 = vrot.slane %v452_v40, 5  ;;  %v456_v1 = vshrl.u32 %v6885_v11, 16 }
  0x3e   : > { %v441_v56 = vsel %vm6725_vm3, %v436_v42, %v440_v0  ;;  %v627_v2 = vor.u32 %v626_v44, %v622_v17  ;;  %v462_v63 = vshll.u32 %v6894_v34, 16  ;;  %v635_v9 = vshrl.u32 %v6899_v41, 16 }
  0x3f   : > { %v5342_v16 = vcombine.low %v431_v32, %v441_v56  ;;  %v623_v19 = vsel %vm6725_vm3, %v618_v48, %v622_v17  ;;  %v449_v21 = vor.u32 %v448_v49, %v445_v47  ;;  %v458_v24 = vrot.slane %v456_v1, 4  ;;  %v6922_v56 = vld [vmem:[%s6687_s28 + $0x4c] sm:$0xf]  ;;  %v6928_v49 = vld [vmem:[%s6687_s28 + $0x50] sm:$0x1] }
  0x40   : > { %v628_v25 = vrot.slane %v627_v2, 4  ;;  %v464_v33 = vrot.slane %v462_v63, 5  ;;  %v637_v0 = vrot.slane %v635_v9, 4  ;;  %v638_v35 = vshll.u32 %v6899_v41, 16 }
  0x41   : > { %6214 = vmatprep.mubr.msk.bf16.mxu0 %vm763_vm2, %v5342_v16  ;;  %v450_v40 = vrot.slane %v449_v21, 4  ;;  %v459_v42 = vor.u32 %v458_v24, %v454_v50  ;;  %v644_v44 = vshll.u32 %v6903_v54, 16  ;;  %v648_v32 = vshrl.u32 %v6903_v54, 16 }
  0x42   : > { %v633_v17 = vsel %vm6725_vm3, %v628_v25, %v632_v45  ;;  %v640_v47 = vrot.slane %v638_v35, 5  ;;  %v654_v48 = vshll.u32 %v6909_v8, 16  ;;  %v467_v1 = vshrl.u32 %v6913_v14, 16  ;;  %v6934_v45 = vld [vmem:[%s6687_s28 + $0xa8] sm:$0xf] }
  0x43   : > { %v5350_v2 = vcombine.low %v623_v19, %v633_v17  ;;  %v455_v63 = vsel %vm6725_vm3, %v450_v40, %v454_v50  ;;  %v460_v9 = vrot.slane %v459_v42, 4  ;;  %v646_v16 = vrot.slane %v644_v44, 5  ;;  %9389 = vst [vmem:[#allocation8_spill] sm:$0xff] %v6934_v45  ;;  %v6943_v40 = vld [vmem:[%s6687_s28 + $0xac] sm:$0xf] }
  0x44   : > { %v641_v21 = vor.u32 %v640_v47, %v637_v0  ;;  %v650_v24 = vrot.slane %v648_v32, 4  ;;  %v656_v59 = vrot.slane %v654_v48, 5  ;;  %v469_v29 = vrot.slane %v467_v1, 4  ;;  %9390 = vst [vmem:[#allocation9_spill] sm:$0xff] %v6943_v40  ;;  %v6947_v17 = vld [vmem:[%s6687_s28 + $0xb0] sm:$0x1] }
  0x45   : > { %6230 = vmatprep.mubr.msk.bf16.mxu1 %vm763_vm2, %v5350_v2  ;;  %v465_v25 = vsel %vm6725_vm3, %v460_v9, %v464_v33  ;;  %v470_v35 = vshll.u32 %v6913_v14, 16  ;;  %v476_v19 = vshll.u32 %v6922_v56, 16  ;;  %v480_v50 = vshrl.u32 %v6922_v56, 16  ;;  %9391 = vst [vmem:[#allocation10_spill] sm:$0xff] %v6947_v17 }
  0x46   : > { %v5343_v42 = vcombine.low %v455_v63, %v465_v25  ;;  %v642_v0 = vrot.slane %v641_v21, 4  ;;  %v651_v44 = vor.u32 %v650_v24, %v646_v16  ;;  %v486_v32 = vshll.u32 %v6928_v49, 16 }
  0x47   : > { %v472_v47 = vrot.slane %v470_v35, 5  ;;  %v478_v48 = vrot.slane %v476_v19, 5  ;;  %v482_v1 = vrot.slane %v480_v50, 4  ;;  %v659_v33 = vshrl.u32 %v6934_v45, 16  ;;  %v6956_v19 = vld [vmem:[%s6687_s28 + $0x54] sm:$0xf] }
  0x48   : > { %6215 = vmatmul.mubr.msk.bf16.gmra.mxu0 %vm763_vm2, %v5343_v42  ;;  %v647_v2 = vsel %vm6725_vm3, %v642_v0, %v646_v16  ;;  %v652_v9 = vrot.slane %v651_v44, 4  ;;  %v488_v63 = vrot.slane %v486_v32, 5  ;;  %v662_v21 = vshll.u32 %v6934_v45, 16  ;;  %v6963_v44 = vld [vmem:[%s6687_s28 + $0x58] sm:$0xf] }
  0x49   : > { %v473_v24 = vor.u32 %v472_v47, %v469_v29  ;;  %v483_v25 = vor.u32 %v482_v1, %v478_v48  ;;  %v661_v58 = vrot.slane %v659_v33, 4  ;;  %v668_v35 = vshll.u32 %v6943_v40, 16  ;;  %v6966_v33 = vld [vmem:[%s6687_s28 + $0x5c] sm:$0x1] }
  0x4a   : > { %v657_v50 = vsel %vm6725_vm3, %v652_v9, %v656_v59  ;;  %v664_v42 = vrot.slane %v662_v21, 5  ;;  %v672_v16 = vshrl.u32 %v6943_v40, 16  ;;  %v678_v0 = vshll.u32 %v6947_v17, 16  ;;  %v1268_v17 = vld [vmem:[%s6687_s28] sm:$0xe] }
  0x4b   : > { %v5351_v29 = vcombine.low %v647_v2, %v657_v50  ;;  %v474_v32 = vrot.slane %v473_v24, 4  ;;  %v484_v47 = vrot.slane %v483_v25, 4  ;;  %v670_v1 = vrot.slane %v668_v35, 5  ;;  %v6977_v25 = vld [vmem:[%s6687_s28 + $0xb4] sm:$0xf] }
  0x4c   : > { %v665_v52 = vor.u32 %v664_v42, %v661_v58  ;;  %v674_v45 = vrot.slane %v672_v16, 4  ;;  %v680_v8 = vrot.slane %v678_v0, 5  ;;  %v491_v59 = vshrl.u32 %v6956_v19, 16  ;;  %9392 = vst [vmem:[#allocation11_spill] sm:$0xff] %v6977_v25  ;;  %v6980_v16 = vld [vmem:[%s6687_s28 + $0xb8] sm:$0xf] }
  0x4d   : > { %6231 = vmatmul.mubr.msk.bf16.gmra.mxu1 %vm763_vm2, %v5351_v29  ;;  %v479_v9 = vsel %vm6725_vm3, %v474_v32, %v478_v48  ;;  %v489_v2 = vsel %vm6725_vm3, %v484_v47, %v488_v63  ;;  %v494_v21 = vshll.u32 %v6956_v19, 16  ;;  %v500_v24 = vshll.u32 %v6963_v44, 16  ;;  %v6985_v63 = vld [vmem:[%s6687_s28 + $0xbc] sm:$0x1] }
  0x4e   : > { %v5344_v58 = vcombine.low %v479_v9, %v489_v2  ;;  %v666_v35 = vrot.slane %v665_v52, 4  ;;  %v675_v50 = vor.u32 %v674_v45, %v670_v1  ;;  %v493_v42 = vrot.slane %v491_v59, 4 }
  0x4f   : > { %v496_v0 = vrot.slane %v494_v21, 5  ;;  %v502_v29 = vrot.slane %v500_v24, 5  ;;  %v504_v48 = vshrl.u32 %v6963_v44, 16  ;;  %v510_v32 = vshll.u32 %v6966_v33, 16 }
  0x50   : > { %6218 = vmatprep.mubr.msk.bf16.mxu0 %vm763_vm2, %v5344_v58  ;;  %v671_v47 = vsel %vm6725_vm3, %v666_v35, %v670_v1  ;;  %v676_v9 = vrot.slane %v675_v50, 4  ;;  %v683_v52 = vshrl.u32 %v6977_v25, 16  ;;  %v686_v45 = vshll.u32 %v6977_v25, 16 }
  0x51   : > { %v497_v59 = vor.u32 %v496_v0, %v493_v42  ;;  %v506_v2 = vrot.slane %v504_v48, 4  ;;  %v512_v21 = vrot.slane %v510_v32, 5  ;;  %v692_v24 = vshll.u32 %v6980_v16, 16 }
  0x52   : > { %v681_v40 = vsel %vm6725_vm3, %v676_v9, %v680_v8  ;;  %v685_v43 = vrot.slane %v683_v52, 4  ;;  %v688_v58 = vrot.slane %v686_v45, 5  ;;  %v696_v41 = vshrl.u32 %v6980_v16, 16 }
  0x53   : > { %v5352_v1 = vcombine.low %v671_v47, %v681_v40  ;;  %v498_v35 = vrot.slane %v497_v59, 4  ;;  %v507_v50 = vor.u32 %v506_v2, %v502_v29  ;;  %v694_v54 = vrot.slane %v692_v24, 5  ;;  %v1270_v59 = vld [vmem:[%s6687_s28 + $0x18] sm:$0xe] }
  0x54   : > { %v689_v25 = vor.u32 %v688_v58, %v685_v43  ;;  %v698_v42 = vrot.slane %v696_v41, 4  ;;  %v702_v0 = vshll.u32 %v6985_v63, 16  ;;  %v9393_v48 = vmov 0 }
  0x55   : > { %v9394_v48 = vsel %vm7001_vm6, 4294967295, %v9393_v48  ;;  %v5404_v8 = vrot.slane %v1268_v17, 9  ;;  %6234 = vmatprep.mubr.msk.bf16.mxu1 %vm763_vm2, %v5352_v1  ;;  %v503_v40 = vsel %vm6725_vm3, %v498_v35, %v502_v29  ;;  %v508_v32 = vrot.slane %v507_v50, 4 }
  0x56   : > { %9395 = vst [vmem:[#allocation12_spill] sm:$0xff] %v9394_v48  ;;  %v1321_v47 = vrot.slane %v6693_v4, 5  ;;  %v5372_v43 = vcombine.low %v6718_v26, %v6721_v27  ;;  %v690_v41 = vrot.slane %v689_v25, 4  ;;  %v699_v9 = vor.u32 %v698_v42, %v694_v54 }
  0x57   : > { %v704_v52 = vrot.slane %v702_v0, 5  ;;  %v5405_v45 = vrot.slane %v1269_v51, 9  ;;  %v513_v17 = vsel %vm6725_vm3, %v508_v32, %v512_v21  ;;  %v9396_v29 = vrot.slane %v6721_v27, 5  ;;  %v1271_v0 = vld [vmem:[%s6687_s28 + $0x24] sm:$0xe] }
  0x58   : > { %v1322_v2 = vsel %vm7001_vm6, %v5404_v8, %v1321_v47  ;;  %v1323_v24 = vrot.slane %v1321_v47, 4  ;;  %v5345_v1 = vcombine.low %v503_v40, %v513_v17  ;;  %v695_v35 = vsel %vm6725_vm3, %v690_v41, %v694_v54  ;;  %v1272_v17 = vld [vmem:[%s6687_s28 + $0x30] sm:$0xe] }
  0x59   : > { %v1330_v58 = vrot.slane %v9396_v29, 4  ;;  %v700_v25 = vrot.slane %v699_v9, 4  ;;  %v9397_v50 = vrot.slane %v6696_v5, 5  ;;  %v5373_v21 = vcombine.low %v6757_v6, %v6763_v18 }
  0x5a   : > { %v5406_v42 = vrot.slane %v1270_v59, 9  ;;  %6219 = vmatmul.mubr.msk.bf16.gmra.mxu0 %vm763_vm2, %v5345_v1  ;;  %v5371_v40 = vcombine.low %v6690_v3, %v6693_v4  ;;  %v1335_v5 = vrot.slane %v6763_v18, 5  ;;  %v9398_v47 = vmov %v9396_v29  ;;  %v1273_v29 = vld [vmem:[%s6687_s28 + $0x3c] sm:$0xe] }
  0x5b   : > { %v1325_v51 = vsel %vm7001_vm6, %v1323_v24, %v9397_v50  ;;  %v705_v8 = vsel %vm6725_vm3, %v700_v25, %v704_v52  ;;  %v1329_v41 = vsel %vm7001_vm6, %v5405_v45, %v9398_v47  ;;  %v9399_v9 = vrot.slane %v6731_v38, 5  ;;  %v1275_v47 = vld [vmem:[%s6687_s28 + $0x54] sm:$0xe] }
  0x5c   : > { %v5422_v54 = vcombine.low %v1322_v2, %v1325_v51  ;;  %v5353_v32 = vcombine.low %v695_v35, %v705_v8  ;;  %v1338_v52 = vrot.slane %v6769_v22, 5  ;;  %v1336_v3 = vsel %vm7001_vm6, %v5406_v42, %v1335_v5  ;;  %v1274_v35 = vld [vmem:[%s6687_s28 + $0x48] sm:$0xe] }
  0x5d   : > { %v1332_v59 = vsel %vm7001_vm6, %v1330_v58, %v9399_v9  ;;  %v1337_v4 = vrot.slane %v1335_v5, 4  ;;  %v5407_v2 = vrot.slane %v1271_v0, 9  ;;  %v1342_v24 = vrot.slane %v6803_v7, 5 }
  0x5e   : > { %6274 = vmatprep.mubr.msk.bf16.mxu0 %vm763_vm2, %v5422_v54  ;;  %6235 = vmatmul.mubr.msk.bf16.gmra.mxu1 %vm763_vm2, %v5353_v32  ;;  %v1345_v38 = vrot.slane %v6814_v20, 5  ;;  %v1349_v45 = vrot.slane %v6848_v62, 5  ;;  %v5423_v22 = vcombine.low %v1329_v41, %v1332_v59  ;;  %v5408_v50 = vrot.slane %v1272_v17, 9 }
  0x5f   : > { %6240 = vmatprep.mubr.msk.bf16.mxu1 %vm763_vm2, %v5371_v40  ;;  %v1339_v58 = vsel %vm7001_vm6, %v1337_v4, %v1338_v52  ;;  %v1344_v1 = vrot.slane %v1342_v24, 4  ;;  %v1352_v51 = vrot.slane %v6856_v23, 5  ;;  %v1343_v42 = vsel %vm7001_vm6, %v5407_v2, %v1342_v24  ;;  %v7062_v40 = vld [vmem:[%s9350_s1 + $0x30] sm:$0xff]   ;;  %v7082_v4 = vld [vmem:[%s9350_s1 + $0x28] sm:$0xff]  }
  0x60   : > { %v5424_v25 = vcombine.low %v1336_v3, %v1339_v58  ;;  %v1351_v20 = vrot.slane %v1349_v45, 4  ;;  %v5409_v0 = vrot.slane %v1273_v29, 9  ;;  %v1356_v8 = vrot.slane %v6885_v11, 5  ;;  %v1276_v3 = vld [vmem:[%s6687_s28 + $0x60] sm:$0xe] }
  0x61   : > { %v1346_v54 = vsel %vm7001_vm6, %v1344_v1, %v1345_v38  ;;  %v1359_v5 = vrot.slane %v6894_v34, 5  ;;  %v5410_v32 = vrot.slane %v1274_v35, 9  ;;  %v1363_v23 = vrot.slane %v6922_v56, 5 }
  0x62   : > { %6275 = vmatmul.mubr.msk.bf16.vlgmr.msra.gmra.mxu0 %vm763_vm2, %v5423_v22  ;;  %v1358_v41 = vrot.slane %v1356_v8, 4  ;;  %v1366_v9 = vrot.slane %v6928_v49, 5  ;;  %v1380_v59 = vrot.slane %v6710_v13, 5  ;;  %v5374_v52 = vcombine.low %v6796_v61, %v6803_v7  ;;  %v1277_v7 = vld [vmem:[%s6687_s28 + $0x6c] sm:$0xe] }
  0x63   : > { %6341 = vmatpush3.bf16.msra.mxu0 %v6780_v37  ;;  %6278 = vmatprep.mubr.msk.bf16.mxu0 %vm763_vm2, %v5424_v25  ;;  %v1350_v34 = vsel %vm7001_vm6, %v5408_v50, %v1349_v45  ;;  %v1365_v17 = vrot.slane %v1363_v23, 4  ;;  %v5425_v49 = vcombine.low %v1343_v42, %v1346_v54  ;;  %v1353_v13 = vsel %vm7001_vm6, %v1351_v20, %v1352_v51  ;;  %v1280_v42 = vld [vmem:[%s6687_s28 + $0x90] sm:$0xe]  ;;  %v7226_v54 = vld [vmem:[%s6687_s28 + $0x14] sm:$0x1] }
  0x64   : > { %v7088_v37 = vsel %vm7001_vm6, %v5409_v0, %v1356_v8  ;;  %v1370_v61 = vrot.slane %v6963_v44, 5  ;;  %6408 = vmatprep.subr.bf16.mxu0 %v7062_v40  ;;  %v7099_v2 = vsel %vm7001_vm6, %v5410_v32, %v1363_v23  ;;  %v5411_v24 = vrot.slane %v1275_v47, 9 }
  0x65   : > { %v1373_v38 = vrot.slane %v6966_v33, 5  ;;  %v1377_v45 = vrot.slane %v6707_v12, 5  ;;  %v1360_v26 = vsel %vm7001_vm6, %v1358_v41, %v1359_v5  ;;  %v7112_v27 = vsel %vm7001_vm6, %v1365_v17, %v1366_v9  ;;  %v1281_v41 = vld [vmem:[%s6687_s28 + $0x9c] sm:$0xe]  ;;  %v1282_v17 = vld [vmem:[%s6687_s28 + $0xa8] sm:$0xe] }
  0x66   : > { %6241 = vmatmul.mubr.msk.bf16.vlgmr.msra.gmra.mxu1 %vm763_vm2, %v5372_v43  ;;  %v1372_v43 = vrot.slane %v1370_v61, 4  ;;  %v5412_v29 = vrot.slane %v1276_v3, 9  ;;  %v5375_v33 = vcombine.low %v6843_v53, %v6848_v62  ;;  %v5376_v6 = vcombine.low %v6880_v57, %v6885_v11  ;;  %v1279_v53 = vld [vmem:[%s6687_s28 + $0x84] sm:$0xe] }
  0x67   : > { %6307 = vmatpush3.bf16.msra.mxu1 %v6809_v15  ;;  %6244 = vmatprep.mubr.msk.bf16.mxu1 %vm763_vm2, %v5373_v21  ;;  %v5426_v15 = vcombine.low %v1350_v34, %v1353_v13  ;;  %v5377_v18 = vcombine.low %v6913_v14, %v6922_v56  ;;  %v7121_v21 = vld [vmem:[%s6687_s28 + $0x78] sm:$0xe]  ;;  %v5378_v22 = vcombine.low %v6956_v19, %v6963_v44  ;;  %v1379_v1 = vrot.slane %v1377_v45, 4 }
  0x68   : > { %6374 = vmatprep.subr.bf16.mxu1 %v7082_v4  ;;  %v5379_v58 = vcombine.low %v6703_v10, %v6707_v12  ;;  %v5413_v35 = vrot.slane %v1277_v7, 9  ;;  %v5427_v62 = vcombine.low %v7088_v37, %v1360_v26  ;;  %v5428_v25 = vcombine.low %v7099_v2, %v7112_v27  ;;  %v9400_v37 = vld [vmem:[#allocation4_spill] sm:$0xff]  ;;  %v9401_v7 = vld [vmem:[#allocation6_spill] sm:$0xff]  ;;  %v9402_v2 = vld [vmem:[#allocation5_spill] sm:$0xff] }
  0x69   : > { %v7134_v50 = vsel %vm7001_vm6, %v5411_v24, %v1370_v61  ;;  %v7138_v51 = vsel %vm7001_vm6, %v1372_v43, %v1373_v38  ;;  %v7144_v20 = vsel %vm7001_vm6, %v5412_v29, %v1377_v45  ;;  %v1384_v0 = vrot.slane %v6744_v55, 5  ;;  %v9403_v45 = vld [vmem:[#allocation2_spill] sm:$0xff]  ;;  %v6594_v10 = vld [vmem:[%s6687_s28 + $0x6c] sm:$0xf]  ;;  %v6595_v12 = vld [vmem:[%s6687_s28 + $0x70] sm:$0xf] }
  0x6a   : > { %6279 = vmatmul.mubr.msk.bf16.gmra.mxu0 %vm763_vm2, %v5425_v49  ;;  %v1387_v8 = vrot.slane %v6752_v60, 5  ;;  %v5414_v5 = vrot.slane %v7121_v21, 9  ;;  %v5415_v32 = vrot.slane %v1279_v53, 9  ;;  %v1398_v23 = vrot.slane %v6828_v36, 5  ;;  %v9406_v53 = vld [vmem:[#allocation8_spill] sm:$0xff] }
  0x6b   : > { %6282 = vmatprep.mubr.msk.bf16.mxu0 %vm763_vm2, %v5426_v15  ;;  %v1401_v47 = vrot.slane %v6835_v46, 5  ;;  %v5429_v9 = vcombine.low %v7134_v50, %v7138_v51  ;;  %v7159_v55 = vsel %vm7001_vm6, %v1379_v1, %v1380_v59  ;;  %v7163_v60 = vsel %vm7001_vm6, %v5413_v35, %v1384_v0  ;;  %v9404_v15 = vld [vmem:[#allocation7_spill] sm:$0xff]  ;;  %v9405_v35 = vld [vmem:[#allocation9_spill] sm:$0xff] }
  0x6c   : > { %v7171_v46 = vsel %vm7001_vm6, %v5415_v32, %v1398_v23  ;;  %v1400_v3 = vrot.slane %v1398_v23, 4  ;;  %v5416_v49 = vrot.slane %v1280_v42, 9  ;;  %v1405_v13 = vrot.slane %v6866_v39, 5  ;;  %v9409_v42 = vld [vmem:[#allocation3_spill] sm:$0xff] }
  0x6d   : > { %v1386_v59 = vrot.slane %v1384_v0, 4  ;;  %v1408_v61 = vrot.slane %v9400_v37, 5  ;;  %v5417_v38 = vrot.slane %v1281_v41, 9  ;;  %v1415_v1 = vrot.slane %v9404_v15, 5  ;;  %v7211_v15 = vld [vmem:[%s6687_s28 + $0x10] sm:$0xf] }
  0x6e   : > { %6245 = vmatmul.mubr.msk.bf16.gmra.mxu1 %vm763_vm2, %v5374_v52  ;;  %v1391_v52 = vrot.slane %v9403_v45, 5  ;;  %v7181_v26 = vsel %vm7001_vm6, %v1400_v3, %v1401_v47  ;;  %v7185_v27 = vsel %vm7001_vm6, %v5416_v49, %v1405_v13  ;;  %v1407_v43 = vrot.slane %v1405_v13, 4  ;;  %v9407_v47 = vld [vmem:[#allocation10_spill] sm:$0xff]  ;;  %v5522_v3 = vld [vmem:[%s6687_s28 + $0xc] sm:$0xf] }
  0x6f   : > { %6248 = vmatprep.mubr.msk.bf16.mxu1 %vm763_vm2, %v5375_v33  ;;  %v1412_v33 = vrot.slane %v9401_v7, 5  ;;  %v5418_v32 = vrot.slane %v1282_v17, 9  ;;  %v1419_v23 = vrot.slane %v9405_v35, 5  ;;  %v1422_v41 = vrot.slane %v9407_v47, 5 }
  0x70   : > { %v7195_v0 = vsel %vm7001_vm6, %v1407_v43, %v1408_v61  ;;  %v9408_v61 = vld [vmem:[#allocation11_spill] sm:$0xff]  ;;  %v1283_v43 = vld [vmem:[%s6687_s28 + $0xb4] sm:$0xe]  ;;  %v1393_v47 = vrot.slane %v1391_v52, 4  ;;  %v1426_v17 = vrot.slane %v6980_v16, 5  ;;  %v2144_v49 = vshll.u32 %v5522_v3, 16 }
  0x71   : > { %v7205_v13 = vsel %vm7001_vm6, %v5417_v38, %v1412_v33  ;;  %v1414_v37 = vrot.slane %v1412_v33, 4  ;;  %v7217_v24 = vsel %vm7001_vm6, %v5418_v32, %v1419_v23  ;;  %v1421_v34 = vrot.slane %v1419_v23, 4  ;;  %v5525_v38 = vld [vmem:[%s6687_s28 + $0x18] sm:$0xf] }
  0x72   : > { %6283 = vmatmul.mubr.msk.bf16.gmra.mxu0 %vm763_vm2, %v5427_v62  ;;  %v1394_v62 = vrot.slane %v9409_v42, 5  ;;  %v5430_v42 = vcombine.low %v7144_v20, %v7159_v55  ;;  %v2150_v20 = vshll.u32 %v7211_v15, 16  ;;  %v5419_v55 = vrot.slane %v1283_v43, 9 }
  0x73   : > { %6286 = vmatprep.mubr.msk.bf16.mxu0 %vm763_vm2, %v5428_v25  ;;  %v7222_v33 = vsel %vm7001_vm6, %v1414_v37, %v1415_v1  ;;  %v2141_v25 = vshrl.u32 %v5522_v3, 16  ;;  %v7236_v1 = vsel %vm7001_vm6, %v1386_v59, %v1387_v8  ;;  %v7242_v23 = vsel %vm7001_vm6, %v1421_v34, %v1422_v41  ;;  %v5526_v3 = vld [vmem:[%s6687_s28 + $0x1c] sm:$0xf]  ;;  %v5527_v8 = vld [vmem:[%s6687_s28 + $0x20] sm:$0x1] }
  0x74   : > { %v1429_v59 = vrot.slane %v6985_v63, 5  ;;  %v2154_v34 = vshrl.u32 %v7211_v15, 16  ;;  %v2165_v41 = vshrl.u32 %v5525_v38, 16  ;;  %v5528_v37 = vld [vmem:[%s6687_s28 + $0x24] sm:$0xf]  ;;  %v1392_v14 = vsel %vm7001_vm6, %v5414_v5, %v1391_v52 }
  0x75   : > { %v2143_v11 = vrot.slane %v2141_v25, 4  ;;  %v1395_v56 = vsel %vm7001_vm6, %v1393_v47, %v1394_v62  ;;  %v7263_v25 = vld [vmem:[%s6687_s28 + $0x28] sm:$0xf]  ;;  %v7265_v57 = vrot.slane %v2150_v20, 5  ;;  %v2160_v63 = vshll.u32 %v7226_v54, 16 }
  0x76   : > { %6249 = vmatmul.mubr.msk.bf16.gmra.mxu1 %vm763_vm2, %v5376_v6  ;;  %v2146_v6 = vrot.slane %v2144_v49, 5  ;;  %v2168_v49 = vshll.u32 %v5525_v38, 16  ;;  %v2156_v43 = vrot.slane %v2154_v34, 4  ;;  %v2167_v32 = vrot.slane %v2165_v41, 4 }
  0x77   : > { %6252 = vmatprep.mubr.msk.bf16.mxu1 %vm763_vm2, %v5377_v18  ;;  %v1428_v18 = vrot.slane %v1426_v17, 4  ;;  %v2174_v52 = vshll.u32 %v5526_v3, 16  ;;  %v2178_v47 = vshrl.u32 %v5526_v3, 16  ;;  %v2184_v62 = vshll.u32 %v5527_v8, 16  ;;  %v7293_v3 = vld [vmem:[%s6687_s28 + $0x34] sm:$0xf] }
  0x78   : > { %v2147_v21 = vor.u32 %v2146_v6, %v2143_v11  ;;  %v2170_v5 = vrot.slane %v2168_v49, 5  ;;  %v2189_v38 = vshrl.u32 %v5528_v37, 16  ;;  %v2192_v20 = vshll.u32 %v5528_v37, 16  ;;  %9410 = vst [vmem:[#allocation4_spill] sm:$0xff] %v7293_v3  ;;  %v7304_v11 = vld [vmem:[%s6687_s28 + $0x2c] sm:$0x1] }
  0x79   : > { %v5431_v34 = vcombine.low %v7163_v60, %v7236_v1  ;;  %v5432_v41 = vcombine.low %v1392_v14, %v1395_v56  ;;  %v7277_v50 = vsel %vm7001_vm6, %v5419_v55, %v1426_v17  ;;  %v7281_v51 = vsel %vm7001_vm6, %v1428_v18, %v1429_v59  ;;  %v5534_v37 = vld [vmem:[%s6687_s28 + $0x3c] sm:$0xf]  ;;  %v6596_v14 = vld [vmem:[%s6687_s28 + $0x78] sm:$0xf] }
  0x7a   : > { %6287 = vmatmul.mubr.msk.bf16.gmra.mxu0 %vm763_vm2, %v5429_v9  ;;  %v5531_v9 = vld [vmem:[%s6687_s28 + $0x30] sm:$0xf]  ;;  %v7289_v60 = vrot.slane %v2160_v63, 5  ;;  %v2171_v1 = vor.u32 %v2170_v5, %v2167_v32  ;;  %v2198_v17 = vshll.u32 %v7263_v25, 16  ;;  %v7299_v19 = vrot.slane %v2147_v21, 4 }
  0x7b   : > { %6290 = vmatprep.mubr.msk.bf16.mxu0 %vm763_vm2, %v5430_v42  ;;  %v2157_v42 = vor.u32 %v2156_v43, %v7265_v57  ;;  %v7301_v44 = vrot.slane %v2174_v52, 5  ;;  %v2202_v32 = vshrl.u32 %v7263_v25, 16  ;;  %v7307_v6 = vrot.slane %v2184_v62, 5  ;;  %v7317_v43 = vld [vmem:[%s6687_s28 + $0x38] sm:$0x1] }
  0x7c   : > { %v2191_v8 = vrot.slane %v2189_v38, 4  ;;  %v2194_v55 = vrot.slane %v2192_v20, 5  ;;  %v2213_v59 = vshrl.u32 %v5531_v9, 16  ;;  %v5381_v56 = vcombine.low %v6596_v14, %v9403_v45  ;;  %9411 = vst [vmem:[#allocation6_spill] sm:$0xff] %v7317_v43 }
  0x7d   : > { %v7314_v18 = vrot.slane %v2198_v17, 5  ;;  %v2204_v49 = vrot.slane %v2202_v32, 4  ;;  %v2158_v63 = vrot.slane %v2157_v42, 4  ;;  %v7319_v21 = vrot.slane %v2171_v1, 4  ;;  %v5537_v17 = vld [vmem:[%s6687_s28 + $0x48] sm:$0xf] }
  0x7e   : > { %6253 = vmatmul.mubr.msk.bf16.gmra.mxu1 %vm763_vm2, %v5378_v22  ;;  %v2180_v22 = vrot.slane %v2178_v47, 4  ;;  %v2215_v5 = vrot.slane %v2213_v59, 4  ;;  %v2216_v52 = vshll.u32 %v5531_v9, 16  ;;  %v7322_v47 = vld [vmem:[%s6687_s28 + $0x40] sm:$0xf]  ;;  %v2153_v45 = vsel %vm6725_vm3, %v7299_v19, %v7265_v57 }
  0x7f   : > { %6256 = vmatprep.mubr.msk.bf16.mxu1 %vm763_vm2, %v5379_v58  ;;  %v5380_v58 = vcombine.low %v6594_v10, %v6595_v12  ;;  %v2222_v38 = vshll.u32 %v7293_v3, 16  ;;  %v2226_v20 = vshrl.u32 %v7293_v3, 16  ;;  %v2195_v42 = vor.u32 %v2194_v55, %v2191_v8  ;;  %v7343_v12 = vld [vmem:[%s6687_s28 + $0x44] sm:$0x1]  ;;  %v7347_v55 = vld [vmem:[%s6687_s28 + $0x4c] sm:$0xf] }
  0x80   : > { %v2181_v9 = vor.u32 %v2180_v22, %v7301_v44  ;;  %v2218_v1 = vrot.slane %v2216_v52, 5  ;;  %v2205_v32 = vor.u32 %v2204_v49, %v7314_v18  ;;  %v2237_v19 = vshrl.u32 %v5534_v37, 16 }
  0x81   : > { %v7338_v59 = vrot.slane %v2222_v38, 5  ;;  %v2228_v57 = vrot.slane %v2226_v20, 4  ;;  %v2240_v22 = vshll.u32 %v5534_v37, 16  ;;  %v2246_v8 = vshll.u32 %v7322_v47, 16  ;;  %v5540_v37 = vld [vmem:[%s6687_s28 + $0x54] sm:$0xf] }
  0x82   : > { %6291 = vmatmul.mubr.msk.bf16.gmra.mxu0 %vm763_vm2, %v5431_v34  ;;  %v2208_v34 = vshll.u32 %v7304_v11, 16  ;;  %v2219_v10 = vor.u32 %v2218_v1, %v2215_v5  ;;  %v2163_v14 = vsel %vm6725_vm3, %v2158_v63, %v7289_v60  ;;  %v2250_v5 = vshrl.u32 %v7322_v47, 16 }
  0x83   : > { %6294 = vmatprep.mubr.msk.bf16.mxu0 %vm763_vm2, %v5432_v41  ;;  %v2232_v41 = vshll.u32 %v7317_v43, 16  ;;  %v2229_v49 = vor.u32 %v2228_v57, %v7338_v59  ;;  %v2182_v52 = vrot.slane %v2181_v9, 4  ;;  %v2196_v38 = vrot.slane %v2195_v42, 4 }
  0x84   : > { %v2242_v20 = vrot.slane %v2240_v22, 5  ;;  %v7355_v1 = vrot.slane %v2246_v8, 5  ;;  %v2206_v62 = vrot.slane %v2205_v32, 4  ;;  %v2210_v29 = vrot.slane %v2208_v34, 5 }
  0x85   : > { %v2252_v43 = vrot.slane %v2250_v5, 4  ;;  %v2220_v3 = vrot.slane %v2219_v10, 4  ;;  %v2230_v48 = vrot.slane %v2229_v49, 4  ;;  %v2234_v60 = vrot.slane %v2232_v41, 5  ;;  %v7379_v41 = vld [vmem:[%s6687_s28 + $0x58] sm:$0xf] }
  0x86   : > { %6257 = vmatmul.mubr.msk.bf16.gmra.mxu1 %vm763_vm2, %v5380_v58  ;;  %v2239_v58 = vrot.slane %v2237_v19, 4  ;;  %v2264_v63 = vshll.u32 %v5537_v17, 16  ;;  %v9412_v57 = vcombine.low %v7171_v46, %v7181_v26  ;;  %v7362_v9 = vcombine.low %v2153_v45, %v2163_v14  ;;  %v7376_v45 = vld [vmem:[%s6687_s28 + $0x50] sm:$0x1]  ;;  %v7401_v49 = vld [vmem:[%s6687_s28 + $0x64] sm:$0xf] }
  0x87   : > { %6260 = vmatprep.mubr.msk.bf16.mxu1 %vm763_vm2, %v5381_v56  ;;  %v2261_v56 = vshrl.u32 %v5537_v17, 16  ;;  %v2256_v32 = vshll.u32 %v7343_v12, 16  ;;  %v2270_v34 = vshll.u32 %v7347_v55, 16  ;;  %v9413_v19 = vcombine.low %v7185_v27, %v7195_v0 }
  0x88   : > { %v2243_v42 = vor.u32 %v2242_v20, %v2239_v58  ;;  %v2177_v46 = vsel %vm6725_vm3, %v7319_v21, %v7301_v44  ;;  %v2253_v26 = vor.u32 %v2252_v43, %v7355_v1  ;;  %v2266_v10 = vrot.slane %v2264_v63, 5  ;;  %v5543_v21 = vld [vmem:[%s6687_s28 + $0x60] sm:$0xf] }
  0x89   : > { %v2263_v17 = vrot.slane %v2261_v56, 4  ;;  %v2187_v27 = vsel %vm6725_vm3, %v2182_v52, %v7307_v6  ;;  %v2201_v0 = vsel %vm6725_vm3, %v2196_v38, %v7314_v18  ;;  %v2274_v22 = vshrl.u32 %v7347_v55, 16 }
  0x8a   : > { %6295 = vmatmul.mubr.msk.bf16.gmra.mxu0 %vm763_vm2, %v9412_v57  ;;  %v2285_v44 = vshrl.u32 %v5540_v37, 16  ;;  %v9414_v43 = vcombine.low %v6821_v31, %v6828_v36  ;;  %v2211_v8 = vsel %vm6725_vm3, %v2206_v62, %v2210_v29  ;;  %v2225_v6 = vsel %vm6725_vm3, %v2220_v3, %v7338_v59 }
  0x8b   : > { %6298 = vmatprep.mubr.msk.bf16.mxu0 %vm763_vm2, %v9413_v19  ;;  %v2235_v14 = vsel %vm6725_vm3, %v2230_v48, %v2234_v60  ;;  %v2288_v18 = vshll.u32 %v5540_v37, 16  ;;  %v9415_v58 = vcombine.low %v6861_v30, %v6866_v39  ;;  %v2244_v31 = vrot.slane %v2243_v42, 4  ;;  %v5546_v30 = vld [vmem:[%s6687_s28 + $0x6c] sm:$0xf] }
  0x8c   : > { %v2258_v36 = vrot.slane %v2256_v32, 5  ;;  %v7407_v5 = vrot.slane %v2270_v34, 5  ;;  %v2294_v29 = vshll.u32 %v7379_v41, 16  ;;  %v2254_v62 = vrot.slane %v2253_v26, 4  ;;  %v7428_v34 = vld [vmem:[%s6687_s28 + $0x5c] sm:$0x1] }
  0x8d   : > { %v2267_v3 = vor.u32 %v2266_v10, %v2263_v17  ;;  %v2276_v59 = vrot.slane %v2274_v22, 4  ;;  %v2280_v48 = vshll.u32 %v7376_v45, 16  ;;  %v2287_v52 = vrot.slane %v2285_v44, 4  ;;  %v7442_v10 = vld [vmem:[%s6687_s28 + $0x68] sm:$0x1] }
  0x8e   : > { %6261 = vmatmul.mubr.msk.bf16.gmra.mxu1 %vm763_vm2, %v9414_v43  ;;  %v2290_v38 = vrot.slane %v2288_v18, 5  ;;  %v2298_v20 = vshrl.u32 %v7379_v41, 16  ;;  %v2309_v37 = vshrl.u32 %v5543_v21, 16  ;;  %v7413_v39 = vcombine.low %v2177_v46, %v2187_v27  ;;  %v7446_v27 = vld [vmem:[%s6687_s28 + $0x70] sm:$0xf] }
  0x8f   : > { %6264 = vmatprep.mubr.msk.bf16.mxu1 %vm763_vm2, %v9415_v58  ;;  %v7415_v56 = vcombine.low %v2201_v0, %v2211_v8  ;;  %v2312_v60 = vshll.u32 %v5543_v21, 16  ;;  %v2318_v63 = vshll.u32 %v7401_v49, 16  ;;  %v9416_v57 = vcombine.low %v7205_v13, %v7222_v33 }
  0x90   : > { %v7422_v42 = vcombine.low %v2225_v6, %v2235_v14  ;;  %v2249_v32 = vsel %vm6725_vm3, %v2244_v31, %v7355_v1  ;;  %v7430_v19 = vrot.slane %v2294_v29, 5  ;;  %v2300_v46 = vrot.slane %v2298_v20, 4  ;;  %v7458_v14 = vld [vmem:[%s6687_s28 + $0x74] sm:$0x1] }
  0x91   : > { %v9417_v26 = vcombine.low %v7217_v24, %v7242_v23  ;;  %v2259_v13 = vsel %vm6725_vm3, %v2254_v62, %v2258_v36  ;;  %v7438_v33 = vrot.slane %v2267_v3, 4  ;;  %v2277_v17 = vor.u32 %v2276_v59, %v7407_v5  ;;  %v5549_v36 = vld [vmem:[%s6687_s28 + $0x78] sm:$0xf] }
  0x92   : > { %6299 = vmatmul.mubr.msk.bf16.gmra.mxu0 %vm763_vm2, %v9416_v57  ;;  %v2322_v1 = vshrl.u32 %v7401_v49, 16  ;;  %v2291_v0 = vor.u32 %v2290_v38, %v2287_v52  ;;  %v2311_v22 = vrot.slane %v2309_v37, 4  ;;  %v2314_v24 = vrot.slane %v2312_v60, 5 }
  0x93   : > { %6302 = vmatprep.mubr.msk.bf16.mxu0 %vm763_vm2, %v9417_v26  ;;  %v2333_v23 = vshrl.u32 %v5546_v30, 16  ;;  %v9418_v44 = vcombine.low %v9402_v2, %v9401_v7  ;;  %v7452_v21 = vrot.slane %v2280_v48, 5  ;;  %v2304_v43 = vshll.u32 %v7428_v34, 16 }
  0x94   : > { %v7455_v8 = vrot.slane %v2318_v63, 5  ;;  %v2324_v6 = vrot.slane %v2322_v1, 4  ;;  %v9419_v18 = vcombine.low %v9406_v53, %v9405_v35  ;;  %v7464_v58 = vcombine.low %v2249_v32, %v2259_v13  ;;  %v7475_v53 = vld [vmem:[%s6687_s28 + $0x7c] sm:$0xf]  ;;  %v6558_v63 = vld [vmem:[%s6687_s28 + $0xc] sm:$0xff]  }
  0x95   : > { %v2301_v7 = vor.u32 %v2300_v46, %v7430_v19  ;;  %v2335_v2 = vrot.slane %v2333_v23, 4  ;;  %v2336_v31 = vshll.u32 %v5546_v30, 16  ;;  %v2273_v29 = vsel %vm6725_vm3, %v7438_v33, %v7407_v5  ;;  %v5552_v13 = vld [vmem:[%s6687_s28 + $0x84] sm:$0xf]  ;;  %v7500_v23 = vld [vmem:[%s6687_s28 + $0x88] sm:$0xf] }
  0x96   : > { %6265 = vmatmul.mubr.msk.bf16.gmra.mxu1 %vm763_vm2, %v9418_v44  ;;  %v2278_v62 = vrot.slane %v2277_v17, 4  ;;  %v2342_v3 = vshll.u32 %v7446_v27, 16  ;;  %v2346_v35 = vshrl.u32 %v7446_v27, 16  ;;  %v2292_v59 = vrot.slane %v2291_v0, 4 }
  0x97   : > { %6268 = vmatprep.mubr.msk.bf16.mxu1 %vm763_vm2, %v9419_v18  ;;  %v2315_v48 = vor.u32 %v2314_v24, %v2311_v22  ;;  %v2328_v52 = vshll.u32 %v7442_v10, 16  ;;  %v2338_v38 = vrot.slane %v2336_v31, 5  ;;  %v2306_v20 = vrot.slane %v2304_v43, 5 }
  0x98   : > { %v2325_v37 = vor.u32 %v2324_v6, %v7455_v8  ;;  %v7479_v30 = vrot.slane %v2342_v3, 5  ;;  %v2357_v60 = vshrl.u32 %v5549_v36, 16  ;;  %v9420_v5 = vcombine.low %v7277_v50, %v7281_v51 }
  0x99   : > { %v2302_v57 = vrot.slane %v2301_v7, 4  ;;  %v2339_v32 = vor.u32 %v2338_v38, %v2335_v2  ;;  %v2348_v46 = vrot.slane %v2346_v35, 4  ;;  %v2352_v26 = vshll.u32 %v7458_v14, 16  ;;  %v7521_v35 = vld [vmem:[%s6687_s28 + $0x94] sm:$0xf] }
  0x9a   : > { %6303 = vmatmul.mubr.msk.bf16.gmra.mxu0 %vm763_vm2, %v9420_v5  ;;  %v2283_v33 = vsel %vm6725_vm3, %v2278_v62, %v7452_v21  ;;  %v2360_v17 = vshll.u32 %v5549_v36, 16  ;;  %v2366_v50 = vshll.u32 %v7475_v53, 16  ;;  %v2370_v51 = vshrl.u32 %v7475_v53, 16  ;;  %v7507_v21 = vld [vmem:[%s6687_s28 + $0x80] sm:$0x1] }
  0x9b   : > { %6342 = vmatprep.mubr.msk.bf16.mxu0 %vm763_vm2, %v7362_v9  ;;  %v2297_v1 = vsel %vm6725_vm3, %v2292_v59, %v7430_v19  ;;  %v2316_v0 = vrot.slane %v2315_v48, 4  ;;  %v2330_v22 = vrot.slane %v2328_v52, 5  ;;  %v2349_v24 = vor.u32 %v2348_v46, %v7479_v30 }
  0x9c   : > { %v9421_v9 = vcombine.low %v9408_v61, %v6980_v16  ;;  %v2326_v44 = vrot.slane %v2325_v37, 4  ;;  %v2359_v43 = vrot.slane %v2357_v60, 4  ;;  %v2362_v6 = vrot.slane %v2360_v17, 5  ;;  %v5555_v61 = vld [vmem:[%s6687_s28 + $0x90] sm:$0xf]  ;;  %v6560_v37 = vld [vmem:[%s6687_s28 + $0x18] sm:$0xff]  }
  0x9d   : > { %v2381_v18 = vshrl.u32 %v5552_v13, 16  ;;  %v2307_v19 = vsel %vm6725_vm3, %v2302_v57, %v2306_v20  ;;  %v7512_v7 = vrot.slane %v2339_v32, 4  ;;  %v7514_v2 = vrot.slane %v2352_v26, 5  ;;  %v7528_v20 = vld [vmem:[%s9350_s1 + $0x40] sm:$0xff]  }
  0x9e   : > { %6269 = vmatmul.mubr.msk.bf16.gmra.mxu1 %vm763_vm2, %v9421_v9  ;;  %v2384_v16 = vshll.u32 %v5552_v13, 16  ;;  %v7517_v31 = vrot.slane %v2366_v50, 5  ;;  %v2372_v36 = vrot.slane %v2370_v51, 4  ;;  %v2390_v3 = vshll.u32 %v7500_v23, 16  ;;  %9422 = vst [vmem:[#allocation5_spill] sm:$0xff] %v7528_v20  ;;  %v6562_v32 = vld [vmem:[%s6687_s28 + $0x24] sm:$0xff]  }
  0x9f   : > { %6308 = vmatprep.mubr.msk.bf16.mxu1 %vm763_vm2, %v6558_v63  ;;  %v2383_v62 = vrot.slane %v2381_v18, 4  ;;  %v2350_v59 = vrot.slane %v2349_v24, 4  ;;  %v2376_v48 = vshll.u32 %v7507_v21, 16  ;;  %v2394_v38 = vshrl.u32 %v7500_v23, 16  ;;  %v7546_v13 = vld [vmem:[%s6687_s28 + $0x8c] sm:$0x1] }
  0xa0   : > { %v2386_v52 = vrot.slane %v2384_v16, 5  ;;  %v2321_v60 = vsel %vm6725_vm3, %v2316_v0, %v7455_v8  ;;  %v2331_v5 = vsel %vm6725_vm3, %v2326_v44, %v2330_v22  ;;  %v2363_v63 = vor.u32 %v2362_v6, %v2359_v43  ;;  %v7571_v24 = vld [vmem:[%s6687_s28 + $0xa0] sm:$0xf]  ;;  %v7583_v6 = vld [vmem:[%s6687_s28 + $0x98] sm:$0x1] }
  0xa1   : > { %v7536_v57 = vrot.slane %v2390_v3, 5  ;;  %v7541_v46 = vcombine.low %v2273_v29, %v2283_v33  ;;  %v7543_v26 = vcombine.low %v2297_v1, %v2307_v19  ;;  %v2396_v17 = vrot.slane %v2394_v38, 4  ;;  %v5558_v29 = vld [vmem:[%s6687_s28 + $0x9c] sm:$0xf]  ;;  %9424 = vst [vmem:[#allocation7_spill] sm:$0xff] %v7571_v24 }
  0xa2   : > { %6343 = vmatmul.mubr.msk.bf16.vlgmr.msra.gmra.mxu0 %vm763_vm2, %v7413_v39  ;;  %v2405_v8 = vshrl.u32 %v5555_v61, 16  ;;  %v2373_v50 = vor.u32 %v2372_v36, %v7517_v31  ;;  %v2387_v51 = vor.u32 %v2386_v52, %v2383_v62  ;;  %v2408_v0 = vshll.u32 %v5555_v61, 16  ;;  %v7557_v33 = vld [vmem:[%s9350_s1 + $0x38] sm:$0xff]   ;;  %v7596_v38 = vld [vmem:[%s6687_s28 + $0xac] sm:$0xf] }
  0xa3   : > { %6409 = vmatpush3.bf16.msra.mxu0 %v7062_v40  ;;  %6346 = vmatprep.mubr.msk.bf16.mxu0 %vm763_vm2, %v7415_v56  ;;  %v2414_v39 = vshll.u32 %v7521_v35, 16  ;;  %9423 = vst [vmem:[#allocation2_spill] sm:$0xff] %v7557_v33  ;;  %v7559_v1 = vcombine.low %v2321_v60, %v2331_v5  ;;  %v2345_v40 = vsel %vm6725_vm3, %v7512_v7, %v7479_v30  ;;  %v7568_v22 = vrot.slane %v2376_v48, 5 }
  0xa4   : > { %v2355_v56 = vsel %vm6725_vm3, %v2350_v59, %v7514_v2  ;;  %6476 = vmatprep.subr.bf16.mxu0 %v7528_v20  ;;  %v7575_v9 = vrot.slane %v2363_v63, 4  ;;  %v2397_v44 = vor.u32 %v2396_v17, %v7536_v57  ;;  %v2400_v43 = vshll.u32 %v7546_v13, 16  ;;  %9425 = vst [vmem:[#allocation9_spill] sm:$0xff] %v7596_v38  ;;  %v6564_v17 = vld [vmem:[%s6687_s28 + $0x3c] sm:$0xff]   ;;  %v7662_v20 = vld [vmem:[%s6687_s28 + $0xc4] sm:$0xf] }
  0xa5   : > { %v2418_v30 = vshrl.u32 %v7521_v35, 16  ;;  %v2407_v18 = vrot.slane %v2405_v8, 4  ;;  %v2410_v19 = vrot.slane %v2408_v0, 5  ;;  %v2429_v7 = vshrl.u32 %v5558_v29, 16 }
  0xa6   : > { %6309 = vmatmul.mubr.msk.bf16.vlgmr.msra.gmra.mxu1 %vm763_vm2, %v6560_v37  ;;  %v2432_v2 = vshll.u32 %v5558_v29, 16  ;;  %v7585_v16 = vrot.slane %v2373_v50, 4  ;;  %v7587_v61 = vrot.slane %v2387_v51, 4  ;;  %v7589_v36 = vrot.slane %v2414_v39, 5  ;;  %v6563_v37 = vld [vmem:[%s6687_s28 + $0x30] sm:$0xff]  }
  0xa7   : > { %6375 = vmatpush3.bf16.msra.mxu1 %v7082_v4  ;;  %6312 = vmatprep.mubr.msk.bf16.mxu1 %vm763_vm2, %v6562_v32  ;;  %v2438_v62 = vshll.u32 %v7571_v24, 16  ;;  %v5561_v4 = vld [vmem:[%s6687_s28 + $0xa8] sm:$0xf]  ;;  %v2420_v3 = vrot.slane %v2418_v30, 4  ;;  %v2431_v59 = vrot.slane %v2429_v7, 4  ;;  %v2442_v52 = vshrl.u32 %v7571_v24, 16 }
  0xa8   : > { %6442 = vmatprep.subr.bf16.mxu1 %v7557_v33  ;;  %v2434_v48 = vrot.slane %v2432_v2, 5  ;;  %v7599_v60 = vcombine.low %v2345_v40, %v2355_v56  ;;  %v7601_v5 = vrot.slane %v2397_v44, 4  ;;  %v7603_v63 = vrot.slane %v2400_v43, 5  ;;  %v7610_v50 = vld [vmem:[%s6687_s28 + $0xa4] sm:$0x1] }
  0xa9   : > { %v2424_v32 = vshll.u32 %v7583_v6, 16  ;;  %v2411_v8 = vor.u32 %v2410_v19, %v2407_v18  ;;  %9426 = vst [vmem:[#allocation8_spill] sm:$0xff] %v7610_v50  ;;  %v7612_v51 = vrot.slane %v2438_v62, 5  ;;  %v2444_v0 = vrot.slane %v2442_v52, 4  ;;  %v7631_v30 = vld [vmem:[%s6687_s28 + $0xb0] sm:$0x1] }
  0xaa   : > { %6347 = vmatmul.mubr.msk.bf16.gmra.mxu0 %vm763_vm2, %v7422_v42  ;;  %v2453_v39 = vshrl.u32 %v5561_v4, 16  ;;  %v2379_v42 = vsel %vm6725_vm3, %v7585_v16, %v7568_v22  ;;  %v2456_v40 = vshll.u32 %v5561_v4, 16  ;;  %v2462_v56 = vshll.u32 %v7596_v38, 16  ;;  %9427 = vst [vmem:[#allocation10_spill] sm:$0xff] %v7631_v30  ;;  %v5564_v19 = vld [vmem:[%s6687_s28 + $0xb4] sm:$0xf] }
  0xab   : > { %6350 = vmatprep.mubr.msk.bf16.mxu0 %vm763_vm2, %v7464_v58  ;;  %v2421_v58 = vor.u32 %v2420_v3, %v7589_v36  ;;  %v2435_v43 = vor.u32 %v2434_v48, %v2431_v59  ;;  %v2448_v22 = vshll.u32 %v7610_v50, 16  ;;  %v2466_v16 = vshrl.u32 %v7596_v38, 16  ;;  %v7640_v62 = vld [vmem:[%s6687_s28 + $0xb8] sm:$0xf]  ;;  %v7671_v24 = vld [vmem:[%s6687_s28 + $0xc8] sm:$0x1] }
  0xac   : > { %v2455_v18 = vrot.slane %v2453_v39, 4  ;;  %v2458_v7 = vrot.slane %v2456_v40, 5  ;;  %v7636_v2 = vrot.slane %v2462_v56, 5  ;;  %9428 = vst [vmem:[#allocation11_spill] sm:$0xff] %v7640_v62  ;;  %v2403_v4 = vsel %vm6725_vm3, %v7601_v5, %v7603_v63  ;;  %v7654_v39 = vld [vmem:[%s6687_s28 + $0xbc] sm:$0x1] }
  0xad   : > { %v7647_v3 = vrot.slane %v2411_v8, 4  ;;  %v7649_v59 = vrot.slane %v2424_v32, 5  ;;  %v2445_v48 = vor.u32 %v2444_v0, %v7612_v51  ;;  %v2468_v52 = vrot.slane %v2466_v16, 4  ;;  %v5567_v63 = vld [vmem:[%s6687_s28 + $0xc0] sm:$0xf]  ;;  %v6565_v32 = vld [vmem:[%s6687_s28 + $0x48] sm:$0xff]  }
  0xae   : > { %6313 = vmatmul.mubr.msk.bf16.gmra.mxu1 %vm763_vm2, %v6563_v37  ;;  %v2472_v37 = vshll.u32 %v7631_v30, 16  ;;  %v2477_v40 = vshrl.u32 %v5564_v19, 16  ;;  %v2422_v56 = vrot.slane %v2421_v58, 4  ;;  %v2459_v44 = vor.u32 %v2458_v7, %v2455_v18 }
  0xaf   : > { %6316 = vmatprep.mubr.msk.bf16.mxu1 %vm763_vm2, %v6564_v17  ;;  %v2480_v17 = vshll.u32 %v5564_v19, 16  ;;  %v2486_v29 = vshll.u32 %v7640_v62, 16  ;;  %v2490_v5 = vshrl.u32 %v7640_v62, 16  ;;  %v2436_v8 = vrot.slane %v2435_v43, 4  ;;  %v6566_v19 = vld [vmem:[%s6687_s28 + $0x54] sm:$0xff]  }
  0xb0   : > { %v2450_v33 = vrot.slane %v2448_v22, 5  ;;  %v2469_v0 = vor.u32 %v2468_v52, %v7636_v2  ;;  %v2479_v16 = vrot.slane %v2477_v40, 4  ;;  %v2496_v30 = vshll.u32 %v7654_v39, 16 }
  0xb1   : > { %v2482_v58 = vrot.slane %v2480_v17, 5  ;;  %v2488_v18 = vrot.slane %v2486_v29, 5  ;;  %v2492_v7 = vrot.slane %v2490_v5, 4  ;;  %v2446_v43 = vrot.slane %v2445_v48, 4 }
  0xb2   : > { %6351 = vmatmul.mubr.msk.bf16.gmra.mxu0 %vm763_vm2, %v7541_v46  ;;  %v2474_v22 = vrot.slane %v2472_v37, 5  ;;  %v2501_v62 = vshrl.u32 %v5567_v63, 16  ;;  %v2504_v52 = vshll.u32 %v5567_v63, 16  ;;  %v2460_v40 = vrot.slane %v2459_v44, 4 }
  0xb3   : > { %6354 = vmatprep.mubr.msk.bf16.mxu0 %vm763_vm2, %v7543_v26  ;;  %v2483_v38 = vor.u32 %v2482_v58, %v2479_v16  ;;  %v2493_v50 = vor.u32 %v2492_v7, %v2488_v18  ;;  %v2510_v46 = vshll.u32 %v7662_v20, 16  ;;  %v2470_v29 = vrot.slane %v2469_v0, 4 }
  0xb4   : > { %v2503_v17 = vrot.slane %v2501_v62, 4  ;;  %v2506_v5 = vrot.slane %v2504_v52, 5  ;;  %v2514_v26 = vshrl.u32 %v7662_v20, 16  ;;  %v2498_v44 = vrot.slane %v2496_v30, 5 }
  0xb5   : > { %v2484_v48 = vrot.slane %v2483_v38, 4  ;;  %v2494_v37 = vrot.slane %v2493_v50, 4  ;;  %v7677_v63 = vrot.slane %v2510_v46, 5  ;;  %v2520_v58 = vshll.u32 %v7671_v24, 16 }
  0xb6   : > { %6317 = vmatmul.mubr.msk.bf16.gmra.mxu1 %vm763_vm2, %v6565_v32  ;;  %v9429_v32 = vsel %vm6725_vm3, %v7575_v9, %v7517_v31  ;;  %v2507_v62 = vor.u32 %v2506_v5, %v2503_v17  ;;  %v2516_v16 = vrot.slane %v2514_v26, 4  ;;  %v9430_v38 = vsel %vm6725_vm3, %v7587_v61, %v7536_v57 }
  0xb7   : > { %6320 = vmatprep.mubr.msk.bf16.mxu1 %vm763_vm2, %v6566_v19  ;;  %v5581_v0 = vcombine.low %v9429_v32, %v2379_v42  ;;  %v5582_v50 = vcombine.low %v9430_v38, %v2403_v4  ;;  %v2417_v30 = vsel %vm6725_vm3, %v7647_v3, %v7589_v36  ;;  %v2427_v31 = vsel %vm6725_vm3, %v2422_v56, %v7649_v59  ;;  %v5607_v42 = vld [vmem:[%s6687_s28 + $0x24] sm:$0xe]  ;;  %v7711_v3 = vld [vmem:[%s6687_s28 + $0xc] sm:$0xe] }
  0xb8   : > { %v2441_v9 = vsel %vm6725_vm3, %v2436_v8, %v7612_v51  ;;  %v6567_v19 = vld [vmem:[%s6687_s28 + $0x60] sm:$0xff]   ;;  %v2451_v57 = vsel %vm6725_vm3, %v2446_v43, %v2450_v33  ;;  %v2465_v61 = vsel %vm6725_vm3, %v2460_v40, %v7636_v2  ;;  %v2475_v36 = vsel %vm6725_vm3, %v2470_v29, %v2474_v22  ;;  %v6568_v51 = vld [vmem:[%s6687_s28 + $0x6c] sm:$0xff]   ;;  %v5609_v29 = vld [vmem:[%s6687_s28 + $0x3c] sm:$0xe] }
  0xb9   : > { %v2517_v4 = vor.u32 %v2516_v16, %v7677_v63  ;;  %v2489_v59 = vsel %vm6725_vm3, %v2484_v48, %v2488_v18  ;;  %v2499_v33 = vsel %vm6725_vm3, %v2494_v37, %v2498_v44  ;;  %v7720_v56 = vrot.slane %v2507_v62, 4  ;;  %v5608_v8 = vld [vmem:[%s6687_s28 + $0x30] sm:$0xe]  ;;  %v5610_v48 = vld [vmem:[%s6687_s28 + $0x48] sm:$0xe]  ;;  %v9433_v38 = vld [vmem:[#allocation6_spill] sm:$0xff] }
  0xba   : > { %6355 = vmatmul.mubr.msk.bf16.gmra.mxu0 %vm763_vm2, %v7559_v1  ;;  %v2888_v2 = vrot.slane %v7211_v15, 5  ;;  %v7726_v7 = vcombine.low %v2417_v30, %v2427_v31  ;;  %v7730_v43 = vrot.slane %v2520_v58, 5  ;;  %v5623_v22 = vrot.slane %v5607_v42, 9  ;;  %v9432_v16 = vld [vmem:[#allocation4_spill] sm:$0xff]  ;;  %v6575_v15 = vld [vmem:[%s6687_s28 + $0xc0] sm:$0xff]  }
  0xbb   : > { %6358 = vmatprep.mubr.msk.bf16.mxu0 %vm763_vm2, %v7599_v60  ;;  %v7728_v1 = vrot.slane %v2517_v4, 4  ;;  %v7732_v18 = vcombine.low %v2441_v9, %v2451_v57  ;;  %v7734_v52 = vcombine.low %v2465_v61, %v2475_v36  ;;  %v5621_v40 = vrot.slane %v7711_v3, 9  ;;  %v5611_v9 = vld [vmem:[%s6687_s28 + $0x54] sm:$0xe]  ;;  %v6569_v36 = vld [vmem:[%s6687_s28 + $0x78] sm:$0xff]  }
  0xbc   : > { %v2902_v46 = vrot.slane %v7263_v25, 5  ;;  %v7740_v60 = vcombine.low %v2489_v59, %v2499_v33  ;;  %v2891_v17 = vrot.slane %v7226_v54, 5  ;;  %v2905_v5 = vrot.slane %v7304_v11, 5 }
  0xbd   : > { %v5624_v26 = vrot.slane %v5608_v8, 9  ;;  %v2513_v25 = vsel %vm6725_vm3, %v7720_v56, %v7677_v63  ;;  %v7752_v37 = vrot.slane %v2888_v2, 4  ;;  %v2523_v62 = vsel %vm6725_vm3, %v7728_v1, %v7730_v43  ;;  %v5612_v8 = vld [vmem:[%s6687_s28 + $0x60] sm:$0xe]  ;;  %v6576_v56 = vld [vmem:[%s6687_s28 + $0x18] sm:$0xff]  }
  0xbe   : > { %6321 = vmatmul.mubr.msk.bf16.gmra.mxu1 %vm763_vm2, %v6567_v19  ;;  %v7756_v32 = vsel %vm7001_vm6, %v5623_v22, %v2902_v46  ;;  %v2904_v11 = vrot.slane %v2902_v46, 4  ;;  %v2909_v58 = vrot.slane %v9432_v16, 5  ;;  %v2912_v30 = vrot.slane %v9433_v38, 5  ;;  %v5606_v43 = vld [vmem:[%s6687_s28 + $0x18] sm:$0xe] }
  0xbf   : > { %6324 = vmatprep.mubr.msk.bf16.mxu1 %vm763_vm2, %v6568_v51  ;;  %v5625_v31 = vrot.slane %v5609_v29, 9  ;;  %v2916_v19 = vrot.slane %v7322_v47, 5  ;;  %v2919_v57 = vrot.slane %v7343_v12, 5  ;;  %v5626_v61 = vrot.slane %v5610_v48, 9  ;;  %v6570_v47 = vld [vmem:[%s6687_s28 + $0x84] sm:$0xff]  }
  0xc0   : > { %v7767_v42 = vsel %vm7001_vm6, %v2904_v11, %v2905_v5  ;;  %v7776_v51 = vsel %vm7001_vm6, %v5624_v26, %v2909_v58  ;;  %v2911_v59 = vrot.slane %v2909_v58, 4  ;;  %v2923_v33 = vrot.slane %v7347_v55, 5  ;;  %v5613_v48 = vld [vmem:[%s6687_s28 + $0x6c] sm:$0xe]  ;;  %v5614_v58 = vld [vmem:[%s6687_s28 + $0x78] sm:$0xe] }
  0xc1   : > { %v5641_v4 = vcombine.low %v7756_v32, %v7767_v42  ;;  %v7784_v12 = vsel %vm7001_vm6, %v5625_v31, %v2916_v19  ;;  %v2918_v22 = vrot.slane %v2916_v19, 4  ;;  %v2926_v46 = vrot.slane %v7376_v45, 5 }
  0xc2   : > { %6359 = vmatmul.mubr.msk.bf16.gmra.mxu0 %vm763_vm2, %v5581_v0  ;;  %v5627_v29 = vrot.slane %v5611_v9, 9  ;;  %v7790_v5 = vsel %vm7001_vm6, %v2911_v59, %v2912_v30  ;;  %v7794_v55 = vsel %vm7001_vm6, %v5626_v61, %v2923_v33  ;;  %v2925_v0 = vrot.slane %v2923_v33, 4  ;;  %v5615_v61 = vld [vmem:[%s6687_s28 + $0x84] sm:$0xe] }
  0xc3   : > { %6362 = vmatprep.mubr.msk.bf16.mxu0 %vm763_vm2, %v5582_v50  ;;  %v2930_v26 = vrot.slane %v7379_v41, 5  ;;  %v5642_v11 = vcombine.low %v7776_v51, %v7790_v5  ;;  %v7802_v45 = vsel %vm7001_vm6, %v2918_v22, %v2919_v57  ;;  %v2933_v50 = vrot.slane %v7428_v34, 5  ;;  %v8054_v34 = vld [vmem:[%s6687_s28 + $0x38] sm:$0x1] }
  0xc4   : > { %v5628_v16 = vrot.slane %v5612_v8, 9  ;;  %v5643_v38 = vcombine.low %v7784_v12, %v7802_v45  ;;  %v7811_v41 = vsel %vm7001_vm6, %v2925_v0, %v2926_v46  ;;  %v2937_v9 = vrot.slane %v7401_v49, 5  ;;  %v5616_v46 = vld [vmem:[%s6687_s28 + $0x90] sm:$0xe] }
  0xc5   : > { %v7815_v30 = vsel %vm7001_vm6, %v5627_v29, %v2930_v26  ;;  %v2932_v31 = vrot.slane %v2930_v26, 4  ;;  %v2940_v19 = vrot.slane %v7442_v10, 5  ;;  %v5629_v57 = vrot.slane %v5613_v48, 9  ;;  %v6571_v29 = vld [vmem:[%s6687_s28 + $0x90] sm:$0xff]   ;;  %v6572_v48 = vld [vmem:[%s6687_s28 + $0x9c] sm:$0xff]  }
  0xc6   : > { %6325 = vmatmul.mubr.msk.bf16.gmra.mxu1 %vm763_vm2, %v6569_v36  ;;  %v2944_v59 = vrot.slane %v7446_v27, 5  ;;  %v2947_v33 = vrot.slane %v7458_v14, 5  ;;  %v5630_v8 = vrot.slane %v5614_v58, 9  ;;  %v7833_v49 = vsel %vm7001_vm6, %v5628_v16, %v2937_v9 }
  0xc7   : > { %6328 = vmatprep.mubr.msk.bf16.mxu1 %vm763_vm2, %v6570_v47  ;;  %v7825_v36 = vsel %vm7001_vm6, %v2932_v31, %v2933_v50  ;;  %v2939_v10 = vrot.slane %v2937_v9, 4  ;;  %v2951_v22 = vrot.slane %v7475_v53, 5  ;;  %v2954_v14 = vrot.slane %v7507_v21, 5  ;;  %v5617_v31 = vld [vmem:[%s6687_s28 + $0x9c] sm:$0xe] }
  0xc8   : > { %v7840_v0 = vsel %vm7001_vm6, %v5629_v57, %v2944_v59  ;;  %v2946_v27 = vrot.slane %v2944_v59, 4  ;;  %v5631_v26 = vrot.slane %v5615_v61, 9  ;;  %v2958_v58 = vrot.slane %v7500_v23, 5  ;;  %v5618_v57 = vld [vmem:[%s6687_s28 + $0xa8] sm:$0xe] }
  0xc9   : > { %v7848_v50 = vsel %vm7001_vm6, %v2939_v10, %v2940_v19  ;;  %v7852_v53 = vsel %vm7001_vm6, %v5630_v8, %v2951_v22  ;;  %v2953_v16 = vrot.slane %v2951_v22, 4  ;;  %v2961_v9 = vrot.slane %v7546_v13, 5  ;;  %v5619_v22 = vld [vmem:[%s6687_s28 + $0xb4] sm:$0xe]  ;;  %v5620_v13 = vld [vmem:[%s6687_s28 + $0xc0] sm:$0xe] }
  0xca   : > { %6363 = vmatmul.mubr.msk.bf16.gmra.mxu0 %vm763_vm2, %v7726_v7  ;;  %v7862_v7 = vsel %vm7001_vm6, %v2946_v27, %v2947_v33  ;;  %v5632_v19 = vrot.slane %v5616_v46, 9  ;;  %v2960_v59 = vrot.slane %v2958_v58, 4  ;;  %v2965_v33 = vrot.slane %v7521_v35, 5  ;;  %v9434_v27 = vld [vmem:[#allocation7_spill] sm:$0xff] }
  0xcb   : > { %6366 = vmatprep.mubr.msk.bf16.mxu0 %vm763_vm2, %v7732_v18  ;;  %v7870_v23 = vsel %vm7001_vm6, %v2953_v16, %v2954_v14  ;;  %v7874_v18 = vsel %vm7001_vm6, %v5631_v26, %v2958_v58  ;;  %v2968_v8 = vrot.slane %v7583_v6, 5  ;;  %v5633_v10 = vrot.slane %v5617_v31, 9  ;;  %v9435_v26 = vld [vmem:[#allocation8_spill] sm:$0xff]  ;;  %v9436_v31 = vld [vmem:[#allocation9_spill] sm:$0xff]  ;;  %v6573_v61 = vld [vmem:[%s6687_s28 + $0xa8] sm:$0xff]  }
  0xcc   : > { %v7885_v46 = vsel %vm7001_vm6, %v2960_v59, %v2961_v9  ;;  %v2972_v14 = vrot.slane %v9434_v27, 5  ;;  %v5634_v16 = vrot.slane %v5618_v57, 9  ;;  %v7893_v6 = vsel %vm7001_vm6, %v5632_v19, %v2965_v33  ;;  %v9437_v27 = vld [vmem:[#allocation10_spill] sm:$0xff] }
  0xcd   : > { %v2967_v58 = vrot.slane %v2965_v33, 4  ;;  %v5635_v57 = vrot.slane %v5619_v22, 9  ;;  %v2889_v1 = vsel %vm7001_vm6, %v5621_v40, %v2888_v2  ;;  %v2892_v63 = vsel %vm7001_vm6, %v7752_v37, %v2891_v17  ;;  %v6598_v17 = vld [vmem:[%s6687_s28 + $0x20] sm:$0x1] }
  0xce   : > { %6329 = vmatmul.mubr.msk.bf16.gmra.mxu1 %vm763_vm2, %v6571_v29  ;;  %v2975_v29 = vrot.slane %v9435_v26, 5  ;;  %v7899_v9 = vsel %vm7001_vm6, %v5633_v10, %v2972_v14  ;;  %v2974_v59 = vrot.slane %v2972_v14, 4  ;;  %v2982_v26 = vrot.slane %v9437_v27, 5  ;;  %v6574_v10 = vld [vmem:[%s6687_s28 + $0xb4] sm:$0xff]  }
  0xcf   : > { %6332 = vmatprep.mubr.msk.bf16.mxu1 %vm763_vm2, %v6572_v48  ;;  %v2979_v48 = vrot.slane %v9436_v31, 5  ;;  %v7905_v35 = vsel %vm7001_vm6, %v2967_v58, %v2968_v8  ;;  %v9438_v31 = vld [vmem:[#allocation11_spill] sm:$0xff]  ;;  %v2989_v8 = vrot.slane %v7654_v39, 5  ;;  %v5636_v58 = vrot.slane %v5620_v13, 9 }
  0xd0   : > { %v2986_v21 = vrot.slane %v9438_v31, 5  ;;  %v7919_v14 = vsel %vm7001_vm6, %v2974_v59, %v2975_v29  ;;  %v2993_v13 = vrot.slane %v7662_v20, 5  ;;  %v6597_v59 = vld [vmem:[%s6687_s28 + $0x1c] sm:$0xf]  ;;  %v5587_v20 = vcombine.low %v2513_v25, %v2523_v62  ;;  %v6580_v31 = vld [vmem:[%s6687_s28 + $0x30] sm:$0xff]  }
  0xd1   : > { %v7909_v19 = vsel %vm7001_vm6, %v5634_v16, %v2979_v48  ;;  %v2981_v33 = vrot.slane %v2979_v48, 4  ;;  %v2895_v27 = vrot.slane %v6597_v59, 5  ;;  %v5639_v54 = vcombine.low %v2889_v1, %v2892_v63 }
  0xd2   : > { %6367 = vmatmul.mubr.msk.bf16.gmra.mxu0 %vm763_vm2, %v7734_v52  ;;  %v7932_v48 = vsel %vm7001_vm6, %v5635_v57, %v2986_v21  ;;  %v2988_v29 = vrot.slane %v2986_v21, 4  ;;  %v7959_v21 = vsel %vm7001_vm6, %v5636_v58, %v2993_v13  ;;  %v5622_v2 = vrot.slane %v5606_v43, 9 }
  0xd3   : > { %6370 = vmatprep.mubr.msk.bf16.mxu0 %vm763_vm2, %v7740_v60  ;;  %v7928_v52 = vsel %vm7001_vm6, %v2981_v33, %v2982_v26  ;;  %v2996_v60 = vrot.slane %v7671_v24, 5  ;;  %v2897_v40 = vrot.slane %v2895_v27, 4  ;;  %v2898_v37 = vrot.slane %v6598_v17, 5  ;;  %v6578_v33 = vld [vmem:[%s6687_s28 + $0x24] sm:$0xff]  }
  0xd4   : > { %v7942_v26 = vsel %vm7001_vm6, %v2988_v29, %v2989_v8  ;;  %v2896_v62 = vsel %vm7001_vm6, %v5622_v2, %v2895_v27  ;;  %v7994_v8 = vld [vmem:[%s6687_s28 + $0x1c] sm:$0xf]  ;;  %v5742_v29 = vld [vmem:[%s6687_s28 + $0x24] sm:$0xf]  ;;  %v6582_v2 = vld [vmem:[%s6687_s28 + $0x48] sm:$0xff]  }
  0xd5   : > { %v2899_v57 = vsel %vm7001_vm6, %v2897_v40, %v2898_v37  ;;  %v3732_v1 = vshrl.u32 %v5742_v29, 16  ;;  %v3735_v63 = vshll.u32 %v5742_v29, 16  ;;  %v5741_v40 = vld [vmem:[%s6687_s28 + $0x20] sm:$0x1] }
  0xd6   : > { %6333 = vmatmul.mubr.msk.bf16.gmra.mxu1 %vm763_vm2, %v6573_v61  ;;  %v2995_v61 = vrot.slane %v2993_v13, 4  ;;  %v5640_v58 = vcombine.low %v2896_v62, %v2899_v57  ;;  %v7999_v13 = vld [vmem:[%s6687_s28 + $0x28] sm:$0xf]  ;;  %v3727_v42 = vshll.u32 %v5741_v40, 16 }
  0xd7   : > { %6336 = vmatprep.mubr.msk.bf16.mxu1 %vm763_vm2, %v6574_v10  ;;  %v5739_v10 = vld [vmem:[%s6687_s28 + $0x18] sm:$0xf]  ;;  %v3745_v43 = vshrl.u32 %v7999_v13, 16 }
  0xd8   : > { %v7976_v25 = vsel %vm7001_vm6, %v2995_v61, %v2996_v60  ;;  %v9439_v60 = vld [vmem:[#allocation5_spill] sm:$0xff]  ;;  %v3708_v59 = vshrl.u32 %v5739_v10, 16  ;;  %v3711_v27 = vshll.u32 %v5739_v10, 16  ;;  %v3721_v61 = vshrl.u32 %v7994_v8, 16  ;;  %v5745_v10 = vld [vmem:[%s6687_s28 + $0x30] sm:$0xf] }
  0xd9   : > { %v3747_v29 = vrot.slane %v3745_v43, 4  ;;  %v4462_v43 = vrot.slane %v7999_v13, 5  ;;  %v3729_v51 = vrot.slane %v3727_v42, 5 }
  0xda   : > { %6371 = vmatmul.mubr.msk.bf16.gmra.mxu0 %vm763_vm2, %v5587_v20  ;;  %v3717_v20 = vshll.u32 %v7994_v8, 16  ;;  %v3710_v17 = vrot.slane %v3708_v59, 4  ;;  %v3713_v37 = vrot.slane %v3711_v27, 5  ;;  %v3723_v57 = vrot.slane %v3721_v61, 4  ;;  %v8027_v59 = vld [vmem:[%s6687_s28 + $0x34] sm:$0xf] }
  0xdb   : > { %6410 = vmatprep.mubr.msk.bf16.mxu0 %vm763_vm2, %v6576_v56  ;;  %v3741_v56 = vshll.u32 %v7999_v13, 16  ;;  %v5822_v61 = vld [vmem:[%s6687_s28 + $0x18] sm:$0xe]  ;;  %v4464_v22 = vrot.slane %v4462_v43, 4 }
  0xdc   : > { %v8016_v62 = vrot.slane %v3717_v20, 5  ;;  %v3714_v27 = vor.u32 %v3713_v37, %v3710_v17  ;;  %v3765_v17 = vshll.u32 %v8027_v59, 16  ;;  %v3769_v37 = vshrl.u32 %v8027_v59, 16  ;;  %v6583_v13 = vld [vmem:[%s6687_s28 + $0x54] sm:$0xff]  }
  0xdd   : > { %v5838_v5 = vrot.slane %v5822_v61, 9 }
  0xde   : > { %6337 = vmatmul.mubr.msk.bf16.gmra.mxu1 %vm763_vm2, %v6575_v15  ;;  %v9440_v15 = vld [vmem:[#allocation2_spill] sm:$0xff]  ;;  %v3724_v20 = vor.u32 %v3723_v57, %v8016_v62  ;;  %v8056_v42 = vrot.slane %v3765_v17, 5 }
  0xdf   : > { %6376 = vmatprep.mubr.msk.bf16.mxu1 %vm763_vm2, %v5639_v54  ;;  %v6581_v54 = vld [vmem:[%s6687_s28 + $0x3c] sm:$0xff]  }
  0xe0   : > { %v8090_v17 = vld [vmem:[%s6687_s28 + $0x40] sm:$0xf] }
  0xe2   : > { %6411 = vmatmul.mubr.msk.bf16.vlgmr.msra.gmra.mxu0 %vm763_vm2, %v6578_v33  ;;  %v3734_v33 = vrot.slane %v3732_v1, 4  ;;  %v3756_v1 = vshrl.u32 %v5745_v10, 16 }
  0xe3   : > { %6477 = vmatpush3.bf16.msra.mxu0 %v9439_v60  ;;  %6414 = vmatprep.mubr.msk.bf16.mxu0 %vm763_vm2, %v6580_v31  ;;  %v3737_v31 = vrot.slane %v3735_v63, 5  ;;  %v5744_v60 = vld [vmem:[%s6687_s28 + $0x2c] sm:$0x1]  ;;  %v3759_v63 = vshll.u32 %v5745_v10, 16  ;;  %v3715_v10 = vrot.slane %v3714_v27, 4 }
  0xe4   : > { %v3758_v3 = vrot.slane %v3756_v1, 4  ;;  %v4465_v12 = vrot.slane %v5744_v60, 5 }
  0xe5   : > { %v3761_v24 = vrot.slane %v3759_v63, 5  ;;  %v3720_v61 = vsel %vm6725_vm3, %v3715_v10, %v8016_v62 }
  0xe6   : > { %6377 = vmatmul.mubr.msk.bf16.vlgmr.msra.gmra.mxu1 %vm763_vm2, %v5640_v58  ;;  %v8019_v58 = vrot.slane %v3741_v56, 5  ;;  %v8022_v32 = vpop.f32.mrf.mxu0  ;;  %v3738_v56 = vor.u32 %v3737_v31, %v3734_v33  ;;  %v4458_v33 = vrot.slane %v5741_v40, 5  ;;  %v6584_v31 = vld [vmem:[%s6687_s28 + $0x60] sm:$0xff]   ;;  %v3771_v40 = vrot.slane %v3769_v37, 4 }
  0xe7   : > { %6443 = vmatpush3.bf16.msra.mxu1 %v9440_v15  ;;  %6380 = vmatprep.mubr.msk.bf16.mxu1 %vm763_vm2, %v5641_v4  ;;  %v4455_v4 = vrot.slane %v7994_v8, 5  ;;  %v8085_v62 = vsel %vm7001_vm6, %v4464_v22, %v4465_v12  ;;  %v3793_v12 = vshrl.u32 %v8090_v17, 16 }
  0xe8   : > { %v3748_v15 = vor.u32 %v3747_v29, %v8019_v58  ;;  %v8048_v57 = vpop.f32.mrf.mxu0  ;;  %v3725_v29 = vrot.slane %v3724_v20, 4  ;;  %v3739_v39 = vrot.slane %v3738_v56, 4  ;;  %v3762_v56 = vor.u32 %v3761_v24, %v3758_v3 }
  0xe9   : > { %v8063_v20 = vsel %vm7001_vm6, %v5838_v5, %v4455_v4  ;;  %v9443_v24 = vcombine.low %v7794_v55, %v7811_v41  ;;  %v3772_v22 = vor.u32 %v3771_v40, %v8056_v42  ;;  %v6585_v55 = vld [vmem:[%s6687_s28 + $0x6c] sm:$0xff]   ;;  %v6586_v41 = vld [vmem:[%s6687_s28 + $0x78] sm:$0xff]  }
  0xea   : > { %6415 = vmatmul.mubr.msk.bf16.gmra.mxu0 %vm763_vm2, %v6581_v54  ;;  %v3751_v54 = vshll.u32 %v5744_v60, 16  ;;  %v8059_v27 = vpop.f32.mrf.mxu0  ;;  %v5824_v60 = vld [vmem:[%s6687_s28 + $0x30] sm:$0xe]  ;;  %v3730_v1 = vsel %vm6725_vm3, %v3725_v29, %v3729_v51  ;;  %v5751_v51 = vld [vmem:[%s6687_s28 + $0x48] sm:$0xf]  ;;  %v8115_v5 = vrot.slane %v3762_v56, 4 }
  0xeb   : > { %6418 = vmatprep.mubr.msk.bf16.mxu0 %vm763_vm2, %v6582_v2  ;;  %v8037_v8 = vpop.f32.mrf.mxu1  ;;  %v5823_v2 = vld [vmem:[%s6687_s28 + $0x24] sm:$0xe]  ;;  %v5840_v3 = vrot.slane %v5824_v60, 9  ;;  %v8126_v29 = vld [vmem:[%s6687_s28 + $0x44] sm:$0x1]  ;;  %v3773_v40 = vrot.slane %v3772_v22, 4 }
  0xec   : > { %9441 = vst [vmem:[#allocation3_spill] sm:$0xff] %v8037_v8  ;;  %v5839_v16 = vrot.slane %v5823_v2, 9  ;;  %v3753_v47 = vrot.slane %v3751_v54, 5  ;;  %v3775_v54 = vshll.u32 %v8054_v34, 16  ;;  %v5748_v2 = vld [vmem:[%s6687_s28 + $0x3c] sm:$0xf]  ;;  %v8108_v37 = vpop.f32.mrf.mxu0 }
  0xed   : > { %v8051_v45 = vpop.f32.mrf.mxu1  ;;  %v5754_v56 = vld [vmem:[%s6687_s28 + $0x54] sm:$0xf]  ;;  %v8143_v22 = vld [vmem:[%s6687_s28 + $0x58] sm:$0xf] }
  0xee   : > { %6381 = vmatmul.mubr.msk.bf16.gmra.mxu1 %vm763_vm2, %v5642_v11  ;;  %v4457_v11 = vrot.slane %v4455_v4, 4  ;;  %9442 = vst [vmem:[#allocation12_spill] sm:$0xff] %v8051_v45  ;;  %v3744_v4 = vsel %vm6725_vm3, %v3739_v39, %v8019_v58  ;;  %v4469_v58 = vrot.slane %v8027_v59, 5  ;;  %v3780_v59 = vshrl.u32 %v5748_v2, 16 }
  0xef   : > { %6384 = vmatprep.mubr.msk.bf16.mxu1 %vm763_vm2, %v5643_v38  ;;  %v3749_v38 = vrot.slane %v3748_v15, 4  ;;  %v8081_v15 = vsel %vm7001_vm6, %v5839_v16, %v4462_v43  ;;  %v8096_v39 = vpop.f32.mrf.mxu1  ;;  %v9445_v43 = vcombine.low %v7815_v30, %v7825_v36  ;;  %v3789_v30 = vshll.u32 %v8090_v17, 16  ;;  %v8119_v36 = vld [vmem:[%s6687_s28 + $0x4c] sm:$0xf] }
  0xf0   : > { %v8074_v63 = vsel %vm7001_vm6, %v4457_v11, %v4458_v33  ;;  %9444 = vst [vmem:[#allocation4_spill] sm:$0xff] %v8096_v39  ;;  %v3783_v11 = vshll.u32 %v5748_v2, 16  ;;  %v3777_v10 = vrot.slane %v3775_v54, 5  ;;  %v8133_v60 = vsel %vm7001_vm6, %v5840_v3, %v4469_v58  ;;  %v6587_v39 = vld [vmem:[%s6687_s28 + $0x84] sm:$0xff]  }
  0xf1   : > { %v3754_v16 = vsel %vm6725_vm3, %v3749_v38, %v3753_v47  ;;  %v8129_v38 = vpop.f32.mrf.mxu1  ;;  %v3804_v54 = vshrl.u32 %v5751_v51, 16  ;;  %v3807_v2 = vshll.u32 %v5751_v51, 16  ;;  %v3782_v3 = vrot.slane %v3780_v59, 4  ;;  %v5825_v51 = vld [vmem:[%s6687_s28 + $0x3c] sm:$0xe] }
  0xf2   : > { %6419 = vmatmul.mubr.msk.bf16.gmra.mxu0 %vm763_vm2, %v6583_v13  ;;  %v8110_v13 = vcombine.low %v3720_v61, %v3730_v1  ;;  %v8121_v33 = vcombine.low %v3744_v4, %v3754_v16  ;;  %9446 = vst [vmem:[#allocation6_spill] sm:$0xff] %v8129_v38  ;;  %v4471_v61 = vrot.slane %v4469_v58, 4  ;;  %v4472_v1 = vrot.slane %v8054_v34, 5 }
  0xf3   : > { %6422 = vmatprep.mubr.msk.bf16.mxu0 %vm763_vm2, %v6584_v31  ;;  %v3817_v16 = vshrl.u32 %v8119_v36, 16  ;;  %v3768_v34 = vsel %vm6725_vm3, %v8115_v5, %v8056_v42  ;;  %v3785_v58 = vrot.slane %v3783_v11, 5  ;;  %v4476_v31 = vrot.slane %v8090_v17, 5 }
  0xf4   : > { %v3828_v47 = vshrl.u32 %v5754_v56, 16  ;;  %v3831_v38 = vshll.u32 %v5754_v56, 16  ;;  %v8163_v42 = vsel %vm7001_vm6, %v4471_v61, %v4472_v1  ;;  %v3799_v5 = vshll.u32 %v8126_v29, 16  ;;  %v6588_v56 = vld [vmem:[%s6687_s28 + $0x90] sm:$0xff]  }
  0xf5   : > { %v3837_v59 = vshll.u32 %v8143_v22, 16  ;;  %v3841_v17 = vshrl.u32 %v8143_v22, 16  ;;  %v9450_v11 = vcombine.low %v7840_v0, %v7862_v7  ;;  %v3819_v1 = vrot.slane %v3817_v16, 4 }
  0xf6   : > { %6385 = vmatmul.mubr.msk.bf16.gmra.mxu1 %vm763_vm2, %v9443_v24  ;;  %v3813_v24 = vshll.u32 %v8119_v36, 16  ;;  %v5841_v8 = vrot.slane %v5825_v51, 9  ;;  %v4479_v0 = vrot.slane %v8126_v29, 5  ;;  %v8201_v51 = vld [vmem:[%s6687_s28 + $0x5c] sm:$0x1] }
  0xf7   : > { %6388 = vmatprep.mubr.msk.bf16.mxu1 %vm763_vm2, %v9445_v43  ;;  %v8138_v4 = vpop.f32.mrf.mxu0  ;;  %v8150_v43 = vrot.slane %v3789_v30, 5  ;;  %v3806_v30 = vrot.slane %v3804_v54, 4  ;;  %v5757_v54 = vld [vmem:[%s6687_s28 + $0x60] sm:$0xf] }
  0xf8   : > { %9447 = vst [vmem:[#allocation7_spill] sm:$0xff] %v8138_v4  ;;  %v8177_v61 = vrot.slane %v3813_v24, 5  ;;  %v3833_v4 = vrot.slane %v3831_v38, 5  ;;  %v3855_v24 = vshll.u32 %v5757_v54, 16 }
  0xfa   : > { %6423 = vmatmul.mubr.msk.bf16.gmra.mxu0 %vm763_vm2, %v6585_v55  ;;  %v3795_v55 = vrot.slane %v3793_v12, 4  ;;  %v3809_v12 = vrot.slane %v3807_v2, 5  ;;  %v3820_v38 = vor.u32 %v3819_v1, %v8177_v61  ;;  %v8217_v1 = vld [vmem:[%s6687_s28 + $0x64] sm:$0xf] }
  0xfb   : > { %6426 = vmatprep.mubr.msk.bf16.mxu0 %vm763_vm2, %v6586_v41  ;;  %v9448_v41 = vcombine.low %v7833_v49, %v7848_v50  ;;  %v8159_v45 = vpop.f32.mrf.mxu1  ;;  %v8172_v49 = vpop.f32.mrf.mxu0  ;;  %v8175_v50 = vld [vmem:[%s6687_s28 + $0x50] sm:$0x1] }
  0xfc   : > { %9449 = vst [vmem:[#allocation8_spill] sm:$0xff] %v8159_v45  ;;  %9451 = vst [vmem:[#allocation9_spill] sm:$0xff] %v8172_v49  ;;  %v3786_v45 = vor.u32 %v3785_v58, %v3782_v3  ;;  %v3796_v7 = vor.u32 %v3795_v55, %v8150_v43  ;;  %v3830_v49 = vrot.slane %v3828_v47, 4  ;;  %v3823_v16 = vshll.u32 %v8175_v50, 16  ;;  %v5826_v58 = vld [vmem:[%s6687_s28 + $0x48] sm:$0xe] }
  0xfd   : > { %v8185_v2 = vpop.f32.mrf.mxu1  ;;  %v8193_v29 = vpop.f32.mrf.mxu0  ;;  %v3810_v47 = vor.u32 %v3809_v12, %v3806_v30  ;;  %v4483_v55 = vrot.slane %v8119_v36, 5  ;;  %v8210_v30 = vsel %vm7001_vm6, %v5841_v8, %v4476_v31 }
  0xfe   : > { %6389 = vmatmul.mubr.msk.bf16.gmra.mxu1 %vm763_vm2, %v9448_v41  ;;  %v3778_v41 = vsel %vm6725_vm3, %v3773_v40, %v3777_v10  ;;  %9452 = vst [vmem:[#allocation10_spill] sm:$0xff] %v8185_v2  ;;  %v8190_v10 = vrot.slane %v3837_v59, 5  ;;  %v3843_v40 = vrot.slane %v3841_v17, 4  ;;  %v8204_v59 = vrot.slane %v3786_v45, 4 }
  0xff   : > { %6392 = vmatprep.mubr.msk.bf16.mxu1 %vm763_vm2, %v9450_v11  ;;  %v4478_v11 = vrot.slane %v4476_v31, 4  ;;  %v8195_v3 = vcombine.low %v3768_v34, %v3778_v41  ;;  %v8206_v17 = vrot.slane %v3799_v5, 5  ;;  %v3797_v34 = vrot.slane %v3796_v7, 4  ;;  %v8223_v5 = vpop.f32.mrf.mxu1  ;;  %v6590_v7 = vld [vmem:[%s6687_s28 + $0xa8] sm:$0xff]  }
 0x100   : > { %v3834_v12 = vor.u32 %v3833_v4, %v3830_v49  ;;  %v9453_v45 = vcombine.low %v7852_v53, %v7870_v23  ;;  %9454 = vst [vmem:[#allocation11_spill] sm:$0xff] %v8223_v5  ;;  %v5842_v41 = vrot.slane %v5826_v58, 9  ;;  %v3844_v8 = vor.u32 %v3843_v40, %v8190_v10  ;;  %v6589_v4 = vld [vmem:[%s6687_s28 + $0x9c] sm:$0xff]   ;;  %v8232_v49 = vpop.f32.mrf.mxu0 }
 0x101   : > { %v8214_v36 = vsel %vm7001_vm6, %v4478_v11, %v4479_v0  ;;  %v3847_v31 = vshll.u32 %v8201_v51, 16  ;;  %v9455_v0 = vcombine.low %v7874_v18, %v7885_v46  ;;  %9456 = vst [vmem:[#allocation5_spill] sm:$0xff] %v8232_v49  ;;  %v3811_v53 = vrot.slane %v3810_v47, 4 }
 0x102   : > { %6427 = vmatmul.mubr.msk.bf16.gmra.mxu0 %vm763_vm2, %v6587_v39  ;;  %v3852_v39 = vshrl.u32 %v5757_v54, 16  ;;  %v3821_v23 = vrot.slane %v3820_v38, 4  ;;  %v4485_v11 = vrot.slane %v4483_v55, 4  ;;  %v4486_v54 = vrot.slane %v8175_v50, 5  ;;  %v8247_v38 = vpop.f32.mrf.mxu1 }
 0x103   : > { %6430 = vmatprep.mubr.msk.bf16.mxu0 %vm763_vm2, %v6588_v56  ;;  %v3825_v56 = vrot.slane %v3823_v16, 5  ;;  %v5827_v16 = vld [vmem:[%s6687_s28 + $0x54] sm:$0xe]  ;;  %v3857_v40 = vrot.slane %v3855_v24, 5  ;;  %v3865_v5 = vshrl.u32 %v8217_v1, 16  ;;  %v3792_v18 = vsel %vm6725_vm3, %v8204_v59, %v8150_v43  ;;  %9457 = vst [vmem:[#allocation2_spill] sm:$0xff] %v8247_v38 }
 0x104   : > { %v3854_v58 = vrot.slane %v3852_v39, 4  ;;  %v3802_v46 = vsel %vm6725_vm3, %v3797_v34, %v8206_v17  ;;  %v3835_v47 = vrot.slane %v3834_v12, 4  ;;  %v4490_v50 = vrot.slane %v8143_v22, 5  ;;  %v5760_v59 = vld [vmem:[%s6687_s28 + $0x6c] sm:$0xf] }
 0x105   : > { %v8253_v39 = vsel %vm7001_vm6, %v5842_v41, %v4483_v55  ;;  %v3849_v43 = vrot.slane %v3847_v31, 5  ;;  %v3816_v22 = vsel %vm6725_vm3, %v3811_v53, %v8177_v61  ;;  %v3826_v34 = vsel %vm6725_vm3, %v3821_v23, %v3825_v56  ;;  %v8269_v41 = vld [vmem:[%s6687_s28 + $0x68] sm:$0x1]  ;;  %v8277_v53 = vld [vmem:[%s6687_s28 + $0x70] sm:$0xf] }
 0x106   : > { %6393 = vmatmul.mubr.msk.bf16.gmra.mxu1 %vm763_vm2, %v9453_v45  ;;  %v3861_v45 = vshll.u32 %v8217_v1, 16  ;;  %v8266_v12 = vsel %vm7001_vm6, %v4485_v11, %v4486_v54  ;;  %v5843_v55 = vrot.slane %v5827_v16, 9  ;;  %v4493_v31 = vrot.slane %v8201_v51, 5 }
 0x107   : > { %6396 = vmatprep.mubr.msk.bf16.mxu1 %vm763_vm2, %v9455_v0  ;;  %v3845_v0 = vrot.slane %v3844_v8, 4  ;;  %v5828_v8 = vld [vmem:[%s6687_s28 + $0x60] sm:$0xe]  ;;  %v3867_v61 = vrot.slane %v3865_v5, 4  ;;  %v3840_v56 = vsel %vm6725_vm3, %v3835_v47, %v8190_v10  ;;  %v4492_v23 = vrot.slane %v4490_v50, 4 }
 0x108   : > { %v8257_v17 = vpop.f32.mrf.mxu0  ;;  %v8274_v24 = vrot.slane %v3861_v45, 5  ;;  %v3876_v11 = vshrl.u32 %v5760_v59, 16  ;;  %v3879_v54 = vshll.u32 %v5760_v59, 16  ;;  %v3871_v16 = vshll.u32 %v8269_v41, 16  ;;  %v6592_v59 = vld [vmem:[%s6687_s28 + $0xc0] sm:$0xff]  }
 0x109   : > { %9458 = vst [vmem:[#allocation13_spill] sm:$0xff] %v8257_v17  ;;  %v3850_v5 = vsel %vm6725_vm3, %v3845_v0, %v3849_v43  ;;  %v4497_v10 = vrot.slane %v8217_v1, 5  ;;  %v8299_v45 = vcombine.low %v3792_v18, %v3802_v46  ;;  %v8301_v47 = vcombine.low %v3816_v22, %v3826_v34  ;;  %v5763_v46 = vld [vmem:[%s6687_s28 + $0x78] sm:$0xf]  ;;  %v8326_v1 = vld [vmem:[%s6687_s28 + $0x7c] sm:$0xf] }
 0x10a   : > { %6431 = vmatmul.mubr.msk.bf16.gmra.mxu0 %vm763_vm2, %v6589_v4  ;;  %v3858_v4 = vor.u32 %v3857_v40, %v3854_v58  ;;  %v5844_v58 = vrot.slane %v5828_v8, 9  ;;  %v9461_v40 = vcombine.low %v7899_v9, %v7919_v14  ;;  %v3885_v0 = vshll.u32 %v8277_v53, 16  ;;  %v8323_v8 = vld [vmem:[%s6687_s28 + $0x74] sm:$0x1] }
 0x10b   : > { %6434 = vmatprep.mubr.msk.bf16.mxu0 %vm763_vm2, %v6590_v7  ;;  %v9459_v7 = vcombine.low %v7893_v6, %v7905_v35  ;;  %v6591_v35 = vld [vmem:[%s6687_s28 + $0xb4] sm:$0xff]   ;;  %v8297_v6 = vpop.f32.mrf.mxu0  ;;  %v3889_v43 = vshrl.u32 %v8277_v53, 16  ;;  %v8310_v9 = vsel %vm7001_vm6, %v5843_v55, %v4490_v50  ;;  %v3868_v18 = vor.u32 %v3867_v61, %v8274_v24 }
 0x10c   : > { %9462 = vst [vmem:[#allocation15_spill] sm:$0xff] %v8297_v6  ;;  %v8312_v14 = vrot.slane %v3858_v4, 4  ;;  %v8316_v22 = vcombine.low %v3840_v56, %v3850_v5  ;;  %v8320_v34 = vsel %vm7001_vm6, %v4492_v23, %v4493_v31  ;;  %v8330_v55 = vrot.slane %v3871_v16, 5  ;;  %v5766_v56 = vld [vmem:[%s6687_s28 + $0x84] sm:$0xf] }
 0x10d   : > { %v8286_v51 = vpop.f32.mrf.mxu1  ;;  %v8334_v4 = vsel %vm7001_vm6, %v5844_v58, %v4497_v10  ;;  %v4499_v61 = vrot.slane %v4497_v10, 4  ;;  %v4500_v31 = vrot.slane %v8269_v41, 5  ;;  %v8339_v23 = vpop.f32.mrf.mxu0  ;;  %v3900_v5 = vshrl.u32 %v5763_v46, 16  ;;  %v5829_v58 = vld [vmem:[%s6687_s28 + $0x6c] sm:$0xe] }
 0x10e   : > { %6397 = vmatmul.mubr.msk.bf16.gmra.mxu1 %vm763_vm2, %v9459_v7  ;;  %9460 = vst [vmem:[#allocation14_spill] sm:$0xff] %v8286_v51  ;;  %9463 = vst [vmem:[#allocation16_spill] sm:$0xff] %v8316_v22  ;;  %v3878_v7 = vrot.slane %v3876_v11, 4  ;;  %v8341_v11 = vrot.slane %v3885_v0, 5  ;;  %v8344_v51 = vld [vmem:[%s6687_s28 + $0x88] sm:$0xf] }
 0x10f   : > { %6400 = vmatprep.mubr.msk.bf16.mxu1 %vm763_vm2, %v9461_v40  ;;  %v3881_v40 = vrot.slane %v3879_v54, 5  ;;  %v8328_v50 = vpop.f32.mrf.mxu1  ;;  %9465 = vst [vmem:[#allocation18_spill] sm:$0xff] %v8339_v23  ;;  %v3891_v54 = vrot.slane %v3889_v43, 4  ;;  %v8351_v41 = vrot.slane %v3868_v18, 4  ;;  %v3909_v10 = vshll.u32 %v8326_v1, 16 }
 0x110   : > { %9464 = vst [vmem:[#allocation17_spill] sm:$0xff] %v8328_v50  ;;  %v3903_v50 = vshll.u32 %v5763_v46, 16  ;;  %v4504_v43 = vrot.slane %v8277_v53, 5  ;;  %v3924_v46 = vshrl.u32 %v5766_v56, 16  ;;  %v3927_v38 = vshll.u32 %v5766_v56, 16 }
 0x111   : > { %v3882_v0 = vor.u32 %v3881_v40, %v3878_v7  ;;  %v8361_v16 = vpop.f32.mrf.mxu1  ;;  %v8365_v18 = vsel %vm7001_vm6, %v4499_v61, %v4500_v31  ;;  %v3895_v2 = vshll.u32 %v8323_v8, 16  ;;  %v3933_v7 = vshll.u32 %v8344_v51, 16  ;;  %v8370_v40 = vpop.f32.mrf.mxu0  ;;  %v5765_v61 = vld [vmem:[%s6687_s28 + $0x80] sm:$0x1]  ;;  %v5830_v22 = vld [vmem:[%s6687_s28 + $0x78] sm:$0xe] }
 0x112   : > { %6435 = vmatmul.mubr.msk.bf16.gmra.mxu0 %vm763_vm2, %v6591_v35  ;;  %v3913_v35 = vshrl.u32 %v8326_v1, 16  ;;  %9467 = vst [vmem:[#allocation19_spill] sm:$0xff] %v8361_v16  ;;  %v3937_v53 = vshrl.u32 %v8344_v51, 16  ;;  %9468 = vst [vmem:[#allocation20_spill] sm:$0xff] %v8370_v40  ;;  %v3892_v56 = vor.u32 %v3891_v54, %v8341_v11  ;;  %v3902_v31 = vrot.slane %v3900_v5, 4 }
 0x113   : > { %6438 = vmatprep.mubr.msk.bf16.mxu0 %vm763_vm2, %v6592_v59  ;;  %v9466_v59 = vcombine.low %v7909_v19, %v7928_v52  ;;  %v9469_v19 = vcombine.low %v7932_v48, %v7942_v26  ;;  %v6593_v52 = vld [vmem:[%s6687_s28 + $0xcc] sm:$0xff]   ;;  %v3905_v16 = vrot.slane %v3903_v50, 5  ;;  %v4507_v23 = vrot.slane %v8323_v8, 5  ;;  %v8386_v54 = vpop.f32.mrf.mxu1 }
 0x114   : > { %v8380_v6 = vrot.slane %v3909_v10, 5  ;;  %v3915_v17 = vrot.slane %v3913_v35, 4  ;;  %v4511_v40 = vrot.slane %v8326_v1, 5  ;;  %v8384_v49 = vrot.slane %v3882_v0, 4  ;;  %9470 = vst [vmem:[#allocation21_spill] sm:$0xff] %v8386_v54 }
 0x115   : > { %v4506_v48 = vrot.slane %v4504_v43, 4  ;;  %v3926_v26 = vrot.slane %v3924_v46, 4  ;;  %v3874_v50 = vsel %vm6725_vm3, %v8351_v41, %v8330_v55  ;;  %v8392_v8 = vrot.slane %v3895_v2, 5  ;;  %v8395_v5 = vld [vmem:[%s6687_s28 + $0x8c] sm:$0x1] }
 0x116   : > { %6401 = vmatmul.mubr.msk.bf16.gmra.mxu1 %vm763_vm2, %v9466_v59  ;;  %v5845_v59 = vrot.slane %v5829_v58, 9  ;;  %v8397_v58 = vrot.slane %v3933_v7, 5  ;;  %v3939_v1 = vrot.slane %v3937_v53, 4  ;;  %v3906_v35 = vor.u32 %v3905_v16, %v3902_v31  ;;  %v5769_v54 = vld [vmem:[%s6687_s28 + $0x90] sm:$0xf] }
 0x117   : > { %6404 = vmatprep.mubr.msk.bf16.mxu1 %vm763_vm2, %v9469_v19  ;;  %v3929_v19 = vrot.slane %v3927_v38, 5  ;;  %v3893_v38 = vrot.slane %v3892_v56, 4  ;;  %v3919_v0 = vshll.u32 %v5765_v61, 16  ;;  %v5846_v46 = vrot.slane %v5830_v22, 9 }
 0x118   : > { %v9471_v2 = vcombine.low %v8063_v20, %v8074_v63  ;;  %v8409_v55 = vsel %vm7001_vm6, %v5845_v59, %v4504_v43  ;;  %v3916_v41 = vor.u32 %v3915_v17, %v8380_v6  ;;  %v4513_v7 = vrot.slane %v4511_v40, 4  ;;  %v8424_v43 = vld [vmem:[%s6687_s28 + $0x94] sm:$0xf] }
 0x119   : > { %v4514_v53 = vrot.slane %v5765_v61, 5  ;;  %v3888_v22 = vsel %vm6725_vm3, %v8384_v49, %v8341_v11  ;;  %v8420_v20 = vsel %vm7001_vm6, %v4506_v48, %v4507_v23  ;;  %v3930_v63 = vor.u32 %v3929_v19, %v3926_v26  ;;  %v5831_v61 = vld [vmem:[%s6687_s28 + $0x84] sm:$0xe] }
 0x11a   : > { %v8399_v10 = vpop.f32.mrf.mxu0  ;;  %6439 = vmatmul.mubr.msk.bf16.gmra.mxu0 %vm763_vm2, %v6593_v52  ;;  %v3943_v16 = vshll.u32 %v8395_v5, 16  ;;  %v9472_v17 = vcombine.low %v7959_v21, %v7976_v25  ;;  %v3940_v59 = vor.u32 %v3939_v1, %v8397_v58  ;;  %v4518_v49 = vrot.slane %v8344_v51, 5 }
 0x11b   : > { %6478 = vmatprep.mubr.msk.bf16.mxu0 %vm763_vm2, %v9471_v2  ;;  %v3948_v11 = vshrl.u32 %v5769_v54, 16  ;;  %v3951_v23 = vshll.u32 %v5769_v54, 16  ;;  %v3898_v48 = vsel %vm6725_vm3, %v3893_v38, %v8392_v8  ;;  %v3907_v26 = vrot.slane %v3906_v35, 4  ;;  %v9507_v28 = vld [vmem:[#allocation21_spill] sm:$0xff] }
 0x11c   : > { %v8412_v52 = vpop.f32.mrf.mxu0  ;;  %v3921_v21 = vrot.slane %v3919_v0, 5  ;;  %v8444_v25 = vsel %vm7001_vm6, %v5846_v46, %v4511_v40  ;;  %v3917_v51 = vrot.slane %v3916_v41, 4  ;;  %v8450_v54 = vsel %vm7001_vm6, %v4513_v7, %v4514_v53 }
 0x11d   : > { %v3957_v1 = vshll.u32 %v8424_v43, 16  ;;  %v3931_v8 = vrot.slane %v3930_v63, 4  ;;  %v3945_v38 = vrot.slane %v3943_v16, 5  ;;  %v5847_v35 = vrot.slane %v5831_v61, 9 }
 0x11e   : > { %v8426_v56 = vpop.f32.mrf.mxu1  ;;  %6405 = vmatmul.mubr.msk.bf16.gmra.mxu1 %vm763_vm2, %v9472_v17  ;;  %v8435_v31 = vpop.f32.mrf.mxu0  ;;  %v4521_v40 = vrot.slane %v8395_v5, 5  ;;  %v3941_v46 = vrot.slane %v3940_v59, 4  ;;  %v4520_v41 = vrot.slane %v4518_v49, 4  ;;  %v3950_v17 = vrot.slane %v3948_v11, 4 }
 0x11f   : > { %6444 = vmatprep.mubr.msk.bf16.mxu1 %vm763_vm2, %v8110_v13  ;;  %v3961_v13 = vshrl.u32 %v8424_v43, 16  ;;  %v3953_v7 = vrot.slane %v3951_v23, 5  ;;  %v5861_v63 = vcombine.low %v8310_v9, %v8320_v34  ;;  %v9475_v5 = vsel %vm6725_vm3, %v8312_v14, %v8274_v24 }
 0x120   : > { %v8446_v19 = vpop.f32.mrf.mxu1  ;;  %v8454_v2 = vpop.f32.mrf.mxu0  ;;  %v8470_v16 = vcombine.low %v9475_v5, %v3874_v50  ;;  %v9476_v11 = vcombine.low %v8133_v60, %v8163_v42  ;;  %v3912_v24 = vsel %vm6725_vm3, %v3907_v26, %v8380_v6  ;;  %v3922_v14 = vsel %vm6725_vm3, %v3917_v51, %v3921_v21  ;;  %v8505_v26 = vld [vmem:[%s6687_s28 + $0xa0] sm:$0xf]  ;;  %v5775_v60 = vld [vmem:[%s6687_s28 + $0xa8] sm:$0xf] }
 0x121   : > { %9473 = vst [vmem:[#allocation22_spill] sm:$0xff] %v8446_v19  ;;  %v9474_v19 = vcombine.low %v8081_v15, %v8085_v62  ;;  %v8477_v15 = vld [vmem:[%s6687_s28 + $0x98] sm:$0x1]  ;;  %v8490_v50 = vrot.slane %v3957_v1, 5  ;;  %v3963_v23 = vrot.slane %v3961_v13, 4  ;;  %v8493_v61 = vcombine.low %v3888_v22, %v3898_v48 }
 0x122   : > { %v8457_v0 = vpop.f32.mrf.mxu1  ;;  %v6276_v53 = vpop.f32.mrf.mxu0  ;;  %v3936_v42 = vsel %vm6725_vm3, %v3931_v8, %v8397_v58  ;;  %v8502_v6 = vsel %vm7001_vm6, %v5847_v35, %v4518_v49  ;;  %v3946_v22 = vsel %vm6725_vm3, %v3941_v46, %v3945_v38  ;;  %v8513_v48 = vsel %vm7001_vm6, %v4520_v41, %v4521_v40  ;;  %v5832_v8 = vld [vmem:[%s6687_s28 + $0x90] sm:$0xe] }
 0x123   : > { %6479 = vmatmul.mubr.msk.bf16.vlgmr.msra.gmra.mxu0 %vm763_vm2, %v9474_v19  ;;  %v5772_v19 = vld [vmem:[%s6687_s28 + $0x9c] sm:$0xf]  ;;  %v3954_v51 = vor.u32 %v3953_v7, %v3950_v17  ;;  %v3967_v58 = vshll.u32 %v8477_v15, 16  ;;  %v8519_v13 = vcombine.low %v3912_v24, %v3922_v14  ;;  %v3964_v46 = vor.u32 %v3963_v23, %v8490_v50 }
 0x124   : > { %v8479_v62 = vpop.f32.mrf.mxu1  ;;  %6482 = vmatprep.mubr.msk.bf16.mxu0 %vm763_vm2, %v9476_v11  ;;  %v1570_v5 = vpop.f32.mrf.mxu0  ;;  %v3975_v35 = vshll.u32 %v5772_v19, 16  ;;  %v4525_v40 = vrot.slane %v8424_v43, 5  ;;  %v3981_v41 = vshll.u32 %v8505_v26, 16  ;;  %v3985_v17 = vshrl.u32 %v8505_v26, 16 }
 0x125   : > { %v8529_v11 = vcombine.low %v3936_v42, %v3946_v22  ;;  %v3969_v23 = vrot.slane %v3967_v58, 5  ;;  %v5848_v43 = vrot.slane %v5832_v8, 9  ;;  %v9477_v42 = vcombine.low %v8210_v30, %v8214_v36 }
 0x126   : > { %v6242_v21 = vpop.f32.mrf.mxu1  ;;  %6445 = vmatmul.mubr.msk.bf16.vlgmr.msra.gmra.mxu1 %vm763_vm2, %v8121_v33  ;;  %v6277_v49 = vpop.f32.mrf.mxu0  ;;  %v3972_v33 = vshrl.u32 %v5772_v19, 16  ;;  %v8533_v19 = vrot.slane %v3954_v51, 4  ;;  %v8545_v51 = vld [vmem:[%s6687_s28 + $0xac] sm:$0xf]  ;;  %v4527_v8 = vrot.slane %v4525_v40, 4 }
 0x127   : > { %v1150_v1 = vadd.f32 %v6242_v21, %v8022_v32  ;;  %6448 = vmatprep.mubr.msk.bf16.mxu1 %vm763_vm2, %v8195_v3  ;;  %v4528_v21 = vrot.slane %v8477_v15, 5  ;;  %v9478_v15 = vcombine.low %v8253_v39, %v8266_v12  ;;  %v8567_v12 = vsel %vm7001_vm6, %v5848_v43, %v4525_v40 }
 0x128   : > { %v1141_v38 = vpop.f32.mrf.mxu1  ;;  %v1573_v3 = vpop.f32.mrf.mxu0  ;;  %v3974_v22 = vrot.slane %v3972_v33, 4  ;;  %v8557_v33 = vld [vmem:[%s6687_s28 + $0xa4] sm:$0x1]  ;;  %v3960_v39 = vsel %vm6725_vm3, %v8533_v19, %v8490_v50  ;;  %v4532_v50 = vrot.slane %v8505_v26, 5 }
 0x129   : > { %v8526_v32 = vadd.f32 %v6276_v53, %v1150_v1  ;;  %v1142_v7 = vadd.f32 %v1141_v38, %v8048_v57  ;;  %v3977_v1 = vrot.slane %v3975_v35, 5  ;;  %v8551_v38 = vrot.slane %v3981_v41, 5 }
 0x12a   : > { %v6243_v14 = vpop.f32.mrf.mxu1  ;;  %v6280_v53 = vpop.f32.mrf.mxu0  ;;  %v3996_v35 = vshrl.u32 %v5775_v60, 16  ;;  %v8582_v43 = vsel %vm7001_vm6, %v4527_v8, %v4528_v21 }
 0x12b   : > { %v8537_v59 = vadd.f32 %v1570_v5, %v1142_v7  ;;  %v1153_v57 = vadd.f32 %v6243_v14, %v8059_v27  ;;  %6483 = vmatmul.mubr.msk.bf16.gmra.mxu0 %vm763_vm2, %v9477_v42  ;;  %v3965_v5 = vrot.slane %v3964_v46, 4  ;;  %v3987_v27 = vrot.slane %v3985_v17, 4 }
 0x12c   : > { %v1144_v58 = vpop.f32.mrf.mxu1  ;;  %6486 = vmatprep.mubr.msk.bf16.mxu0 %vm763_vm2, %v9478_v15  ;;  %v1586_v36 = vpop.f32.mrf.mxu0  ;;  %v3999_v14 = vshll.u32 %v5775_v60, 16  ;;  %v9479_v60 = vld [vmem:[#allocation7_spill] sm:$0xff]  ;;  %v3998_v26 = vrot.slane %v3996_v35, 4 }
 0x12d   : > { %v8553_v7 = vadd.f32 %v6277_v49, %v1153_v57  ;;  %v1145_v30 = vadd.f32 %v1144_v58, %v8108_v37  ;;  %v4005_v37 = vshll.u32 %v8545_v51, 16  ;;  %v4009_v49 = vshrl.u32 %v8545_v51, 16  ;;  %v5833_v57 = vld [vmem:[%s6687_s28 + $0x9c] sm:$0xe] }
 0x12e   : > { %v6246_v42 = vpop.f32.mrf.mxu1  ;;  %6449 = vmatmul.mubr.msk.bf16.gmra.mxu1 %vm763_vm2, %v8299_v45  ;;  %v6281_v17 = vpop.f32.mrf.mxu0  ;;  %v3978_v45 = vor.u32 %v3977_v1, %v3974_v22  ;;  %v3970_v40 = vsel %vm6725_vm3, %v3965_v5, %v3969_v23  ;;  %v3991_v58 = vshll.u32 %v8557_v33, 16  ;;  %v4001_v1 = vrot.slane %v3999_v14, 5 }
 0x12f   : > { %v8571_v46 = vadd.f32 %v1573_v3, %v1145_v30  ;;  %v1166_v41 = vadd.f32 %v6246_v42, %v9479_v60  ;;  %6452 = vmatprep.mubr.msk.bf16.mxu1 %vm763_vm2, %v8301_v47  ;;  %v3988_v3 = vor.u32 %v3987_v27, %v8551_v38  ;;  %v9480_v30 = vld [vmem:[#allocation9_spill] sm:$0xff]  ;;  %v5849_v60 = vrot.slane %v5833_v57, 9 }
 0x130   : > { %v1157_v19 = vpop.f32.mrf.mxu1  ;;  %v1589_v22 = vpop.f32.mrf.mxu0  ;;  %v4535_v23 = vrot.slane %v8557_v33, 5  ;;  %v8590_v5 = vrot.slane %v4005_v37, 5  ;;  %v4011_v21 = vrot.slane %v4009_v49, 4  ;;  %v8599_v35 = vrot.slane %v3978_v45, 4  ;;  %v5834_v33 = vld [vmem:[%s6687_s28 + $0xa8] sm:$0xe] }
 0x131   : > { %v8586_v15 = vadd.f32 %v6280_v53, %v1166_v41  ;;  %v1158_v47 = vadd.f32 %v1157_v19, %v9480_v30  ;;  %v4534_v14 = vrot.slane %v4532_v50, 4  ;;  %v8602_v41 = vld [vmem:[%s6687_s28 + $0xb0] sm:$0x1]  ;;  %v8613_v34 = vrot.slane %v3988_v3, 4  ;;  %v9482_v45 = vld [vmem:[#allocation5_spill] sm:$0xff] }
 0x132   : > { %v6247_v42 = vpop.f32.mrf.mxu1  ;;  %v6284_v53 = vpop.f32.mrf.mxu0  ;;  %v4002_v30 = vor.u32 %v4001_v1, %v3998_v26  ;;  %v4012_v3 = vor.u32 %v4011_v21, %v8590_v5  ;;  %v9484_v26 = vld [vmem:[#allocation13_spill] sm:$0xff] }
 0x133   : > { %v8592_v8 = vadd.f32 %v1586_v36, %v1158_v47  ;;  %v1169_v27 = vadd.f32 %v6247_v42, %v8193_v29  ;;  %6487 = vmatmul.mubr.msk.bf16.gmra.mxu0 %vm763_vm2, %v5861_v63  ;;  %v9481_v36 = vcombine.low %v8334_v4, %v8365_v18  ;;  %v8609_v29 = vcombine.low %v3960_v39, %v3970_v40  ;;  %v5778_v4 = vld [vmem:[%s6687_s28 + $0xb4] sm:$0xf] }
 0x134   : > { %v1160_v37 = vpop.f32.mrf.mxu1  ;;  %v8615_v63 = vrot.slane %v3991_v58, 5  ;;  %v1602_v19 = vpop.f32.mrf.mxu0  ;;  %v4539_v47 = vrot.slane %v8545_v51, 5  ;;  %v9483_v39 = vld [vmem:[#allocation16_spill] sm:$0xff]  ;;  %v8626_v40 = vsel %vm7001_vm6, %v5849_v60, %v4532_v50  ;;  %v5850_v58 = vrot.slane %v5834_v33, 9  ;;  %v8649_v33 = vld [vmem:[%s6687_s28 + $0xb8] sm:$0xf] }
 0x135   : > { %6490 = vmatprep.mubr.msk.bf16.mxu0 %vm763_vm2, %v9481_v36  ;;  %v8617_v49 = vadd.f32 %v6281_v17, %v1169_v27  ;;  %v1161_v57 = vadd.f32 %v1160_v37, %v9482_v45  ;;  %v4015_v17 = vshll.u32 %v8602_v41, 16  ;;  %v3984_v50 = vsel %vm6725_vm3, %v8599_v35, %v8551_v38  ;;  %v9485_v38 = vld [vmem:[#allocation15_spill] sm:$0xff] }
 0x136   : > { %v6250_v18 = vpop.f32.mrf.mxu1  ;;  %6453 = vmatmul.mubr.msk.bf16.gmra.mxu1 %vm763_vm2, %v9483_v39  ;;  %v6285_v51 = vpop.f32.mrf.mxu0  ;;  %v8641_v60 = vsel %vm7001_vm6, %v4534_v14, %v4535_v23  ;;  %v4542_v27 = vrot.slane %v8602_v41, 5  ;;  %v4023_v37 = vshll.u32 %v5778_v4, 16  ;;  %v4003_v23 = vrot.slane %v4002_v30, 4 }
 0x137   : > { %v8630_v42 = vadd.f32 %v1589_v22, %v1161_v57  ;;  %v1182_v1 = vadd.f32 %v6250_v18, %v9484_v26  ;;  %6456 = vmatprep.mubr.msk.bf16.mxu1 %vm763_vm2, %v8470_v16  ;;  %v3994_v22 = vsel %vm6725_vm3, %v8613_v34, %v8615_v63  ;;  %v4020_v16 = vshrl.u32 %v5778_v4, 16  ;;  %v5781_v57 = vld [vmem:[%s6687_s28 + $0xc0] sm:$0xf] }
 0x138   : > { %v1173_v21 = vpop.f32.mrf.mxu1  ;;  %v1605_v45 = vpop.f32.mrf.mxu0  ;;  %v4541_v14 = vrot.slane %v4539_v47, 4  ;;  %v4013_v63 = vrot.slane %v4012_v3, 4  ;;  %v4017_v41 = vrot.slane %v4015_v17, 5  ;;  %v8659_v39 = vsel %vm7001_vm6, %v5850_v58, %v4539_v47  ;;  %v8674_v17 = vld [vmem:[%s6687_s28 + $0xc4] sm:$0xf] }
 0x139   : > { %v8651_v36 = vadd.f32 %v6284_v53, %v1182_v1  ;;  %v1174_v35 = vadd.f32 %v1173_v21, %v9485_v38  ;;  %v9486_v53 = vld [vmem:[#allocation18_spill] sm:$0xff]  ;;  %v9487_v30 = vcombine.low %v8409_v55, %v8420_v20  ;;  %v8669_v21 = vld [vmem:[%s6687_s28 + $0xbc] sm:$0x1]  ;;  %v4029_v38 = vshll.u32 %v8649_v33, 16 }
 0x13a   : > { %v6251_v18 = vpop.f32.mrf.mxu1  ;;  %v6288_v1 = vpop.f32.mrf.mxu0  ;;  %v4033_v3 = vshrl.u32 %v8649_v33, 16  ;;  %v4022_v58 = vrot.slane %v4020_v16, 4  ;;  %v4044_v55 = vshrl.u32 %v5781_v57, 16  ;;  %v4047_v20 = vshll.u32 %v5781_v57, 16  ;;  %v5835_v16 = vld [vmem:[%s6687_s28 + $0xb4] sm:$0xe] }
 0x13b   : > { %v8661_v4 = vadd.f32 %v1602_v19, %v1174_v35  ;;  %v1185_v26 = vadd.f32 %v6251_v18, %v9486_v53  ;;  %6491 = vmatmul.mubr.msk.bf16.gmra.mxu0 %vm763_vm2, %v9487_v30  ;;  %v9488_v19 = vcombine.low %v8444_v25, %v8450_v54  ;;  %v4025_v35 = vrot.slane %v4023_v37, 5  ;;  %v9489_v53 = vld [vmem:[#allocation20_spill] sm:$0xff] }
 0x13c   : > { %v1176_v47 = vpop.f32.mrf.mxu1  ;;  %v1618_v34 = vpop.f32.mrf.mxu0  ;;  %v4008_v9 = vsel %vm6725_vm3, %v4003_v23, %v8590_v5  ;;  %v8688_v24 = vsel %vm7001_vm6, %v4541_v14, %v4542_v27  ;;  %v4018_v54 = vsel %vm6725_vm3, %v4013_v63, %v4017_v41  ;;  %v4053_v37 = vshll.u32 %v8674_v17, 16 }
 0x13d   : > { %6494 = vmatprep.mubr.msk.bf16.mxu0 %vm763_vm2, %v9488_v19  ;;  %v8680_v18 = vadd.f32 %v6285_v51, %v1185_v26  ;;  %v1177_v30 = vadd.f32 %v1176_v47, %v9489_v53  ;;  %v4039_v51 = vshll.u32 %v8669_v21, 16  ;;  %v4057_v57 = vshrl.u32 %v8674_v17, 16 }
 0x13e   : > { %v6254_v25 = vpop.f32.mrf.mxu1  ;;  %6457 = vmatmul.mubr.msk.bf16.gmra.mxu1 %vm763_vm2, %v8493_v61  ;;  %v6289_v27 = vpop.f32.mrf.mxu0  ;;  %v8703_v23 = vrot.slane %v4029_v38, 5  ;;  %v4035_v61 = vrot.slane %v4033_v3, 4  ;;  %v4026_v63 = vor.u32 %v4025_v35, %v4022_v58  ;;  %v4546_v41 = vrot.slane %v8649_v33, 5 }
 0x13f   : > { %v8698_v26 = vadd.f32 %v1605_v45, %v1177_v30  ;;  %v1198_v5 = vadd.f32 %v6254_v25, %v8399_v10  ;;  %6460 = vmatprep.mubr.msk.bf16.mxu1 %vm763_vm2, %v8519_v13  ;;  %v4046_v47 = vrot.slane %v4044_v55, 4  ;;  %v4049_v19 = vrot.slane %v4047_v20, 5 }
 0x140   : > { %v1189_v14 = vpop.f32.mrf.mxu1  ;;  %v1621_v10 = vpop.f32.mrf.mxu0  ;;  %v8709_v30 = vcombine.low %v3984_v50, %v3994_v22  ;;  %v5851_v25 = vrot.slane %v5835_v16, 9  ;;  %v8711_v38 = vcombine.low %v4008_v9, %v4018_v54  ;;  %v5868_v3 = vcombine.low %v8659_v39, %v8688_v24  ;;  %v5783_v24 = vld [vmem:[%s6687_s28 + $0xc8] sm:$0x1]  ;;  %v5784_v39 = vld [vmem:[%s6687_s28 + $0xcc] sm:$0xf] }
 0x141   : > { %v8706_v53 = vadd.f32 %v6288_v1, %v1198_v5  ;;  %v1190_v45 = vadd.f32 %v1189_v14, %v8412_v52  ;;  %v8715_v58 = vrot.slane %v4053_v37, 5  ;;  %v4059_v33 = vrot.slane %v4057_v57, 4  ;;  %v8737_v54 = vld [vmem:[%s6687_s28 + $0xd0] sm:$0xf] }
 0x142   : > { %v6255_v13 = vpop.f32.mrf.mxu1  ;;  %v6292_v52 = vpop.f32.mrf.mxu0  ;;  %v9491_v50 = vcombine.low %v8502_v6, %v8513_v48  ;;  %v8724_v9 = vrot.slane %v4039_v51, 5  ;;  %v4549_v22 = vrot.slane %v8669_v21, 5  ;;  %v4036_v20 = vor.u32 %v4035_v61, %v8703_v23 }
 0x143   : > { %v8717_v1 = vadd.f32 %v1618_v34, %v1190_v45  ;;  %v1201_v35 = vadd.f32 %v6255_v13, %v8435_v31  ;;  %v9492_v34 = vcombine.low %v8567_v12, %v8582_v43  ;;  %v8733_v31 = vrot.slane %v4026_v63, 4  ;;  %v5836_v12 = vld [vmem:[%s6687_s28 + $0xc0] sm:$0xe] }
 0x144   : > { %6495 = vmatmul.mubr.msk.bf16.gmra.mxu0 %vm763_vm2, %v9491_v50  ;;  %v1192_v55 = vpop.f32.mrf.mxu1  ;;  %v4548_v6 = vrot.slane %v4546_v41, 4  ;;  %v4050_v48 = vor.u32 %v4049_v19, %v4046_v47  ;;  %v1634_v16 = vpop.f32.mrf.mxu0  ;;  %v8744_v37 = vsel %vm7001_vm6, %v5851_v25, %v4546_v41  ;;  %v4553_v43 = vrot.slane %v8674_v17, 5 }
 0x145   : > { %9490 = vst [vmem:[#allocation7_spill] sm:$0xff] %v8717_v1  ;;  %6498 = vmatprep.mubr.msk.bf16.mxu0 %vm763_vm2, %v9492_v34  ;;  %v8739_v51 = vadd.f32 %v6289_v27, %v1201_v35  ;;  %v1193_v21 = vadd.f32 %v1192_v55, %v8454_v2  ;;  %v4060_v5 = vor.u32 %v4059_v33, %v8715_v58  ;;  %v4063_v61 = vshll.u32 %v5783_v24, 16  ;;  %v9495_v2 = vld [vmem:[#allocation3_spill] sm:$0xff] }
 0x146   : > { %v6258_v57 = vpop.f32.mrf.mxu1  ;;  %6461 = vmatmul.mubr.msk.bf16.gmra.mxu1 %vm763_vm2, %v8529_v11  ;;  %v4068_v14 = vshrl.u32 %v5784_v39, 16  ;;  %v4071_v27 = vshll.u32 %v5784_v39, 16  ;;  %v6293_v19 = vpop.f32.mrf.mxu0  ;;  %v4077_v41 = vshll.u32 %v8737_v54, 16  ;;  %v4081_v17 = vshrl.u32 %v8737_v54, 16 }
 0x147   : > { %9493 = vst [vmem:[#allocation9_spill] sm:$0xff] %v8739_v51  ;;  %v8751_v63 = vadd.f32 %v1621_v10, %v1193_v21  ;;  %v1214_v47 = vadd.f32 %v6258_v57, %v9495_v2  ;;  %6464 = vmatprep.mubr.msk.bf16.mxu1 %vm763_vm2, %v8609_v29  ;;  %v4037_v25 = vrot.slane %v4036_v20, 4  ;;  %v4550_v11 = vsel %vm7001_vm6, %v4548_v6, %v4549_v22  ;;  %v9496_v10 = vld [vmem:[#allocation12_spill] sm:$0xff] }
 0x148   : > { %v1205_v45 = vpop.f32.mrf.mxu1  ;;  %v4051_v13 = vrot.slane %v4050_v48, 4  ;;  %v5852_v33 = vrot.slane %v5836_v12, 9  ;;  %v1637_v39 = vpop.f32.mrf.mxu0  ;;  %v4555_v55 = vrot.slane %v4553_v43, 4  ;;  %v4556_v34 = vrot.slane %v5783_v24, 5  ;;  %v9497_v20 = vld [vmem:[#allocation4_spill] sm:$0xff] }
 0x149   : > { %9494 = vst [vmem:[#allocation5_spill] sm:$0xff] %v8751_v63  ;;  %v8760_v35 = vadd.f32 %v6292_v52, %v1214_v47  ;;  %v1206_v50 = vadd.f32 %v1205_v45, %v9496_v10  ;;  %v4061_v21 = vrot.slane %v4060_v5, 4  ;;  %v4065_v57 = vrot.slane %v4063_v61, 5  ;;  %v5786_v5 = vld [vmem:[%s6687_s28 + $0xd4] sm:$0x1]  ;;  %v9499_v61 = vld [vmem:[#allocation6_spill] sm:$0xff] }
 0x14a   : > { %v6259_v29 = vpop.f32.mrf.mxu1  ;;  %v4070_v2 = vrot.slane %v4068_v14, 4  ;;  %v4073_v63 = vrot.slane %v4071_v27, 5  ;;  %v6296_v22 = vpop.f32.mrf.mxu0  ;;  %v9498_v52 = vcombine.low %v8626_v40, %v8641_v60  ;;  %v8770_v6 = vrot.slane %v4077_v41, 5  ;;  %v5837_v41 = vld [vmem:[%s6687_s28 + $0xcc] sm:$0xe]  ;;  %s267_s28 = scalar_lea.vmem %s9353_s4, %s9575_s15 }
 0x14b   : > { %v8763_v51 = vadd.f32 %v1634_v16, %v1206_v50  ;;  %v1217_v1 = vadd.f32 %v6259_v29, %v9497_v20  ;;  %v4083_v24 = vrot.slane %v4081_v17, 4  ;;  %v4032_v16 = vsel %vm6725_vm3, %v8733_v31, %v8703_v23  ;;  %v9501_v50 = vld [vmem:[#allocation10_spill] sm:$0xff] }
 0x14c   : > { %6499 = vmatmul.mubr.msk.bf16.gmra.mxu0 %vm763_vm2, %v9498_v52  ;;  %v1208_v48 = vpop.f32.mrf.mxu1  ;;  %v4042_v12 = vsel %vm6725_vm3, %v4037_v25, %v8724_v9  ;;  %v4560_v40 = vrot.slane %v8737_v54, 5  ;;  %v1650_v27 = vpop.f32.mrf.mxu0  ;;  %v4557_v47 = vsel %vm7001_vm6, %v4555_v55, %v4556_v34  ;;  %v5869_v9 = vcombine.low %v8744_v37, %v4550_v11 }
 0x14d   : > { %6502 = vmatprep.mubr.msk.bf16.mxu0 %vm763_vm2, %v5868_v3  ;;  %v8782_v60 = vadd.f32 %v6293_v19, %v1217_v1  ;;  %v1209_v14 = vadd.f32 %v1208_v48, %v9499_v61  ;;  %v4554_v3 = vsel %vm7001_vm6, %v5852_v33, %v4553_v43  ;;  %v4056_v1 = vsel %vm6725_vm3, %v4051_v13, %v8715_v58  ;;  %v9500_v43 = vld [vmem:[#allocation8_spill] sm:$0xff] }
 0x14e   : > { %v6262_v23 = vpop.f32.mrf.mxu1  ;;  %6465 = vmatmul.mubr.msk.bf16.gmra.mxu1 %vm763_vm2, %v8709_v30  ;;  %v4066_v31 = vsel %vm6725_vm3, %v4061_v21, %v4065_v57  ;;  %v4074_v54 = vor.u32 %v4073_v63, %v4070_v2  ;;  %v6297_v45 = vpop.f32.mrf.mxu0  ;;  %v4084_v30 = vor.u32 %v4083_v24, %v8770_v6  ;;  %v4087_v25 = vshll.u32 %v5786_v5, 16 }
 0x14f   : > { %v8798_v19 = vadd.f32 %v1637_v39, %v1209_v14  ;;  %v1230_v17 = vadd.f32 %v6262_v23, %v9500_v43  ;;  %6468 = vmatprep.mubr.msk.bf16.mxu1 %vm763_vm2, %v8711_v38  ;;  %v5870_v11 = vcombine.low %v4554_v3, %v4557_v47  ;;  %v5853_v33 = vrot.slane %v5837_v41, 9  ;;  %v9502_v38 = vld [vmem:[#allocation11_spill] sm:$0xff]  ;;  %v9504_v41 = vld [vmem:[#allocation14_spill] sm:$0xff] }
 0x150   : > { %v1221_v37 = vpop.f32.mrf.mxu1  ;;  %v4562_v10 = vrot.slane %v4560_v40, 4  ;;  %v4563_v58 = vrot.slane %v5786_v5, 5  ;;  %v1653_v39 = vpop.f32.mrf.mxu0  ;;  %v5802_v34 = vcombine.low %v4032_v16, %v4042_v12  ;;  %v5803_v29 = vcombine.low %v4056_v1, %v4066_v31  ;;  %v9503_v5 = vld [vmem:[#allocation2_spill] sm:$0xff] }
 0x151   : > { %v8804_v13 = vadd.f32 %v6296_v22, %v1230_v17  ;;  %v1222_v63 = vadd.f32 %v1221_v37, %v9501_v50  ;;  %v4075_v21 = vrot.slane %v4074_v54, 4  ;;  %v4085_v52 = vrot.slane %v4084_v30, 4  ;;  %v9505_v54 = vld [vmem:[#allocation17_spill] sm:$0xff] }
 0x152   : > { %v6263_v55 = vpop.f32.mrf.mxu1  ;;  %v6300_v20 = vpop.f32.mrf.mxu0  ;;  %v4089_v24 = vrot.slane %v4087_v25, 5  ;;  %v4561_v22 = vsel %vm7001_vm6, %v5853_v33, %v4560_v40  ;;  %v4564_v16 = vsel %vm7001_vm6, %v4562_v10, %v4563_v58  ;;  %v9506_v25 = vld [vmem:[#allocation19_spill] sm:$0xff] }
 0x153   : > { %v8807_v57 = vadd.f32 %v1650_v27, %v1222_v63  ;;  %v1233_v2 = vadd.f32 %v6263_v55, %v9502_v38  ;;  %v4080_v3 = vsel %vm6725_vm3, %v4075_v21, %v8770_v6  ;;  %v9508_v38 = vld [vmem:[#allocation22_spill] sm:$0xff] }
 0x154   : > { %6503 = vmatmul.mubr.msk.bf16.gmra.mxu0 %vm763_vm2, %v5869_v9  ;;  %v1224_v48 = vpop.f32.mrf.mxu1  ;;  %v1666_v14 = vpop.f32.mrf.mxu0  ;;  %v4090_v44 = vsel %vm6725_vm3, %v4085_v52, %v4089_v24  ;;  %v5871_v9 = vcombine.low %v4561_v22, %v4564_v16 }
 0x155   : > { %6506 = vmatprep.mubr.msk.bf16.mxu0 %vm763_vm2, %v5870_v11  ;;  %v8816_v12 = vadd.f32 %v6297_v45, %v1233_v2  ;;  %v1225_v61 = vadd.f32 %v1224_v48, %v9503_v5  ;;  %v5804_v30 = vcombine.low %v4080_v3, %v4090_v44 }
 0x156   : > { %v6266_v27 = vpop.f32.mrf.mxu1  ;;  %6469 = vmatmul.mubr.msk.bf16.gmra.mxu1 %vm763_vm2, %v5802_v34  ;;  %v6301_v40 = vpop.f32.mrf.mxu0 }
 0x157   : > { %v8823_v47 = vadd.f32 %v1653_v39, %v1225_v61  ;;  %v1246_v23 = vadd.f32 %v6266_v27, %v9504_v41  ;;  %6472 = vmatprep.mubr.msk.bf16.mxu1 %vm763_vm2, %v5803_v29 }
 0x158   : > { %v1237_v1 = vpop.f32.mrf.mxu1  ;;  %v1669_v17 = vpop.f32.mrf.mxu0 }
 0x159   : > { %v8829_v31 = vadd.f32 %v6300_v20, %v1246_v23  ;;  %v1238_v43 = vadd.f32 %v1237_v1, %v9505_v54 }
 0x15a   : > { %v6267_v45 = vpop.f32.mrf.mxu1  ;;  %v6304_v11 = vpop.f32.mrf.mxu0 }
 0x15b   : > { %v8832_v6 = vadd.f32 %v1666_v14, %v1238_v43  ;;  %v1249_v37 = vadd.f32 %v6267_v45, %v9506_v25 }
 0x15c   : > { %6507 = vmatmul.mubr.msk.bf16.gmra.mxu0 %vm763_vm2, %v5871_v9  ;;  %v1240_v33 = vpop.f32.mrf.mxu1  ;;  %v1682_v50 = vpop.f32.mrf.mxu0 }
 0x15d   : > { %v8836_v10 = vadd.f32 %v6301_v40, %v1249_v37  ;;  %v1241_v58 = vadd.f32 %v1240_v33, %v9507_v28 }
 0x15e   : > { %v6270_v63 = vpop.f32.mrf.mxu1  ;;  %6473 = vmatmul.mubr.msk.bf16.gmra.mxu1 %vm763_vm2, %v5804_v30  ;;  %v6305_v34 = vpop.f32.mrf.mxu0 }
 0x15f   : > { %v8840_v39 = vadd.f32 %v1669_v17, %v1241_v58  ;;  %v1262_v55 = vadd.f32 %v6270_v63, %v8426_v56 }
 0x160   : > { %v1253_v29 = vpop.f32.mrf.mxu1  ;;  %v1685_v20 = vpop.f32.mrf.mxu0 }
 0x161   : > { %v8843_v21 = vadd.f32 %v6304_v11, %v1262_v55  ;;  %v1254_v2 = vadd.f32 %v1253_v29, %v9508_v38 }
 0x162   : > { %v6271_v52 = vpop.f32.mrf.mxu1  ;;  %v6344_v22 = vpop.f32.mrf.mxu0 }
 0x163   : > { %v8846_v24 = vadd.f32 %v1682_v50, %v1254_v2  ;;  %v1265_v48 = vadd.f32 %v6271_v52, %v8457_v0 }
 0x164   : > { %v1256_v16 = vpop.f32.mrf.mxu1  ;;  %v2663_v14 = vpop.f32.mrf.mxu0 }
 0x165   : > { %v8849_v5 = vadd.f32 %v6305_v34, %v1265_v48  ;;  %v1257_v61 = vadd.f32 %v1256_v16, %v8479_v62 }
 0x166   : > { %v6310_v56 = vpop.f32.mrf.mxu1  ;;  %v6345_v41 = vpop.f32.mrf.mxu0 }
 0x167   : > { %v8852_v27 = vadd.f32 %v1685_v20, %v1257_v61  ;;  %v2062_v3 = vadd.f32 %v6310_v56, %v8526_v32 }
 0x168   : > { %v1933_v23 = vpop.f32.mrf.mxu1  ;;  %v2666_v9 = vpop.f32.mrf.mxu0 }
 0x169   : > { %v8855_v40 = vadd.f32 %v6344_v22, %v2062_v3  ;;  %v2060_v44 = vadd.f32 %v1933_v23, %v8537_v59 }
 0x16a   : > { %v6311_v0 = vpop.f32.mrf.mxu1  ;;  %v6348_v43 = vpop.f32.mrf.mxu0 }
 0x16b   : > { %v8858_v1 = vadd.f32 %v2663_v14, %v2060_v44  ;;  %v2063_v54 = vadd.f32 %v6311_v0, %v8553_v7 }
 0x16c   : > { %v1936_v62 = vpop.f32.mrf.mxu1  ;;  %v2679_v30 = vpop.f32.mrf.mxu0 }
 0x16d   : > { %v8861_v17 = vadd.f32 %v6345_v41, %v2063_v54  ;;  %v2061_v45 = vadd.f32 %v1936_v62, %v8571_v46 }
 0x16e   : > { %v6314_v32 = vpop.f32.mrf.mxu1  ;;  %v6349_v11 = vpop.f32.mrf.mxu0 }
 0x16f   : > { %v8864_v25 = vadd.f32 %v2666_v9, %v2061_v45  ;;  %v2066_v37 = vadd.f32 %v6314_v32, %v8586_v15  ;;  %v9510_v32 = vld [vmem:[#allocation9_spill] sm:$0xff] }
 0x170   : > { %v1949_v59 = vpop.f32.mrf.mxu1  ;;  %v2682_v58 = vpop.f32.mrf.mxu0 }
 0x171   : > { %v8867_v33 = vadd.f32 %v6348_v43, %v2066_v37  ;;  %v2064_v28 = vadd.f32 %v1949_v59, %v8592_v8  ;;  %v9509_v43 = vld [vmem:[#allocation7_spill] sm:$0xff] }
 0x172   : > { %v6315_v7 = vpop.f32.mrf.mxu1  ;;  %v6352_v55 = vpop.f32.mrf.mxu0 }
 0x173   : > { %v8870_v50 = vadd.f32 %v2679_v30, %v2064_v28  ;;  %v2067_v63 = vadd.f32 %v6315_v7, %v8617_v49  ;;  %v9511_v28 = vld [vmem:[#allocation5_spill] sm:$0xff] }
 0x174   : > { %v1952_v46 = vpop.f32.mrf.mxu1  ;;  %v2695_v38 = vpop.f32.mrf.mxu0 }
 0x175   : > { %v8873_v34 = vadd.f32 %v6349_v11, %v2067_v63  ;;  %v2065_v29 = vadd.f32 %v1952_v46, %v8630_v42 }
 0x176   : > { %v6318_v15 = vpop.f32.mrf.mxu1  ;;  %v6353_v52 = vpop.f32.mrf.mxu0 }
 0x177   : > { %v8876_v2 = vadd.f32 %v2682_v58, %v2065_v29  ;;  %v2070_v20 = vadd.f32 %v6318_v15, %v8651_v36 }
 0x178   : > { %v1965_v8 = vpop.f32.mrf.mxu1  ;;  %v2698_v16 = vpop.f32.mrf.mxu0 }
 0x179   : > { %v8879_v48 = vadd.f32 %v6352_v55, %v2070_v20  ;;  %v2068_v22 = vadd.f32 %v1965_v8, %v8661_v4 }
 0x17a   : > { %v6319_v49 = vpop.f32.mrf.mxu1  ;;  %v6356_v56 = vpop.f32.mrf.mxu0 }
 0x17b   : > { %v8882_v61 = vadd.f32 %v2695_v38, %v2068_v22  ;;  %v2071_v14 = vadd.f32 %v6319_v49, %v8680_v18 }
 0x17c   : > { %v1968_v42 = vpop.f32.mrf.mxu1  ;;  %v2711_v23 = vpop.f32.mrf.mxu0 }
 0x17d   : > { %v8885_v3 = vadd.f32 %v6353_v52, %v2071_v14  ;;  %v2069_v41 = vadd.f32 %v1968_v42, %v8698_v26 }
 0x17e   : > { %v6322_v36 = vpop.f32.mrf.mxu1  ;;  %v6357_v0 = vpop.f32.mrf.mxu0 }
 0x17f   : > { %v8888_v44 = vadd.f32 %v2698_v16, %v2069_v41  ;;  %v2074_v9 = vadd.f32 %v6322_v36, %v8706_v53 }
 0x180   : > { %v1981_v4 = vpop.f32.mrf.mxu1  ;;  %v2714_v45 = vpop.f32.mrf.mxu0 }
 0x181   : > { %v8891_v54 = vadd.f32 %v6356_v56, %v2074_v9  ;;  %v2072_v62 = vadd.f32 %v1981_v4, %v9509_v43 }
 0x182   : > { %v6323_v18 = vpop.f32.mrf.mxu1  ;;  %v6360_v11 = vpop.f32.mrf.mxu0 }
 0x183   : > { %v8894_v30 = vadd.f32 %v2711_v23, %v2072_v62  ;;  %v2075_v37 = vadd.f32 %v6323_v18, %v9510_v32 }
 0x184   : > { %v1984_v26 = vpop.f32.mrf.mxu1  ;;  %v2727_v7 = vpop.f32.mrf.mxu0 }
 0x185   : > { %v8897_v59 = vadd.f32 %v6357_v0, %v2075_v37  ;;  %v2073_v58 = vadd.f32 %v1984_v26, %v9511_v28 }
 0x186   : > { %v6326_v53 = vpop.f32.mrf.mxu1  ;;  %v6361_v46 = vpop.f32.mrf.mxu0 }
 0x187   : > { %v8900_v63 = vadd.f32 %v2714_v45, %v2073_v58  ;;  %v2078_v55 = vadd.f32 %v6326_v53, %v8760_v35 }
 0x188   : > { %v1997_v29 = vpop.f32.mrf.mxu1  ;;  %v2730_v20 = vpop.f32.mrf.mxu0 }
 0x189   : > { %v8903_v38 = vadd.f32 %v6360_v11, %v2078_v55  ;;  %v2076_v15 = vadd.f32 %v1997_v29, %v8763_v51 }
 0x18a   : > { %v6327_v52 = vpop.f32.mrf.mxu1  ;;  %v6364_v16 = vpop.f32.mrf.mxu0 }
 0x18b   : > { %v8906_v8 = vadd.f32 %v2727_v7, %v2076_v15  ;;  %v2079_v22 = vadd.f32 %v6327_v52, %v8782_v60 }
 0x18c   : > { %v2000_v49 = vpop.f32.mrf.mxu1  ;;  %v2743_v42 = vpop.f32.mrf.mxu0 }
 0x18d   : > { %v8909_v14 = vadd.f32 %v6361_v46, %v2079_v22  ;;  %v2077_v56 = vadd.f32 %v2000_v49, %v8798_v19 }
 0x18e   : > { %v6330_v35 = vpop.f32.mrf.mxu1  ;;  %v6365_v36 = vpop.f32.mrf.mxu0 }
 0x18f   : > { %v8912_v41 = vadd.f32 %v2730_v20, %v2077_v56  ;;  %v2082_v23 = vadd.f32 %v6330_v35, %v8804_v13 }
 0x190   : > { %v2013_v51 = vpop.f32.mrf.mxu1  ;;  %v2746_v4 = vpop.f32.mrf.mxu0 }
 0x191   : > { %v8915_v9 = vadd.f32 %v6364_v16, %v2082_v23  ;;  %v2080_v0 = vadd.f32 %v2013_v51, %v8807_v57 }
 0x192   : > { %v6331_v60 = vpop.f32.mrf.mxu1  ;;  %v6368_v45 = vpop.f32.mrf.mxu0 }
 0x193   : > { %v8918_v43 = vadd.f32 %v2743_v42, %v2080_v0  ;;  %v2083_v62 = vadd.f32 %v6331_v60, %v8816_v12 }
 0x194   : > { %v2016_v19 = vpop.f32.mrf.mxu1  ;;  %v2759_v37 = vpop.f32.mrf.mxu0 }
 0x195   : > { %9512 = vst [vmem:[#allocation16_spill] sm:$0xff] %v8918_v43  ;;  %v8921_v18 = vadd.f32 %v6365_v36, %v2083_v62  ;;  %v2081_v32 = vadd.f32 %v2016_v19, %v8823_v47 }
 0x196   : > { %v6334_v13 = vpop.f32.mrf.mxu1  ;;  %v6369_v28 = vpop.f32.mrf.mxu0 }
 0x197   : > { %9513 = vst [vmem:[#allocation13_spill] sm:$0xff] %v8921_v18  ;;  %v8924_v11 = vadd.f32 %v2746_v4, %v2081_v32  ;;  %v2086_v26 = vadd.f32 %v6334_v13, %v8829_v31 }
 0x198   : > { %v2029_v57 = vpop.f32.mrf.mxu1  ;;  %v2762_v53 = vpop.f32.mrf.mxu0 }
 0x199   : > { %9514 = vst [vmem:[#allocation15_spill] sm:$0xff] %v8924_v11  ;;  %v8927_v58 = vadd.f32 %v6368_v45, %v2086_v26  ;;  %v2084_v7 = vadd.f32 %v2029_v57, %v8832_v6 }
 0x19a   : > { %v6335_v12 = vpop.f32.mrf.mxu1  ;;  %v6372_v29 = vpop.f32.mrf.mxu0 }
 0x19b   : > { %v8930_v55 = vadd.f32 %v2759_v37, %v2084_v7  ;;  %v2087_v46 = vadd.f32 %v6335_v12, %v8836_v10 }
 0x19c   : > { %v2032_v47 = vpop.f32.mrf.mxu1  ;;  %v2775_v52 = vpop.f32.mrf.mxu0 }
 0x19d   : > { %9515 = vst [vmem:[#allocation18_spill] sm:$0xff] %v8930_v55  ;;  %v8933_v15 = vadd.f32 %v6369_v28, %v2087_v46  ;;  %v2085_v20 = vadd.f32 %v2032_v47, %v8840_v39 }
 0x19e   : > { %v6338_v31 = vpop.f32.mrf.mxu1  ;;  %v6373_v49 = vpop.f32.mrf.mxu0 }
 0x19f   : > { %9516 = vst [vmem:[#allocation20_spill] sm:$0xff] %v8933_v15  ;;  %v8936_v22 = vadd.f32 %v2762_v53, %v2085_v20  ;;  %v2090_v16 = vadd.f32 %v6338_v31, %v8843_v21 }
 0x1a0   : > { %v2045_v6 = vpop.f32.mrf.mxu1  ;;  %v2778_v35 = vpop.f32.mrf.mxu0 }
 0x1a1   : > { %9517 = vst [vmem:[#allocation3_spill] sm:$0xff] %v8936_v22  ;;  %v8939_v56 = vadd.f32 %v6372_v29, %v2090_v16  ;;  %v2088_v42 = vadd.f32 %v2045_v6, %v8846_v24 }
 0x1a2   : > { %v6339_v10 = vpop.f32.mrf.mxu1  ;;  %v6412_v51 = vpop.f32.mrf.mxu0 }
 0x1a3   : > { %v8942_v23 = vadd.f32 %v2775_v52, %v2088_v42  ;;  %v2091_v36 = vadd.f32 %v6339_v10, %v8849_v5 }
 0x1a4   : > { %v2048_v39 = vpop.f32.mrf.mxu1  ;;  %v3500_v60 = vpop.f32.mrf.mxu0 }
 0x1a5   : > { %9518 = vst [vmem:[#allocation12_spill] sm:$0xff] %v8942_v23  ;;  %v8945_v0 = vadd.f32 %v6373_v49, %v2091_v36  ;;  %v2089_v4 = vadd.f32 %v2048_v39, %v8852_v27 }
 0x1a6   : > { %v6378_v21 = vpop.f32.mrf.mxu1  ;;  %v8951_v19 = vpop.f32.mrf.mxu0 }
 0x1a7   : > { %9519 = vst [vmem:[#allocation4_spill] sm:$0xff] %v8945_v0  ;;  %v8948_v62 = vadd.f32 %v2778_v35, %v2089_v4  ;;  %v3266_v45 = vadd.f32 %v6378_v21, %v8855_v40 }
 0x1a8   : > { %v3137_v24 = vpop.f32.mrf.mxu1  ;;  %v8956_v5 = vpop.f32.mrf.mxu0 }
 0x1a9   : > { %9520 = vst [vmem:[#allocation6_spill] sm:$0xff] %v8948_v62  ;;  %v8953_v32 = vadd.f32 %v6412_v51, %v3266_v45  ;;  %v3264_v37 = vadd.f32 %v3137_v24, %v8858_v1 }
 0x1aa   : > { %v8958_v13 = vpop.f32.mrf.mxu1  ;;  %v6416_v27 = vpop.f32.mrf.mxu0 }
 0x1ab   : > { %v8960_v26 = vadd.f32 %v3500_v60, %v3264_v37 }
 0x1ac   : > { %v8962_v28 = vpop.f32.mrf.mxu1  ;;  %v8964_v57 = vpop.f32.mrf.mxu0 }
 0x1ae   : > { %v6382_v7 = vpop.f32.mrf.mxu1  ;;  %v8967_v53 = vpop.f32.mrf.mxu0 }
 0x1af   : > { %v3270_v40 = vadd.f32 %v6382_v7, %v8867_v33 }
 0x1b0   : > { %v8969_v12 = vpop.f32.mrf.mxu1  ;;  %v8973_v1 = vpop.f32.mrf.mxu0 }
 0x1b1   : > { %v8971_v46 = vadd.f32 %v6416_v27, %v3270_v40 }
 0x1b2   : > { %v8975_v29 = vpop.f32.mrf.mxu1  ;;  %v6420_v47 = vpop.f32.mrf.mxu0 }
 0x1b4   : > { %v8977_v20 = vpop.f32.mrf.mxu1  ;;  %v8979_v52 = vpop.f32.mrf.mxu0 }
 0x1b6   : > { %v6386_v31 = vpop.f32.mrf.mxu1  ;;  %v8982_v49 = vpop.f32.mrf.mxu0 }
 0x1b7   : > { %v3274_v16 = vadd.f32 %v6386_v31, %v8879_v48 }
 0x1b8   : > { %v8984_v33 = vpop.f32.mrf.mxu1  ;;  %v8988_v42 = vpop.f32.mrf.mxu0 }
 0x1b9   : > { %v8986_v6 = vadd.f32 %v6420_v47, %v3274_v16 }
 0x1ba   : > { %v8990_v35 = vpop.f32.mrf.mxu1  ;;  %v6424_v10 = vpop.f32.mrf.mxu0 }
 0x1bc   : > { %v8992_v36 = vpop.f32.mrf.mxu1  ;;  %v8994_v51 = vpop.f32.mrf.mxu0 }
 0x1be   : > { %v6390_v39 = vpop.f32.mrf.mxu1  ;;  %v8997_v60 = vpop.f32.mrf.mxu0 }
 0x1bf   : > { %v3278_v4 = vadd.f32 %v6390_v39, %v8891_v54 }
 0x1c0   : > { %v8999_v48 = vpop.f32.mrf.mxu1  ;;  %v9003_v45 = vpop.f32.mrf.mxu0 }
 0x1c1   : > { %v9001_v21 = vadd.f32 %v6424_v10, %v3278_v4 }
 0x1c2   : > { %v9005_v24 = vpop.f32.mrf.mxu1  ;;  %v6428_v37 = vpop.f32.mrf.mxu0 }
 0x1c4   : > { %v9007_v27 = vpop.f32.mrf.mxu1  ;;  %v9009_v7 = vpop.f32.mrf.mxu0 }
 0x1c6   : > { %v6394_v40 = vpop.f32.mrf.mxu1  ;;  %v9012_v31 = vpop.f32.mrf.mxu0 }
 0x1c7   : > { %v3282_v47 = vadd.f32 %v6394_v40, %v8903_v38 }
 0x1c8   : > { %v9014_v54 = vpop.f32.mrf.mxu1  ;;  %v9018_v10 = vpop.f32.mrf.mxu0 }
 0x1c9   : > { %v9016_v16 = vadd.f32 %v6428_v37, %v3282_v47  ;;  %9521 = vst [vmem:[#allocation8_spill] sm:$0xff] %v9018_v10 }
 0x1ca   : > { %v9020_v39 = vpop.f32.mrf.mxu1  ;;  %v6432_v4 = vpop.f32.mrf.mxu0 }
 0x1cc   : > { %v9022_v62 = vpop.f32.mrf.mxu1  ;;  %v9024_v0 = vpop.f32.mrf.mxu0 }
 0x1cd   : > { %9522 = vst [vmem:[#allocation10_spill] sm:$0xff] %v9024_v0 }
 0x1ce   : > { %v6398_v23 = vpop.f32.mrf.mxu1  ;;  %v9027_v15 = vpop.f32.mrf.mxu0 }
 0x1cf   : > { %v3286_v22 = vadd.f32 %v6398_v23, %v8915_v9  ;;  %9523 = vst [vmem:[#allocation11_spill] sm:$0xff] %v9027_v15 }
 0x1d0   : > { %v9029_v38 = vpop.f32.mrf.mxu1  ;;  %v9033_v37 = vpop.f32.mrf.mxu0 }
 0x1d1   : > { %v9031_v40 = vadd.f32 %v6432_v4, %v3286_v22  ;;  %9525 = vst [vmem:[#allocation14_spill] sm:$0xff] %v9033_v37 }
 0x1d2   : > { %v9035_v47 = vpop.f32.mrf.mxu1  ;;  %v6436_v55 = vpop.f32.mrf.mxu0 }
 0x1d3   : > { %9524 = vst [vmem:[#allocation2_spill] sm:$0xff] %v9031_v40  ;;  %9526 = vst [vmem:[#allocation17_spill] sm:$0xff] %v9035_v47 }
 0x1d4   : > { %v9037_v11 = vpop.f32.mrf.mxu1  ;;  %v9039_v18 = vpop.f32.mrf.mxu0 }
 0x1d5   : > { %9527 = vst [vmem:[#allocation19_spill] sm:$0xff] %v9037_v11  ;;  %9528 = vst [vmem:[#allocation21_spill] sm:$0xff] %v9039_v18 }
 0x1d6   : > { %v6402_v10 = vpop.f32.mrf.mxu1  ;;  %v9042_v43 = vpop.f32.mrf.mxu0 }
 0x1d7   : > { %v3290_v0 = vadd.f32 %v6402_v10, %v8927_v58  ;;  %9529 = vst [vmem:[#allocation22_spill] sm:$0xff] %v9042_v43 }
 0x1d8   : > { %v9044_v9 = vpop.f32.mrf.mxu1  ;;  %v9048_v22 = vpop.f32.mrf.mxu0 }
 0x1d9   : > { %v9046_v23 = vadd.f32 %v6436_v55, %v3290_v0  ;;  %9531 = vst [vmem:[#allocation9_spill] sm:$0xff] %v9048_v22 }
 0x1da   : > { %v9050_v4 = vpop.f32.mrf.mxu1  ;;  %v6440_v37 = vpop.f32.mrf.mxu0 }
 0x1db   : > { %9530 = vst [vmem:[#allocation7_spill] sm:$0xff] %v9046_v23  ;;  %9532 = vst [vmem:[#allocation5_spill] sm:$0xff] %v9050_v4 }
 0x1dc   : > { %v9052_v15 = vpop.f32.mrf.mxu1  ;;  %v9054_v40 = vpop.f32.mrf.mxu0 }
 0x1dd   : > { %9533 = vst [vmem:[#allocation23_spill] sm:$0xff] %v9052_v15  ;;  %9534 = vst [vmem:[#allocation24_spill] sm:$0xff] %v9054_v40  ;;  %v3267_v40 = vadd.f32 %v8958_v13, %v8861_v17 }
 0x1de   : > { %v6406_v11 = vpop.f32.mrf.mxu1  ;;  %v9057_v47 = vpop.f32.mrf.mxu0 }
 0x1df   : > { %v3294_v18 = vadd.f32 %v6406_v11, %v8939_v56  ;;  %9535 = vst [vmem:[#allocation25_spill] sm:$0xff] %v9057_v47  ;;  %v3265_v11 = vadd.f32 %v8962_v28, %v8864_v25  ;;  %v3271_v25 = vadd.f32 %v8975_v29, %v8873_v34 }
 0x1e0   : > { %v9059_v58 = vpop.f32.mrf.mxu1  ;;  %v9063_v55 = vpop.f32.mrf.mxu0 }
 0x1e1   : > { %9536 = vst [vmem:[#allocation26_spill] sm:$0xff] %v9059_v58  ;;  %v9061_v10 = vadd.f32 %v6440_v37, %v3294_v18  ;;  %9538 = vst [vmem:[#allocation28_spill] sm:$0xff] %v9063_v55  ;;  %v3630_v18 = vadd.f32 %v8951_v19, %v3267_v40 }
 0x1e2   : > { %v9065_v0 = vpop.f32.mrf.mxu1 }
 0x1e3   : > { %9537 = vst [vmem:[#allocation27_spill] sm:$0xff] %v9061_v10  ;;  %9539 = vst [vmem:[#allocation29_spill] sm:$0xff] %v9065_v0  ;;  %v6480_v22 = vpop.f32.mrf.mxu0  ;;  %v3268_v10 = vadd.f32 %v8969_v12, %v8870_v50 }
 0x1e4   : > { %v9067_v43 = vpop.f32.mrf.mxu1 }
 0x1e5   : > { %9540 = vst [vmem:[#allocation30_spill] sm:$0xff] %v9067_v43  ;;  %v4704_v23 = vpop.f32.mrf.mxu0  ;;  %v3628_v43 = vadd.f32 %v8956_v5, %v3265_v11  ;;  %v3631_v50 = vadd.f32 %v8964_v57, %v3268_v10  ;;  %v3275_v11 = vadd.f32 %v8990_v35, %v8885_v3 }
 0x1e6   : > { %v6446_v15 = vpop.f32.mrf.mxu1 }
 0x1e7   : > { %v6481_v56 = vpop.f32.mrf.mxu0  ;;  %v4359_v37 = vadd.f32 %v6446_v15, %v8953_v32 }
 0x1e8   : > { %v4230_v47 = vpop.f32.mrf.mxu1 }
 0x1e9   : > { %v4707_v55 = vpop.f32.mrf.mxu0  ;;  %v4357_v17 = vadd.f32 %v4230_v47, %v8960_v26  ;;  %v9082_v28 = vadd.f32 %v6480_v22, %v4359_v37  ;;  %v3269_v26 = vadd.f32 %v8977_v20, %v8876_v2  ;;  %v3634_v47 = vadd.f32 %v8967_v53, %v3271_v25 }
 0x1ea   : > { %v6447_v0 = vpop.f32.mrf.mxu1 }
 0x1eb   : > { %v4360_v13 = vadd.f32 %v6447_v0, %v3630_v18  ;;  %v6484_v58 = vpop.f32.mrf.mxu0  ;;  %v9094_v34 = vadd.f32 %v4704_v23, %v4357_v17 }
 0x1ec   : > { %v4233_v4 = vpop.f32.mrf.mxu1 }
 0x1ed   : > { %v9084_v19 = vadd.f32 %v6481_v56, %v4360_v13  ;;  %v4358_v15 = vadd.f32 %v4233_v4, %v3628_v43  ;;  %v4720_v32 = vpop.f32.mrf.mxu0  ;;  %v3272_v4 = vadd.f32 %v8984_v33, %v8882_v61 }
 0x1ee   : > { %v6450_v5 = vpop.f32.mrf.mxu1 }
 0x1ef   : > { %v5964_v12 = vpack.c.bf16 %v9084_v19, %v9082_v28  ;;  %v9098_v43 = vadd.f32 %v4707_v55, %v4358_v15  ;;  %v6485_v29 = vpop.f32.mrf.mxu0  ;;  %v4363_v57 = vadd.f32 %v6450_v5, %v8971_v46  ;;  %v3632_v55 = vadd.f32 %v8973_v1, %v3269_v26 }
 0x1f0   : > { %v4246_v40 = vpop.f32.mrf.mxu1  ;;  %v3635_v13 = vadd.f32 %v8979_v52, %v3272_v4  ;;  %v3273_v15 = vadd.f32 %v8992_v36, %v8888_v44  ;;  %v3638_v26 = vadd.f32 %v8982_v49, %v3275_v11  ;;  %v3279_v49 = vadd.f32 %v9005_v24, %v8897_v59 }
 0x1f1   : > { %6036 = vst [vmem:[%s9090_s22 + $0x8] sm:$0xff] %v5964_v12   ;;  %v5959_v22 = vpack.c.bf16 %v9098_v43, %v9094_v34  ;;  %v5023_v2 = vadd.f32 %v9098_v43, %v9094_v34  ;;  %v4361_v20 = vadd.f32 %v4246_v40, %v3631_v50  ;;  %v4723_v23 = vpop.f32.mrf.mxu0  ;;  %v9114_v56 = vadd.f32 %v6484_v58, %v4363_v57 }
 0x1f2   : > { %v6451_v10 = vpop.f32.mrf.mxu1  ;;  %v3636_v40 = vadd.f32 %v8988_v42, %v3273_v15 }
 0x1f3   : > { %5960 = vst [vmem:[%s9090_s22] sm:$0xff] %v5959_v22   ;;  %v5024_v46 = vadd.f32 %v5023_v2, %v9082_v28  ;;  %v4364_v0 = vadd.f32 %v6451_v10, %v3634_v47  ;;  %v6488_v53 = vpop.f32.mrf.mxu0  ;;  %v9116_v37 = vadd.f32 %v4720_v32, %v4361_v20 }
 0x1f4   : > { %v4249_v18 = vpop.f32.mrf.mxu1 }
 0x1f5   : > { %v5025_v17 = vadd.f32 %v5024_v46, %v9084_v19  ;;  %v9119_v61 = vadd.f32 %v6485_v29, %v4364_v0  ;;  %v4362_v33 = vadd.f32 %v4249_v18, %v3632_v55  ;;  %v4736_v1 = vpop.f32.mrf.mxu0  ;;  %v3276_v29 = vadd.f32 %v8999_v48, %v8894_v30 }
 0x1f6   : > { %v6454_v25 = vpop.f32.mrf.mxu1  ;;  %v3277_v46 = vadd.f32 %v9007_v27, %v8900_v63 }
 0x1f7   : > { %v5026_v3 = vadd.f32 %v5025_v17, %v9116_v37  ;;  %v5974_v35 = vpack.c.bf16 %v9119_v61, %v9114_v56  ;;  %v9127_v58 = vadd.f32 %v4723_v23, %v4362_v33  ;;  %v6489_v32 = vpop.f32.mrf.mxu0  ;;  %v4367_v50 = vadd.f32 %v6454_v25, %v8986_v6 }
 0x1f8   : > { %v4262_v5 = vpop.f32.mrf.mxu1  ;;  %v3639_v10 = vadd.f32 %v8994_v51, %v3276_v29  ;;  %v3642_v17 = vadd.f32 %v8997_v60, %v3279_v49  ;;  %v3640_v25 = vadd.f32 %v9003_v45, %v3277_v46  ;;  %v3283_v60 = vadd.f32 %v9020_v39, %v8909_v14 }
 0x1f9   : > { %6038 = vst [vmem:[%s9090_s22 + $0x18] sm:$0xff] %v5974_v35   ;;  %v5969_v52 = vpack.c.bf16 %v9127_v58, %v9116_v37  ;;  %v5027_v44 = vadd.f32 %v5026_v3, %v9127_v58  ;;  %v4365_v36 = vadd.f32 %v4262_v5, %v3635_v13  ;;  %v4739_v12 = vpop.f32.mrf.mxu0  ;;  %v9142_v2 = vadd.f32 %v6488_v53, %v4367_v50 }
 0x1fa   : > { %v6455_v57 = vpop.f32.mrf.mxu1 }
 0x1fb   : > { %6037 = vst [vmem:[%s9090_s22 + $0x10] sm:$0xff] %v5969_v52   ;;  %v5028_v6 = vadd.f32 %v5027_v44, %v9114_v56  ;;  %v4368_v47 = vadd.f32 %v6455_v57, %v3638_v26  ;;  %v6492_v22 = vpop.f32.mrf.mxu0  ;;  %v9144_v23 = vadd.f32 %v4736_v1, %v4365_v36  ;;  %v3280_v1 = vadd.f32 %v9014_v54, %v8906_v8 }
 0x1fc   : > { %v4265_v20 = vpop.f32.mrf.mxu1  ;;  %v3281_v44 = vadd.f32 %v9022_v62, %v8912_v41 }
 0x1fd   : > { %v5029_v4 = vadd.f32 %v5028_v6, %v9119_v61  ;;  %v9147_v30 = vadd.f32 %v6489_v32, %v4368_v47  ;;  %v4366_v48 = vadd.f32 %v4265_v20, %v3636_v40  ;;  %v4752_v42 = vpop.f32.mrf.mxu0  ;;  %v3643_v26 = vadd.f32 %v9009_v7, %v3280_v1  ;;  %v9541_v47 = vld [vmem:[#allocation16_spill] sm:$0xff] }
 0x1fe   : > { %v6458_v55 = vpop.f32.mrf.mxu1  ;;  %v3646_v40 = vadd.f32 %v9012_v31, %v3283_v60  ;;  %v9542_v20 = vld [vmem:[#allocation8_spill] sm:$0xff]  ;;  %v9543_v31 = vld [vmem:[#allocation13_spill] sm:$0xff] }
 0x1ff   : > { %v5030_v59 = vadd.f32 %v5029_v4, %v9144_v23  ;;  %v5984_v24 = vpack.c.bf16 %v9147_v30, %v9142_v2  ;;  %v9155_v0 = vadd.f32 %v4739_v12, %v4366_v48  ;;  %v6493_v53 = vpop.f32.mrf.mxu0  ;;  %v4371_v11 = vadd.f32 %v6458_v55, %v9001_v21 }
 0x200   : > { %v4278_v18 = vpop.f32.mrf.mxu1  ;;  %v3644_v4 = vadd.f32 %v9542_v20, %v3281_v44 }
 0x201   : > { %6040 = vst [vmem:[%s9090_s22 + $0x28] sm:$0xff] %v5984_v24   ;;  %v5979_v51 = vpack.c.bf16 %v9155_v0, %v9144_v23  ;;  %v5031_v63 = vadd.f32 %v5030_v59, %v9155_v0  ;;  %v4369_v27 = vadd.f32 %v4278_v18, %v3639_v10  ;;  %v4755_v33 = vpop.f32.mrf.mxu0  ;;  %v9170_v35 = vadd.f32 %v6492_v22, %v4371_v11  ;;  %v9544_v10 = vld [vmem:[#allocation17_spill] sm:$0xff] }
 0x202   : > { %v6459_v13 = vpop.f32.mrf.mxu1  ;;  %v3284_v22 = vadd.f32 %v9029_v38, %v9541_v47  ;;  %v3287_v55 = vadd.f32 %v9544_v10, %v9543_v31  ;;  %v9554_v31 = vld [vmem:[#allocation21_spill] sm:$0xff] }
 0x203   : > { %6039 = vst [vmem:[%s9090_s22 + $0x20] sm:$0xff] %v5979_v51   ;;  %v5032_v21 = vadd.f32 %v5031_v63, %v9142_v2  ;;  %v4372_v15 = vadd.f32 %v6459_v13, %v3642_v17  ;;  %v9172_v50 = vadd.f32 %v4752_v42, %v4369_v27  ;;  %v9545_v17 = vld [vmem:[#allocation10_spill] sm:$0xff]  ;;  %v9546_v27 = vld [vmem:[#allocation15_spill] sm:$0xff] }
 0x204   : > { %v6496_v3 = vpop.f32.mrf.mxu0  ;;  %v4281_v32 = vpop.f32.mrf.mxu1  ;;  %v3647_v51 = vadd.f32 %v9545_v17, %v3284_v22 }
 0x205   : > { %v5033_v5 = vadd.f32 %v5032_v21, %v9147_v30  ;;  %v9175_v8 = vadd.f32 %v6493_v53, %v4372_v15  ;;  %v4370_v54 = vadd.f32 %v4281_v32, %v3640_v25 }
 0x206   : > { %v4768_v45 = vpop.f32.mrf.mxu0  ;;  %v6462_v52 = vpop.f32.mrf.mxu1 }
 0x207   : > { %v5034_v14 = vadd.f32 %v5033_v5, %v9172_v50  ;;  %v5994_v39 = vpack.c.bf16 %v9175_v8, %v9170_v35  ;;  %v9183_v36 = vadd.f32 %v4755_v33, %v4370_v54  ;;  %v4375_v29 = vadd.f32 %v6462_v52, %v9016_v16  ;;  %v9547_v33 = vld [vmem:[#allocation19_spill] sm:$0xff] }
 0x208   : > { %v6497_v12 = vpop.f32.mrf.mxu0  ;;  %v4294_v57 = vpop.f32.mrf.mxu1  ;;  %v3285_v1 = vadd.f32 %v9547_v33, %v9546_v27  ;;  %v9549_v5 = vld [vmem:[#allocation11_spill] sm:$0xff] }
 0x209   : > { %6042 = vst [vmem:[%s9090_s22 + $0x38] sm:$0xff] %v5994_v39   ;;  %v5989_v7 = vpack.c.bf16 %v9183_v36, %v9172_v50  ;;  %v5035_v41 = vadd.f32 %v5034_v14, %v9183_v36  ;;  %v4373_v62 = vadd.f32 %v4294_v57, %v3643_v26  ;;  %v9198_v46 = vadd.f32 %v6496_v3, %v4375_v29  ;;  %v9548_v3 = vld [vmem:[#allocation2_spill] sm:$0xff] }
 0x20a   : > { %v4771_v6 = vpop.f32.mrf.mxu0  ;;  %v6463_v49 = vpop.f32.mrf.mxu1  ;;  %v3650_v54 = vadd.f32 %v9549_v5, %v3287_v55  ;;  %v9550_v14 = vld [vmem:[#allocation18_spill] sm:$0xff] }
 0x20b   : > { %6041 = vst [vmem:[%s9090_s22 + $0x30] sm:$0xff] %v5989_v7   ;;  %v5036_v16 = vadd.f32 %v5035_v41, %v9170_v35  ;;  %v4376_v48 = vadd.f32 %v6463_v49, %v3646_v40  ;;  %v9200_v24 = vadd.f32 %v4768_v45, %v4373_v62  ;;  %v3288_v39 = vadd.f32 %v9044_v9, %v9550_v14  ;;  %v9551_v29 = vld [vmem:[#allocation14_spill] sm:$0xff]  ;;  %v9552_v62 = vld [vmem:[#allocation20_spill] sm:$0xff] }
 0x20c   : > { %v6500_v42 = vpop.f32.mrf.mxu0  ;;  %v4297_v59 = vpop.f32.mrf.mxu1  ;;  %v3648_v57 = vadd.f32 %v9551_v29, %v3285_v1  ;;  %v9558_v1 = vld [vmem:[#allocation22_spill] sm:$0xff]  ;;  %v9563_v29 = vld [vmem:[#allocation29_spill] sm:$0xff] }
 0x20d   : > { %v5037_v53 = vadd.f32 %v5036_v16, %v9175_v8  ;;  %v9203_v38 = vadd.f32 %v6497_v12, %v4376_v48  ;;  %v4374_v11 = vadd.f32 %v4297_v59, %v3644_v4  ;;  %v3651_v10 = vadd.f32 %v9554_v31, %v3288_v39  ;;  %v9555_v59 = vld [vmem:[#allocation3_spill] sm:$0xff]  ;;  %v9560_v5 = vld [vmem:[#allocation26_spill] sm:$0xff] }
 0x20e   : > { %v4784_v18 = vpop.f32.mrf.mxu0  ;;  %v6466_v63 = vpop.f32.mrf.mxu1 }
 0x20f   : > { %v5038_v13 = vadd.f32 %v5037_v53, %v9200_v24  ;;  %v6004_v25 = vpack.c.bf16 %v9203_v38, %v9198_v46  ;;  %v9211_v21 = vadd.f32 %v4771_v6, %v4374_v11  ;;  %v4379_v60 = vadd.f32 %v6466_v63, %v9548_v3  ;;  %v9553_v6 = vld [vmem:[#allocation5_spill] sm:$0xff]  ;;  %v9556_v53 = vld [vmem:[#allocation23_spill] sm:$0xff] }
 0x210   : > { %v6501_v15 = vpop.f32.mrf.mxu0  ;;  %v4310_v32 = vpop.f32.mrf.mxu1  ;;  %v3291_v47 = vadd.f32 %v9553_v6, %v9552_v62  ;;  %v3289_v11 = vadd.f32 %v9556_v53, %v9555_v59  ;;  %v9557_v63 = vld [vmem:[#allocation7_spill] sm:$0xff]  ;;  %v9566_v59 = vld [vmem:[#allocation30_spill] sm:$0xff] }
 0x211   : > { %6044 = vst [vmem:[%s9090_s22 + $0x48] sm:$0xff] %v6004_v25   ;;  %v5999_v45 = vpack.c.bf16 %v9211_v21, %v9200_v24  ;;  %v5039_v26 = vadd.f32 %v5038_v13, %v9211_v21  ;;  %v4377_v52 = vadd.f32 %v4310_v32, %v3647_v51  ;;  %v9226_v22 = vadd.f32 %v6500_v42, %v4379_v60  ;;  %v9559_v32 = vld [vmem:[#allocation12_spill] sm:$0xff] }
 0x212   : > { %v4787_v44 = vpop.f32.mrf.mxu0  ;;  %v6467_v12 = vpop.f32.mrf.mxu1  ;;  %v3654_v13 = vadd.f32 %v9558_v1, %v3291_v47 }
 0x213   : > { %6043 = vst [vmem:[%s9090_s22 + $0x40] sm:$0xff] %v5999_v45   ;;  %v5040_v40 = vadd.f32 %v5039_v26, %v9198_v46  ;;  %v4380_v7 = vadd.f32 %v6467_v12, %v3650_v54  ;;  %v9228_v20 = vadd.f32 %v4784_v18, %v4377_v52  ;;  %v3292_v54 = vadd.f32 %v9560_v5, %v9559_v32  ;;  %v9561_v26 = vld [vmem:[#allocation9_spill] sm:$0xff]  ;;  %v9562_v12 = vld [vmem:[#allocation4_spill] sm:$0xff] }
 0x214   : > { %v6504_v41 = vpop.f32.mrf.mxu0  ;;  %v4313_v49 = vpop.f32.mrf.mxu1  ;;  %v3652_v52 = vadd.f32 %v9561_v26, %v3289_v11 }
 0x215   : > { %v5041_v4 = vadd.f32 %v5040_v40, %v9203_v38  ;;  %v9231_v9 = vadd.f32 %v6501_v15, %v4380_v7  ;;  %v4378_v16 = vadd.f32 %v4313_v49, %v3648_v57  ;;  %v3295_v57 = vadd.f32 %v9563_v29, %v9562_v12 }
 0x216   : > { %v4800_v48 = vpop.f32.mrf.mxu0  ;;  %v6470_v55 = vpop.f32.mrf.mxu1 }
 0x217   : > { %v5042_v42 = vadd.f32 %v5041_v4, %v9228_v20  ;;  %v6014_v17 = vpack.c.bf16 %v9231_v9, %v9226_v22  ;;  %v9239_v18 = vadd.f32 %v4787_v44, %v4378_v16  ;;  %v4383_v27 = vadd.f32 %v6470_v55, %v9557_v63  ;;  %v9564_v4 = vld [vmem:[#allocation24_spill] sm:$0xff]  ;;  %v9565_v55 = vld [vmem:[#allocation6_spill] sm:$0xff] }
 0x218   : > { %v6505_v51 = vpop.f32.mrf.mxu0  ;;  %v4326_v33 = vpop.f32.mrf.mxu1  ;;  %v3655_v16 = vadd.f32 %v9564_v4, %v3292_v54  ;;  %v3293_v53 = vadd.f32 %v9566_v59, %v9565_v55 }
 0x219   : > { %6046 = vst [vmem:[%s9090_s22 + $0x58] sm:$0xff] %v6014_v17   ;;  %v6009_v25 = vpack.c.bf16 %v9239_v18, %v9228_v20  ;;  %v5043_v15 = vadd.f32 %v5042_v42, %v9239_v18  ;;  %v4381_v3 = vadd.f32 %v4326_v33, %v3651_v10  ;;  %v9254_v40 = vadd.f32 %v6504_v41, %v4383_v27  ;;  %v9567_v42 = vld [vmem:[#allocation27_spill] sm:$0xff] }
 0x21a   : > { %v4803_v60 = vpop.f32.mrf.mxu0  ;;  %v6471_v45 = vpop.f32.mrf.mxu1 }
 0x21b   : > { %6045 = vst [vmem:[%s9090_s22 + $0x50] sm:$0xff] %v6009_v25   ;;  %v5044_v44 = vadd.f32 %v5043_v15, %v9226_v22  ;;  %v4384_v14 = vadd.f32 %v6471_v45, %v3654_v13  ;;  %v9256_v62 = vadd.f32 %v4800_v48, %v4381_v3  ;;  %v9569_v3 = vld [vmem:[#allocation28_spill] sm:$0xff] }
 0x21c   : > { %v6508_v39 = vpop.f32.mrf.mxu0  ;;  %v4329_v7 = vpop.f32.mrf.mxu1  ;;  %v3656_v32 = vadd.f32 %v9569_v3, %v3293_v53 }
 0x21d   : > { %v5045_v6 = vadd.f32 %v5044_v44, %v9231_v9  ;;  %v9259_v47 = vadd.f32 %v6505_v51, %v4384_v14  ;;  %v4382_v49 = vadd.f32 %v4329_v7, %v3652_v52  ;;  %v9568_v51 = vld [vmem:[#allocation25_spill] sm:$0xff] }
 0x21e   : > { %v6474_v31 = vpop.f32.mrf.mxu1  ;;  %v4816_v10 = vpop.f32.mrf.mxu0  ;;  %v3658_v27 = vadd.f32 %v9568_v51, %v3295_v57 }
 0x21f   : > { %v5046_v41 = vadd.f32 %v5045_v6, %v9256_v62  ;;  %v6024_v11 = vpack.c.bf16 %v9259_v47, %v9254_v40  ;;  %v4856_v48 = vadd.f32 %v4803_v60, %v4382_v49  ;;  %v4387_v17 = vadd.f32 %v6474_v31, %v9567_v42 }
 0x220   : > { %v4342_v63 = vpop.f32.mrf.mxu1  ;;  %v6509_v15 = vpop.f32.mrf.mxu0 }
 0x221   : > { %6048 = vst [vmem:[%s9090_s22 + $0x68] sm:$0xff] %v6024_v11   ;;  %v6019_v33 = vpack.c.bf16 %v4856_v48, %v9256_v62  ;;  %v5047_v1 = vadd.f32 %v5046_v41, %v4856_v48  ;;  %v4385_v13 = vadd.f32 %v4342_v63, %v3655_v16  ;;  %v4861_v54 = vadd.f32 %v6508_v39, %v4387_v17 }
 0x222   : > { %v6475_v25 = vpop.f32.mrf.mxu1  ;;  %v4819_v12 = vpop.f32.mrf.mxu0 }
 0x223   : > { %6047 = vst [vmem:[%s9090_s22 + $0x60] sm:$0xff] %v6019_v33   ;;  %v5048_v5 = vadd.f32 %v5047_v1, %v9254_v40  ;;  %v4388_v60 = vadd.f32 %v6475_v25, %v3658_v27  ;;  %v4859_v26 = vadd.f32 %v4816_v10, %v4385_v13 }
 0x224   : > { %v4345_v45 = vpop.f32.mrf.mxu1 }
 0x225   : > { %v5049_v52 = vadd.f32 %v5048_v5, %v9259_v47  ;;  %v4862_v44 = vadd.f32 %v6509_v15, %v4388_v60  ;;  %v4386_v14 = vadd.f32 %v4345_v45, %v3656_v32 }
 0x227   : > { %v5050_v29 = vadd.f32 %v5049_v52, %v4859_v26  ;;  %v6034_v57 = vpack.c.bf16 %v4862_v44, %v4861_v54  ;;  %v4860_v7 = vadd.f32 %v4819_v12, %v4386_v14 }
 0x229   : > { %6050 = vst [vmem:[%s9090_s22 + $0x78] sm:$0xff] %v6034_v57   ;;  %v6029_v6 = vpack.c.bf16 %v4860_v7, %v4859_v26  ;;  %v5051_v49 = vadd.f32 %v5050_v29, %v4860_v7 }
 0x22b   : > { %6049 = vst [vmem:[%s9090_s22 + $0x70] sm:$0xff] %v6029_v6   ;;  %v5052_v4 = vadd.f32 %v5051_v49, %v4861_v54 }
 0x22d   : > { %v5053_v16 = vadd.f32 %v5052_v4, %v4862_v44 }
 0x22f   : > { %v5054_v31 = vrot.slane %v5053_v16, 4 }
 0x231   : > { %v5055_v55 = vadd.f32 %v5054_v31, %v5053_v16 }
 0x233   : > { %v5056_v39 = vrot.slane %v5055_v55, 2 }
 0x235   : > { %v5057_v59 = vadd.f32 %v5056_v39, %v5055_v55 }
 0x237   : > { %v5058_v10 = vrot.slane %v5057_v59, 1 }
 0x239   : > { %v5059_v53 = vadd.f32 %v5058_v10, %v5057_v59 }
 0x23b   : > { %v5060_v41 = vmul.f32 0.00390625, %v5059_v53 }
 0x23d   : > { %5093 = vst [vmem:[%s261_s25] sm:$0x1] %v5060_v41  ;;  %v5069_v11 = vsub.f32 %v9144_v23, %v5060_v41  ;;  %v5070_v42 = vsub.f32 %v9155_v0, %v5060_v41  ;;  %v5071_v17 = vsub.f32 %v9142_v2, %v5060_v41  ;;  %v5072_v63 = vsub.f32 %v9147_v30, %v5060_v41 }
 0x23e   : > { %v5073_v51 = vsub.f32 %v9172_v50, %v5060_v41  ;;  %v5074_v27 = vsub.f32 %v9183_v36, %v5060_v41  ;;  %v5075_v33 = vsub.f32 %v9170_v35, %v5060_v41  ;;  %v5076_v1 = vsub.f32 %v9175_v8, %v5060_v41 }
 0x23f   : > { %v5077_v13 = vsub.f32 %v9200_v24, %v5060_v41  ;;  %v5078_v25 = vsub.f32 %v9211_v21, %v5060_v41  ;;  %v5079_v23 = vsub.f32 %v9198_v46, %v5060_v41  ;;  %v5080_v0 = vsub.f32 %v9203_v38, %v5060_v41 }
 0x240   : > { %v5081_v2 = vsub.f32 %v9228_v20, %v5060_v41  ;;  %v5082_v30 = vsub.f32 %v9239_v18, %v5060_v41  ;;  %v5083_v50 = vsub.f32 %v9226_v22, %v5060_v41  ;;  %v5084_v36 = vsub.f32 %v9231_v9, %v5060_v41 }
 0x241   : > { %v5085_v35 = vsub.f32 %v9256_v62, %v5060_v41  ;;  %v9298_v15 = vsub.f32 %v4856_v48, %v5060_v41  ;;  %v9301_v8 = vsub.f32 %v9254_v40, %v5060_v41  ;;  %v9304_v24 = vsub.f32 %v9259_v47, %v5060_v41 }
 0x242   : > { %v9306_v46 = vsub.f32 %v4859_v26, %v5060_v41  ;;  %v9308_v38 = vsub.f32 %v4860_v7, %v5060_v41  ;;  %v9310_v21 = vsub.f32 %v4861_v54, %v5060_v41  ;;  %v9312_v20 = vsub.f32 %v4862_v44, %v5060_v41 }
 0x243   : > { %v5061_v22 = vsub.f32 %v9094_v34, %v5060_v41  ;;  %v5062_v9 = vsub.f32 %v9098_v43, %v5060_v41  ;;  %v5063_v18 = vsub.f32 %v9082_v28, %v5060_v41  ;;  %v5064_v48 = vsub.f32 %v9084_v19, %v5060_v41 }
 0x244   : > { %v5065_v47 = vsub.f32 %v9116_v37, %v5060_v41  ;;  %v5066_v5 = vsub.f32 %v9127_v58, %v5060_v41  ;;  %v5067_v45 = vsub.f32 %v9114_v56, %v5060_v41  ;;  %v5068_v43 = vsub.f32 %v9119_v61, %v5060_v41 }
 0x245   : > { %v5094_v62 = vmul.f32 %v5061_v22, %v5061_v22  ;;  %v5095_v40 = vmul.f32 %v5062_v9, %v5062_v9  ;;  %v5096_v3 = vmul.f32 %v5063_v18, %v5063_v18  ;;  %v5097_v60 = vmul.f32 %v5064_v48, %v5064_v48 }
 0x246   : > { %v5098_v26 = vmul.f32 %v5065_v47, %v5065_v47  ;;  %v5099_v52 = vmul.f32 %v5066_v5, %v5066_v5  ;;  %v5100_v44 = vmul.f32 %v5067_v45, %v5067_v45  ;;  %v5101_v12 = vmul.f32 %v5068_v43, %v5068_v43 }
 0x247   : > { %v5126_v32 = vadd.f32 %v5095_v40, %v5094_v62  ;;  %v5102_v29 = vmul.f32 %v5069_v11, %v5069_v11  ;;  %v5103_v57 = vmul.f32 %v5070_v42, %v5070_v42  ;;  %v5104_v6 = vmul.f32 %v5071_v17, %v5071_v17 }
 0x248   : > { %v5105_v49 = vmul.f32 %v5072_v63, %v5072_v63  ;;  %v5106_v16 = vmul.f32 %v5073_v51, %v5073_v51  ;;  %v5107_v31 = vmul.f32 %v5074_v27, %v5074_v27  ;;  %v5108_v39 = vmul.f32 %v5075_v33, %v5075_v33 }
 0x249   : > { %v5127_v54 = vadd.f32 %v5126_v32, %v5096_v3  ;;  %v5109_v59 = vmul.f32 %v5076_v1, %v5076_v1  ;;  %v5110_v53 = vmul.f32 %v5077_v13, %v5077_v13  ;;  %v5111_v22 = vmul.f32 %v5078_v25, %v5078_v25 }
 0x24a   : > { %v5112_v11 = vmul.f32 %v5079_v23, %v5079_v23  ;;  %v5113_v42 = vmul.f32 %v5080_v0, %v5080_v0  ;;  %v5114_v17 = vmul.f32 %v5081_v2, %v5081_v2  ;;  %v5115_v63 = vmul.f32 %v5082_v30, %v5082_v30 }
 0x24b   : > { %v5128_v34 = vadd.f32 %v5127_v54, %v5097_v60  ;;  %v5116_v51 = vmul.f32 %v5083_v50, %v5083_v50  ;;  %v5117_v27 = vmul.f32 %v5084_v36, %v5084_v36  ;;  %v5118_v33 = vmul.f32 %v5085_v35, %v5085_v35 }
 0x24c   : > { %v5119_v1 = vmul.f32 %v9298_v15, %v9298_v15  ;;  %v5120_v25 = vmul.f32 %v9301_v8, %v9301_v8  ;;  %v5121_v0 = vmul.f32 %v9304_v24, %v9304_v24  ;;  %v5122_v30 = vmul.f32 %v9306_v46, %v9306_v46 }
 0x24d   : > { %v5129_v28 = vadd.f32 %v5128_v34, %v5098_v26  ;;  %v5123_v36 = vmul.f32 %v9308_v38, %v9308_v38  ;;  %v5124_v15 = vmul.f32 %v9310_v21, %v9310_v21  ;;  %v5125_v8 = vmul.f32 %v9312_v20, %v9312_v20 }
 0x24f   : > { %v5130_v14 = vadd.f32 %v5129_v28, %v5099_v52 }
 0x251   : > { %v5131_v19 = vadd.f32 %v5130_v14, %v5100_v44 }
 0x253   : > { %v5132_v37 = vadd.f32 %v5131_v19, %v5101_v12 }
 0x255   : > { %v5133_v7 = vadd.f32 %v5132_v37, %v5102_v29 }
 0x257   : > { %v5134_v58 = vadd.f32 %v5133_v7, %v5103_v57 }
 0x259   : > { %v5135_v4 = vadd.f32 %v5134_v58, %v5104_v6 }
 0x25b   : > { %v5136_v56 = vadd.f32 %v5135_v4, %v5105_v49 }
 0x25d   : > { %v5137_v55 = vadd.f32 %v5136_v56, %v5106_v16 }
 0x25f   : > { %v5138_v61 = vadd.f32 %v5137_v55, %v5107_v31 }
 0x261   : > { %v5139_v10 = vadd.f32 %v5138_v61, %v5108_v39 }
 0x263   : > { %v5140_v41 = vadd.f32 %v5139_v10, %v5109_v59 }
 0x265   : > { %v5141_v9 = vadd.f32 %v5140_v41, %v5110_v53 }
 0x267   : > { %v5142_v18 = vadd.f32 %v5141_v9, %v5111_v22 }
 0x269   : > { %v5143_v62 = vadd.f32 %v5142_v18, %v5112_v11 }
 0x26b   : > { %v5144_v40 = vadd.f32 %v5143_v62, %v5113_v42 }
 0x26d   : > { %v5145_v48 = vadd.f32 %v5144_v40, %v5114_v17 }
 0x26f   : > { %v5146_v47 = vadd.f32 %v5145_v48, %v5115_v63 }
 0x271   : > { %v5147_v3 = vadd.f32 %v5146_v47, %v5116_v51 }
 0x273   : > { %v5148_v32 = vadd.f32 %v5147_v3, %v5117_v27 }
 0x275   : > { %v5149_v13 = vadd.f32 %v5148_v32, %v5118_v33 }
 0x277   : > { %v5150_v23 = vadd.f32 %v5149_v13, %v5119_v1 }
 0x279   : > { %v5151_v2 = vadd.f32 %v5150_v23, %v5120_v25 }
 0x27b   : > { %v5152_v50 = vadd.f32 %v5151_v2, %v5121_v0 }
 0x27d   : > { %v5153_v35 = vadd.f32 %v5152_v50, %v5122_v30 }
 0x27f   : > { %v5154_v5 = vadd.f32 %v5153_v35, %v5123_v36 }
 0x281   : > { %v5155_v60 = vadd.f32 %v5154_v5, %v5124_v15 }
 0x283   : > { %v5156_v54 = vadd.f32 %v5155_v60, %v5125_v8 }
 0x285   : > { %v5157_v24 = vrot.slane %v5156_v54, 4 }
 0x287   : > { %v5158_v45 = vadd.f32 %v5157_v24, %v5156_v54 }
 0x289   : > { %v5159_v26 = vrot.slane %v5158_v45, 2 }
 0x28b   : > { %v5160_v34 = vadd.f32 %v5159_v26, %v5158_v45 }
 0x28d   : > { %v5161_v43 = vrot.slane %v5160_v34, 1 }
 0x28f   : > { %v5162_v46 = vadd.f32 %v5161_v43, %v5160_v34 }
 0x291   : > { %5163 = vst [vmem:[%s267_s28] sm:$0x1] %v5162_v46 }
 0x292 PF: > { %s15_s17 = sadd.s32 1, %s6621_s17   ;;  %s9570_s15 = smov %s6617_s16 }
 0x293   : > { %p12_p5 = scmp.ge.s32.totalorder %s15_s17, 4   ;;  %s9571_s16 = smov %s9573_s18 }
 0x295   :  { %14 = sbr.rel (!%p12_p5) target bundleno = 2 (0x2), region = 95 }

</bundles_post_ra>
